<compile_context>
chip_gen: v7x
topology: tpu7x:2x2x1
jax: 0.10.0
libtpu: 0.0.40
codegen_flags: <defaults>
</compile_context>

<pallas_src>
import math

import jax
import jax.numpy as jnp
from jax.experimental import pallas as pl
from jax.experimental.pallas import tpu as pltpu


# ----------------------------------------------------------------------------
# Weight-slab layout (all offsets are static Python ints, 8-row aligned)
# ----------------------------------------------------------------------------
_MHA_BLOCKS = ("enc_sa", "d1_sa", "d1_ca", "d2_sa", "d2_ca")
_FFN_BLOCKS = ("enc_ffn", "d1_ffn", "d2_ffn")


def _align8(n):
    return ((n + 7) // 8) * 8


def _slab_layout(F, W, dff, out_lanes):
    D = 2 * F
    width = max(out_lanes, D, dff, F)
    off = 0
    layout = {}

    def put(name, rows, cols):
        nonlocal off
        layout[name] = (off, rows, cols)
        off += _align8(rows)

    for blk in _MHA_BLOCKS:
        for m in ("wq", "wk", "wv", "wo"):
            put(f"{blk}.{m}", D, D)
        put(f"{blk}.bias", 4, D)                  # rows: bq, bk, bv, bo
    for blk in _FFN_BLOCKS:
        put(f"{blk}.w1", D, dff)
        put(f"{blk}.w2", dff, D)
        put(f"{blk}.bias", 2, max(D, dff))        # row0 = b1, row1 = b2
    put("fcn.w", D, F)
    put("fcn.b", 1, F)
    put("pe", W, D)
    put("cat_lo", F, D)                           # sqrt(F)-scaled src selector
    put("cat_hi", F, D)                           # sqrt(F)-scaled c selector
    put("rep", F, D)                              # tgt.repeat(1,1,2) selector
    put("qmask", F * W, D)                        # head masks, query-stacked
    for i in range(3):
        put(f"pack{i}", F, out_lanes)             # lane-dense output packers
    layout["_rows"] = off
    layout["_width"] = width
    return layout


def pack_params(params):
    """Pack weights + constant selectors into a single (rows, 128) f32 slab."""
    F = params["fcn"]["w"].shape[1]
    D = 2 * F
    W = params["pe"].shape[0]
    dff = params["enc"]["w1"].shape[1]
    nhead = F
    dh = D // nhead
    attn_scale = 1.0 / math.sqrt(dh)
    in_scale = math.sqrt(float(F))
    out_lanes = max(128, _align8(3 * F) if 3 * F <= 128 else
                    ((3 * F + 127) // 128) * 128)
    layout = _slab_layout(F, W, dff, out_lanes)
    slab = jnp.zeros((layout["_rows"], layout["_width"]), jnp.float32)

    def place(s, name, arr):
        off, r, c = layout[name]
        return s.at[off:off + r, 0:c].set(jnp.asarray(arr, jnp.float32))

    mha_src = {"enc_sa": params["enc"], "d1_sa": params["dec1"]["sa"],
               "d1_ca": params["dec1"]["ca"], "d2_sa": params["dec2"]["sa"],
               "d2_ca": params["dec2"]["ca"]}
    for blk, p in mha_src.items():
        slab = place(slab, f"{blk}.wq", p["wq"] * attn_scale)   # fold 1/sqrt(dh)
        slab = place(slab, f"{blk}.wk", p["wk"])
        slab = place(slab, f"{blk}.wv", p["wv"])
        slab = place(slab, f"{blk}.wo", p["wo"])
        bias = jnp.concatenate(
            [p["bq"] * attn_scale, p["bk"], p["bv"], p["bo"]], axis=0)
        slab = place(slab, f"{blk}.bias", bias)

    ffn_src = {"enc_ffn": params["enc"], "d1_ffn": params["dec1"],
               "d2_ffn": params["dec2"]}
    for blk, p in ffn_src.items():
        slab = place(slab, f"{blk}.w1", p["w1"])
        slab = place(slab, f"{blk}.w2", p["w2"])
        bias = jnp.zeros((2, max(D, dff)), jnp.float32)
        bias = bias.at[0, :dff].set(p["b1"][0])
        bias = bias.at[1, :D].set(p["b2"][0])
        slab = place(slab, f"{blk}.bias", bias)

    slab = place(slab, "fcn.w", params["fcn"]["w"])
    slab = place(slab, "fcn.b", params["fcn"]["b"])
    slab = place(slab, "pe", params["pe"])

    eyeF = jnp.eye(F, dtype=jnp.float32)
    zlo = jnp.zeros((F, D), jnp.float32).at[:, :F].set(eyeF)
    zhi = jnp.zeros((F, D), jnp.float32).at[:, F:].set(eyeF)
    slab = place(slab, "cat_lo", zlo * in_scale)   # fold sqrt(F) into selector
    slab = place(slab, "cat_hi", zhi * in_scale)
    slab = place(slab, "rep", zlo + zhi)
    head_of_col = jnp.arange(D) // dh
    head_of_row = jnp.repeat(jnp.arange(nhead), W)
    qmask = (head_of_row[:, None] == head_of_col[None, :]).astype(jnp.float32)
    slab = place(slab, "qmask", qmask)
    for i in range(3):
        pk = jnp.zeros((F, out_lanes), jnp.float32
                       ).at[:, i * F:(i + 1) * F].set(eyeF)
        slab = place(slab, f"pack{i}", pk)

    dims = {"F": F, "W": W, "D": D, "dff": dff, "out_lanes": out_lanes}
    return slab, layout, dims


# ----------------------------------------------------------------------------
# Fused kernel: whole TranAD forward for one batch tile of Bb elements
# ----------------------------------------------------------------------------
def _make_kernel(layout, F, W, dff, out_lanes):
    D = 2 * F
    nhead = F

    def kernel(src_ref, tgt_ref, slab_ref, out_ref):
        Bb = src_ref.shape[0]

        def ld(name):
            off, r, c = layout[name]
            return slab_ref[off:off + r, 0:c]

        def recip(x):
            r = pl.reciprocal(x, approx=True)      # EUP slot
            return r * (2.0 - x * r)               # 1 Newton step -> ~f32 exact

        # ---- one slab -> static slices (no per-tensor DMAs) -----------------
        mha_p = {}
        for blk in _MHA_BLOCKS:
            b = ld(f"{blk}.bias")
            mha_p[blk] = (ld(f"{blk}.wq"), ld(f"{blk}.wk"), ld(f"{blk}.wv"),
                          ld(f"{blk}.wo"),
                          b[0:1, :], b[1:2, :], b[2:3, :], b[3:4, :])
        ffn_p = {}
        for blk in _FFN_BLOCKS:
            b = ld(f"{blk}.bias")
            ffn_p[blk] = (ld(f"{blk}.w1"), b[0:1, 0:dff],
                          ld(f"{blk}.w2"), b[1:2, 0:D])
        fcn_w, fcn_b = ld("fcn.w"), ld("fcn.b")
        pe = ld("pe")                              # (W, D)
        cat_lo, cat_hi, rep = ld("cat_lo"), ld("cat_hi"), ld("rep")
        qmask = ld("qmask")                        # (nhead*W, D)
        packs = [ld(f"pack{i}") for i in range(3)]

        src2d = src_ref[...].reshape(Bb * W, F)
        tgt2d = tgt_ref[...].reshape(Bb * W, F)

        def mha(xq, xkv, p):
            """nn.MultiheadAttention (nhead=F, head_dim=2); heads folded along
            the query/row axis -> one score matmul, one softmax pipeline and
            one context matmul per attention block."""
            wq, wk, wv, wo, bq, bk, bv, bo = p
            Lq, Lk = xq.shape[1], xkv.shape[1]
            q = (jnp.dot(xq.reshape(Bb * Lq, D), wq,
                         preferred_element_type=jnp.float32) + bq
                 ).reshape(Bb, Lq, D)              # 1/sqrt(dh) folded into wq/bq
            k = (jnp.dot(xkv.reshape(Bb * Lk, D), wk,
                         preferred_element_type=jnp.float32) + bk
                 ).reshape(Bb, Lk, D)
            v = (jnp.dot(xkv.reshape(Bb * Lk, D), wv,
                         preferred_element_type=jnp.float32) + bv
                 ).reshape(Bb, Lk, D)
            # q_st[b, h*Lq+i, :] = q[b, i, :] masked to head h's columns.
            q_st = jnp.concatenate([q] * nhead, axis=1) * qmask  # (Bb,nh*Lq,D)
            s = jnp.einsum("bqd,bkd->bqk", q_st, k,
                           preferred_element_type=jnp.float32)   # (Bb,nh*Lq,Lk)
            s = s - jnp.max(s, axis=-1, keepdims=True)           # per-(head,q)
            pr = jnp.exp(s)
            pr = pr * recip(jnp.sum(pr, axis=-1, keepdims=True))
            ctx_st = jnp.einsum("bqk,bkd->bqd", pr, v,
                                preferred_element_type=jnp.float32)
            ctx_m = ctx_st * qmask                 # keep each head's columns
            ctx = ctx_m[:, 0:Lq, :]
            for h in range(1, nhead):
                ctx = ctx + ctx_m[:, h * Lq:(h + 1) * Lq, :]
            o = jnp.dot(ctx.reshape(Bb * Lq, D), wo,
                        preferred_element_type=jnp.float32) + bo
            return o.reshape(Bb, Lq, D)

        def ffn(x, p):
            w1, b1, w2, b2 = p
            L = x.shape[1]
            h = jnp.dot(x.reshape(Bb * L, D), w1,
                        preferred_element_type=jnp.float32) + b1
            # nn.LeakyReLU(True) -> negative_slope == 1.0 -> identity (omitted).
            o = jnp.dot(h, w2, preferred_element_type=jnp.float32) + b2
            return o.reshape(Bb, L, D)

        # tgt.repeat(1,1,2) and the sqrt(F)-scaled src half of cat((src, c), 2)
        tgt_rep = jnp.dot(tgt2d, rep,
                          preferred_element_type=jnp.float32).reshape(Bb, W, D)
        src_lo = jnp.dot(src2d, cat_lo, preferred_element_type=jnp.float32)

        def phase(c2d, sa, ca, ff):
            e2d = src_lo if c2d is None else src_lo + jnp.dot(
                c2d, cat_hi, preferred_element_type=jnp.float32)
            e = e2d.reshape(Bb, W, D) + pe
            # --- TransformerEncoderLayer (self-attn + FFN, no LayerNorm) ---
            mem = e + mha(e, e, mha_p["enc_sa"])
            mem = mem + ffn(mem, ffn_p["enc_ffn"])
            # --- TransformerDecoderLayer (self-attn + cross-attn + FFN) ---
            t = tgt_rep + mha(tgt_rep, tgt_rep, mha_p[sa])
            t = t + mha(t, mem, mha_p[ca])
            t = t + ffn(t, ffn_p[ff])
            # --- fcn: Linear(2F -> F) + Sigmoid (exp + reciprocal on EUP) ---
            z = jnp.dot(t.reshape(Bb * W, D), fcn_w,
                        preferred_element_type=jnp.float32) + fcn_b
            z = jnp.clip(z, -60.0, 60.0)
            return recip(1.0 + jnp.exp(-z))        # (Bb*W, F)

        x1 = phase(None, "d1_sa", "d1_ca", "d1_ffn")
        c1 = (x1 - src2d) ** 2
        x2 = phase(c1, "d2_sa", "d2_ca", "d2_ffn")
        logits = (x2 - tgt2d) ** 2

        # Lane-dense packing: [x1 | x2 | logits | zeros] -> 128 lanes, one
        # unmasked store per tile.
        packed = (jnp.dot(x1, packs[0], preferred_element_type=jnp.float32)
                  + jnp.dot(x2, packs[1], preferred_element_type=jnp.float32)
                  + jnp.dot(logits, packs[2],
                            preferred_element_type=jnp.float32))
        out_ref[...] = packed.reshape(Bb, W, out_lanes)

    return kernel


# ----------------------------------------------------------------------------
# pallas_call wrapper
# ----------------------------------------------------------------------------
def _tensorcores_per_chip():
    try:
        kind = jax.devices()[0].device_kind.lower()
    except Exception:
        return 1
    # Chips with two TensorCores per device: v4, v5p, v7x.
    if ("v4" in kind) or ("v5p" in kind) or ("v7" in kind) or ("7x" in kind):
        return 2
    return 1


def _pick_block_b(B):
    """Single grid step on single-TC chips (v5e/v6e); exactly two 'parallel'
    steps on dual-TC chips so both TensorCores get one tile. VMEM is not a
    constraint at this footprint (KBs), so no row cap."""
    if _tensorcores_per_chip() >= 2 and B % 2 == 0 and B >= 2:
        return B // 2
    return B


def run_tranad_fused(src_b, tgt_b, slab, layout, dims):
    B, W, F = src_b.shape
    out_lanes = dims["out_lanes"]
    Bb = _pick_block_b(B)
    kernel = _make_kernel(layout, F, W, dims["dff"], out_lanes)
    return pl.pallas_call(
        kernel,
        out_shape=jax.ShapeDtypeStruct((B, W, out_lanes), jnp.float32),
        grid=(B // Bb,),
        in_specs=[
            pl.BlockSpec((Bb, W, F), lambda b: (b, 0, 0)),
            pl.BlockSpec((Bb, W, F), lambda b: (b, 0, 0)),
            pl.BlockSpec(slab.shape, lambda b: (0, 0)),   # one weight slab DMA
        ],
        out_specs=pl.BlockSpec((Bb, W, out_lanes), lambda b: (b, 0, 0)),
        compiler_params=pltpu.CompilerParams(
            dimension_semantics=("parallel",)),
    )(src_b, tgt_b, slab)


@jax.jit
def tranad_forward(params, src, tgt):
    # src, tgt: (W, B, F), PyTorch (seq, batch, feature) convention.
    src_b = jnp.transpose(src, (1, 0, 2))
    tgt_b = jnp.transpose(tgt, (1, 0, 2))
    slab, layout, dims = pack_params(params)      # layout/dims are trace-static
    F = dims["F"]
    packed = run_tranad_fused(src_b, tgt_b, slab, layout, dims)   # (B, W, 128)
    to_torch = lambda a: jnp.transpose(a, (1, 0, 2))
    x1 = to_torch(packed[..., :F])
    x2 = to_torch(packed[..., F:2 * F])
    logits = to_torch(packed[..., 2 * F:3 * F])
    return x2, logits, {"x1": x1, "x2": x2}


# ----------------------------------------------------------------------------
# Parameters (deterministic synthetic init; shapes follow the PyTorch module)
# ----------------------------------------------------------------------------
def _uniform(key, shape, fan_in):
    b = 1.0 / math.sqrt(fan_in)
    return jax.random.uniform(key, shape, jnp.float32, minval=-b, maxval=b)


def _init_mha(key, d_model):
    ks = jax.random.split(key, 8)
    return {
        "wq": _uniform(ks[0], (d_model, d_model), d_model),
        "wk": _uniform(ks[1], (d_model, d_model), d_model),
        "wv": _uniform(ks[2], (d_model, d_model), d_model),
        "wo": _uniform(ks[3], (d_model, d_model), d_model),
        "bq": _uniform(ks[4], (1, d_model), d_model),
        "bk": _uniform(ks[5], (1, d_model), d_model),
        "bv": _uniform(ks[6], (1, d_model), d_model),
        "bo": _uniform(ks[7], (1, d_model), d_model),
    }


def _init_ffn(key, d_model, dff):
    k1, k2, k3, k4 = jax.random.split(key, 4)
    return {
        "w1": _uniform(k1, (d_model, dff), d_model),
        "b1": _uniform(k2, (1, dff), d_model),
        "w2": _uniform(k3, (dff, d_model), dff),
        "b2": _uniform(k4, (1, d_model), dff),
    }


def init_params(key, feats, n_window, dff=16):
    d_model = 2 * feats
    keys = jax.random.split(key, 9)
    # PositionalEncoding buffer (matches reference): pe[t,d] = sin(t*div[d]) +
    # cos(t*div[d]) with div = exp(arange(d_model) * -ln(1e4)/d_model).
    pos = jnp.arange(n_window, dtype=jnp.float32)[:, None]
    div = jnp.exp(jnp.arange(d_model, dtype=jnp.float32)
                  * (-math.log(10000.0) / d_model))
    pe = jnp.sin(pos * div) + jnp.cos(pos * div)          # (W, 2F)

    enc = {**_init_mha(keys[0], d_model), **_init_ffn(keys[1], d_model, dff)}
    dec1 = {"sa": _init_mha(keys[2], d_model),
            "ca": _init_mha(keys[3], d_model),
            **_init_ffn(keys[4], d_model, dff)}
    dec2 = {"sa": _init_mha(keys[5], d_model),
            "ca": _init_mha(keys[6], d_model),
            **_init_ffn(keys[7], d_model, dff)}
    kf1, kf2 = jax.random.split(keys[8])
    fcn = {"w": _uniform(kf1, (d_model, feats), d_model),
           "b": _uniform(kf2, (1, feats), d_model)}
    return {"pe": pe, "enc": enc, "dec1": dec1, "dec2": dec2, "fcn": fcn}


# ----------------------------------------------------------------------------
# Pure-JAX (XLA) reference of the same module, for an in-script cross-check
# ----------------------------------------------------------------------------
def _ref_mha(xq, xkv, p):
    B, Lq, D = xq.shape
    Lk = xkv.shape[1]
    nhead = D // 2
    dh = D // nhead
    q = (xq @ p["wq"] + p["bq"]).reshape(B, Lq, nhead, dh)
    k = (xkv @ p["wk"] + p["bk"]).reshape(B, Lk, nhead, dh)
    v = (xkv @ p["wv"] + p["bv"]).reshape(B, Lk, nhead, dh)
    s = jnp.einsum("bqhd,bkhd->bhqk", q, k) / math.sqrt(dh)
    a = jax.nn.softmax(s, axis=-1)
    ctx = jnp.einsum("bhqk,bkhd->bqhd", a, v).reshape(B, Lq, D)
    return ctx @ p["wo"] + p["bo"]


def _ref_ffn(x, p):
    h = x @ p["w1"] + p["b1"]          # LeakyReLU(slope=1.0) == identity
    return h @ p["w2"] + p["b2"]


def tranad_forward_ref(params, src, tgt):
    src_b = jnp.transpose(src, (1, 0, 2))
    tgt_b = jnp.transpose(tgt, (1, 0, 2))
    F = src_b.shape[-1]
    pe = params["pe"]
    tgt_rep = jnp.concatenate([tgt_b, tgt_b], axis=-1)

    def encode(c):
        e = jnp.concatenate([src_b, c], axis=-1) * math.sqrt(float(F)) + pe
        m = e + _ref_mha(e, e, params["enc"])
        return m + _ref_ffn(m, params["enc"])

    def decode(mem, dp):
        t = tgt_rep + _ref_mha(tgt_rep, tgt_rep, dp["sa"])
        t = t + _ref_mha(t, mem, dp["ca"])
        return t + _ref_ffn(t, dp)

    def fcn(x):
        return jax.nn.sigmoid(x @ params["fcn"]["w"] + params["fcn"]["b"])

    x1 = fcn(decode(encode(jnp.zeros_like(src_b)), params["dec1"]))
    c1 = (x1 - src_b) ** 2
    x2 = fcn(decode(encode(c1), params["dec2"]))
    logits = (x2 - tgt_b) ** 2
    tr = lambda a: jnp.transpose(a, (1, 0, 2))
    return tr(x1), tr(x2), tr(logits)


if __name__ == "__main__":
    feats, n_window, batch = 4, 8, 2
    key = jax.random.PRNGKey(0)
    k_src, k_tgt, k_par = jax.random.split(key, 3)
    src = jax.random.normal(k_src, (n_window, batch, feats), jnp.float32)
    tgt = jax.random.normal(k_tgt, (n_window, batch, feats), jnp.float32)
    params = init_params(k_par, feats, n_window)

    x2, logits, others = tranad_forward(params, src, tgt)
    jax.block_until_ready((x2, logits, others))

    assert x2.shape == (n_window, batch, feats)
    assert logits.shape == (n_window, batch, feats)
    assert bool(jnp.all(jnp.isfinite(x2))) and bool(jnp.all(jnp.isfinite(logits)))
    assert bool(jnp.all((x2 >= 0.0) & (x2 <= 1.0)))       # sigmoid output range
    # Internal consistency: kernel-side logits must equal (x2 - tgt)^2.
    assert bool(jnp.allclose(logits, (x2 - tgt) ** 2, atol=1e-5))
    # Cross-check against the pure-JAX reference.  Newton-refined reciprocals
    # make the kernel ~f32-exact, so the tolerance is tight.
    x1_r, x2_r, lg_r = tranad_forward_ref(params, src, tgt)
    assert bool(jnp.allclose(others["x1"], x1_r, atol=2e-3))
    assert bool(jnp.allclose(x2, x2_r, atol=2e-3))
    assert bool(jnp.allclose(logits, lg_r, atol=2e-3))
    print("KERNEL_OK")
</pallas_src>

<mosaic_0001>
module attributes {stable_mosaic.version = 11 : i64} {
  func.func @kernel(%arg0: i32, %arg1: memref<2x8x4xf32, #tpu.memory_space<vmem>>, %arg2: memref<2x8x4xf32, #tpu.memory_space<vmem>>, %arg3: memref<400x128xf32, #tpu.memory_space<vmem>>, %arg4: memref<2x8x128xf32, #tpu.memory_space<vmem>>) attributes {dimension_semantics = [#tpu.dimension_semantics<parallel>], iteration_bounds = array<i64: 1>, scalar_prefetch = 0 : i64, scratch_operands = 0 : i64, tpu.core_type = #tpu.core_type<tc>, window_params = [{transform_indices = @transform_0, window_bounds = array<i64: 2, 8, 4>}, {transform_indices = @transform_1, window_bounds = array<i64: 2, 8, 4>}, {pipeline_mode = #tpu.pipeline_mode<synchronous>, transform_indices = @transform_2, window_bounds = array<i64: 400, 128>}, {transform_indices = @transform_3, window_bounds = array<i64: 2, 8, 128>}]} {
    %c32 = arith.constant 32 : index
    %c0 = arith.constant 0 : index
    %0 = vector.load %arg3[%c32, %c0] : memref<400x128xf32, #tpu.memory_space<vmem>>, vector<4x8xf32>
    %c0_0 = arith.constant 0 : index
    %c0_1 = arith.constant 0 : index
    %1 = vector.load %arg3[%c0_0, %c0_1] : memref<400x128xf32, #tpu.memory_space<vmem>>, vector<8x8xf32>
    %c8 = arith.constant 8 : index
    %c0_2 = arith.constant 0 : index
    %2 = vector.load %arg3[%c8, %c0_2] : memref<400x128xf32, #tpu.memory_space<vmem>>, vector<8x8xf32>
    %c16 = arith.constant 16 : index
    %c0_3 = arith.constant 0 : index
    %3 = vector.load %arg3[%c16, %c0_3] : memref<400x128xf32, #tpu.memory_space<vmem>>, vector<8x8xf32>
    %c24 = arith.constant 24 : index
    %c0_4 = arith.constant 0 : index
    %4 = vector.load %arg3[%c24, %c0_4] : memref<400x128xf32, #tpu.memory_space<vmem>>, vector<8x8xf32>
    %5 = vector.extract_strided_slice %0 {offsets = [0, 0], sizes = [1, 8], strides = [1, 1]} : vector<4x8xf32> to vector<1x8xf32>
    %6 = vector.extract_strided_slice %0 {offsets = [1, 0], sizes = [1, 8], strides = [1, 1]} : vector<4x8xf32> to vector<1x8xf32>
    %7 = vector.extract_strided_slice %0 {offsets = [2, 0], sizes = [1, 8], strides = [1, 1]} : vector<4x8xf32> to vector<1x8xf32>
    %8 = vector.extract_strided_slice %0 {offsets = [3, 0], sizes = [1, 8], strides = [1, 1]} : vector<4x8xf32> to vector<1x8xf32>
    %c72 = arith.constant 72 : index
    %c0_5 = arith.constant 0 : index
    %9 = vector.load %arg3[%c72, %c0_5] : memref<400x128xf32, #tpu.memory_space<vmem>>, vector<4x8xf32>
    %c40 = arith.constant 40 : index
    %c0_6 = arith.constant 0 : index
    %10 = vector.load %arg3[%c40, %c0_6] : memref<400x128xf32, #tpu.memory_space<vmem>>, vector<8x8xf32>
    %c48 = arith.constant 48 : index
    %c0_7 = arith.constant 0 : index
    %11 = vector.load %arg3[%c48, %c0_7] : memref<400x128xf32, #tpu.memory_space<vmem>>, vector<8x8xf32>
    %c56 = arith.constant 56 : index
    %c0_8 = arith.constant 0 : index
    %12 = vector.load %arg3[%c56, %c0_8] : memref<400x128xf32, #tpu.memory_space<vmem>>, vector<8x8xf32>
    %c64 = arith.constant 64 : index
    %c0_9 = arith.constant 0 : index
    %13 = vector.load %arg3[%c64, %c0_9] : memref<400x128xf32, #tpu.memory_space<vmem>>, vector<8x8xf32>
    %14 = vector.extract_strided_slice %9 {offsets = [0, 0], sizes = [1, 8], strides = [1, 1]} : vector<4x8xf32> to vector<1x8xf32>
    %15 = vector.extract_strided_slice %9 {offsets = [1, 0], sizes = [1, 8], strides = [1, 1]} : vector<4x8xf32> to vector<1x8xf32>
    %16 = vector.extract_strided_slice %9 {offsets = [2, 0], sizes = [1, 8], strides = [1, 1]} : vector<4x8xf32> to vector<1x8xf32>
    %17 = vector.extract_strided_slice %9 {offsets = [3, 0], sizes = [1, 8], strides = [1, 1]} : vector<4x8xf32> to vector<1x8xf32>
    %c112 = arith.constant 112 : index
    %c0_10 = arith.constant 0 : index
    %18 = vector.load %arg3[%c112, %c0_10] : memref<400x128xf32, #tpu.memory_space<vmem>>, vector<4x8xf32>
    %c80 = arith.constant 80 : index
    %c0_11 = arith.constant 0 : index
    %19 = vector.load %arg3[%c80, %c0_11] : memref<400x128xf32, #tpu.memory_space<vmem>>, vector<8x8xf32>
    %c88 = arith.constant 88 : index
    %c0_12 = arith.constant 0 : index
    %20 = vector.load %arg3[%c88, %c0_12] : memref<400x128xf32, #tpu.memory_space<vmem>>, vector<8x8xf32>
    %c96 = arith.constant 96 : index
    %c0_13 = arith.constant 0 : index
    %21 = vector.load %arg3[%c96, %c0_13] : memref<400x128xf32, #tpu.memory_space<vmem>>, vector<8x8xf32>
    %c104 = arith.constant 104 : index
    %c0_14 = arith.constant 0 : index
    %22 = vector.load %arg3[%c104, %c0_14] : memref<400x128xf32, #tpu.memory_space<vmem>>, vector<8x8xf32>
    %23 = vector.extract_strided_slice %18 {offsets = [0, 0], sizes = [1, 8], strides = [1, 1]} : vector<4x8xf32> to vector<1x8xf32>
    %24 = vector.extract_strided_slice %18 {offsets = [1, 0], sizes = [1, 8], strides = [1, 1]} : vector<4x8xf32> to vector<1x8xf32>
    %25 = vector.extract_strided_slice %18 {offsets = [2, 0], sizes = [1, 8], strides = [1, 1]} : vector<4x8xf32> to vector<1x8xf32>
    %26 = vector.extract_strided_slice %18 {offsets = [3, 0], sizes = [1, 8], strides = [1, 1]} : vector<4x8xf32> to vector<1x8xf32>
    %c152 = arith.constant 152 : index
    %c0_15 = arith.constant 0 : index
    %27 = vector.load %arg3[%c152, %c0_15] : memref<400x128xf32, #tpu.memory_space<vmem>>, vector<4x8xf32>
    %c120 = arith.constant 120 : index
    %c0_16 = arith.constant 0 : index
    %28 = vector.load %arg3[%c120, %c0_16] : memref<400x128xf32, #tpu.memory_space<vmem>>, vector<8x8xf32>
    %c128 = arith.constant 128 : index
    %c0_17 = arith.constant 0 : index
    %29 = vector.load %arg3[%c128, %c0_17] : memref<400x128xf32, #tpu.memory_space<vmem>>, vector<8x8xf32>
    %c136 = arith.constant 136 : index
    %c0_18 = arith.constant 0 : index
    %30 = vector.load %arg3[%c136, %c0_18] : memref<400x128xf32, #tpu.memory_space<vmem>>, vector<8x8xf32>
    %c144 = arith.constant 144 : index
    %c0_19 = arith.constant 0 : index
    %31 = vector.load %arg3[%c144, %c0_19] : memref<400x128xf32, #tpu.memory_space<vmem>>, vector<8x8xf32>
    %32 = vector.extract_strided_slice %27 {offsets = [0, 0], sizes = [1, 8], strides = [1, 1]} : vector<4x8xf32> to vector<1x8xf32>
    %33 = vector.extract_strided_slice %27 {offsets = [1, 0], sizes = [1, 8], strides = [1, 1]} : vector<4x8xf32> to vector<1x8xf32>
    %34 = vector.extract_strided_slice %27 {offsets = [2, 0], sizes = [1, 8], strides = [1, 1]} : vector<4x8xf32> to vector<1x8xf32>
    %35 = vector.extract_strided_slice %27 {offsets = [3, 0], sizes = [1, 8], strides = [1, 1]} : vector<4x8xf32> to vector<1x8xf32>
    %c192 = arith.constant 192 : index
    %c0_20 = arith.constant 0 : index
    %36 = vector.load %arg3[%c192, %c0_20] : memref<400x128xf32, #tpu.memory_space<vmem>>, vector<4x8xf32>
    %c160 = arith.constant 160 : index
    %c0_21 = arith.constant 0 : index
    %37 = vector.load %arg3[%c160, %c0_21] : memref<400x128xf32, #tpu.memory_space<vmem>>, vector<8x8xf32>
    %c168 = arith.constant 168 : index
    %c0_22 = arith.constant 0 : index
    %38 = vector.load %arg3[%c168, %c0_22] : memref<400x128xf32, #tpu.memory_space<vmem>>, vector<8x8xf32>
    %c176 = arith.constant 176 : index
    %c0_23 = arith.constant 0 : index
    %39 = vector.load %arg3[%c176, %c0_23] : memref<400x128xf32, #tpu.memory_space<vmem>>, vector<8x8xf32>
    %c184 = arith.constant 184 : index
    %c0_24 = arith.constant 0 : index
    %40 = vector.load %arg3[%c184, %c0_24] : memref<400x128xf32, #tpu.memory_space<vmem>>, vector<8x8xf32>
    %41 = vector.extract_strided_slice %36 {offsets = [0, 0], sizes = [1, 8], strides = [1, 1]} : vector<4x8xf32> to vector<1x8xf32>
    %42 = vector.extract_strided_slice %36 {offsets = [1, 0], sizes = [1, 8], strides = [1, 1]} : vector<4x8xf32> to vector<1x8xf32>
    %43 = vector.extract_strided_slice %36 {offsets = [2, 0], sizes = [1, 8], strides = [1, 1]} : vector<4x8xf32> to vector<1x8xf32>
    %44 = vector.extract_strided_slice %36 {offsets = [3, 0], sizes = [1, 8], strides = [1, 1]} : vector<4x8xf32> to vector<1x8xf32>
    %c224 = arith.constant 224 : index
    %c0_25 = arith.constant 0 : index
    %45 = vector.load %arg3[%c224, %c0_25] : memref<400x128xf32, #tpu.memory_space<vmem>>, vector<2x16xf32>
    %c200 = arith.constant 200 : index
    %c0_26 = arith.constant 0 : index
    %46 = vector.load %arg3[%c200, %c0_26] : memref<400x128xf32, #tpu.memory_space<vmem>>, vector<8x16xf32>
    %47 = vector.extract_strided_slice %45 {offsets = [0, 0], sizes = [1, 16], strides = [1, 1]} : vector<2x16xf32> to vector<1x16xf32>
    %c208 = arith.constant 208 : index
    %c0_27 = arith.constant 0 : index
    %48 = vector.load %arg3[%c208, %c0_27] : memref<400x128xf32, #tpu.memory_space<vmem>>, vector<16x8xf32>
    %49 = vector.extract_strided_slice %45 {offsets = [1, 0], sizes = [1, 8], strides = [1, 1]} : vector<2x16xf32> to vector<1x8xf32>
    %c256 = arith.constant 256 : index
    %c0_28 = arith.constant 0 : index
    %50 = vector.load %arg3[%c256, %c0_28] : memref<400x128xf32, #tpu.memory_space<vmem>>, vector<2x16xf32>
    %c232 = arith.constant 232 : index
    %c0_29 = arith.constant 0 : index
    %51 = vector.load %arg3[%c232, %c0_29] : memref<400x128xf32, #tpu.memory_space<vmem>>, vector<8x16xf32>
    %52 = vector.extract_strided_slice %50 {offsets = [0, 0], sizes = [1, 16], strides = [1, 1]} : vector<2x16xf32> to vector<1x16xf32>
    %c240 = arith.constant 240 : index
    %c0_30 = arith.constant 0 : index
    %53 = vector.load %arg3[%c240, %c0_30] : memref<400x128xf32, #tpu.memory_space<vmem>>, vector<16x8xf32>
    %54 = vector.extract_strided_slice %50 {offsets = [1, 0], sizes = [1, 8], strides = [1, 1]} : vector<2x16xf32> to vector<1x8xf32>
    %c288 = arith.constant 288 : index
    %c0_31 = arith.constant 0 : index
    %55 = vector.load %arg3[%c288, %c0_31] : memref<400x128xf32, #tpu.memory_space<vmem>>, vector<2x16xf32>
    %c264 = arith.constant 264 : index
    %c0_32 = arith.constant 0 : index
    %56 = vector.load %arg3[%c264, %c0_32] : memref<400x128xf32, #tpu.memory_space<vmem>>, vector<8x16xf32>
    %57 = vector.extract_strided_slice %55 {offsets = [0, 0], sizes = [1, 16], strides = [1, 1]} : vector<2x16xf32> to vector<1x16xf32>
    %c272 = arith.constant 272 : index
    %c0_33 = arith.constant 0 : index
    %58 = vector.load %arg3[%c272, %c0_33] : memref<400x128xf32, #tpu.memory_space<vmem>>, vector<16x8xf32>
    %59 = vector.extract_strided_slice %55 {offsets = [1, 0], sizes = [1, 8], strides = [1, 1]} : vector<2x16xf32> to vector<1x8xf32>
    %c296 = arith.constant 296 : index
    %c0_34 = arith.constant 0 : index
    %60 = vector.load %arg3[%c296, %c0_34] : memref<400x128xf32, #tpu.memory_space<vmem>>, vector<8x4xf32>
    %c304 = arith.constant 304 : index
    %c0_35 = arith.constant 0 : index
    %61 = vector.load %arg3[%c304, %c0_35] : memref<400x128xf32, #tpu.memory_space<vmem>>, vector<1x4xf32>
    %c312 = arith.constant 312 : index
    %c0_36 = arith.constant 0 : index
    %62 = vector.load %arg3[%c312, %c0_36] : memref<400x128xf32, #tpu.memory_space<vmem>>, vector<8x8xf32>
    %c320 = arith.constant 320 : index
    %c0_37 = arith.constant 0 : index
    %63 = vector.load %arg3[%c320, %c0_37] : memref<400x128xf32, #tpu.memory_space<vmem>>, vector<4x8xf32>
    %c328 = arith.constant 328 : index
    %c0_38 = arith.constant 0 : index
    %64 = vector.load %arg3[%c328, %c0_38] : memref<400x128xf32, #tpu.memory_space<vmem>>, vector<4x8xf32>
    %c336 = arith.constant 336 : index
    %c0_39 = arith.constant 0 : index
    %65 = vector.load %arg3[%c336, %c0_39] : memref<400x128xf32, #tpu.memory_space<vmem>>, vector<4x8xf32>
    %c344 = arith.constant 344 : index
    %c0_40 = arith.constant 0 : index
    %66 = vector.load %arg3[%c344, %c0_40] : memref<400x128xf32, #tpu.memory_space<vmem>>, vector<32x8xf32>
    %c376 = arith.constant 376 : index
    %c0_41 = arith.constant 0 : index
    %67 = vector.load %arg3[%c376, %c0_41] : memref<400x128xf32, #tpu.memory_space<vmem>>, vector<4x128xf32>
    %c384 = arith.constant 384 : index
    %c0_42 = arith.constant 0 : index
    %68 = vector.load %arg3[%c384, %c0_42] : memref<400x128xf32, #tpu.memory_space<vmem>>, vector<4x128xf32>
    %c392 = arith.constant 392 : index
    %c0_43 = arith.constant 0 : index
    %69 = vector.load %arg3[%c392, %c0_43] : memref<400x128xf32, #tpu.memory_space<vmem>>, vector<4x128xf32>
    %c0_44 = arith.constant 0 : index
    %c0_45 = arith.constant 0 : index
    %c0_46 = arith.constant 0 : index
    %70 = vector.load %arg1[%c0_44, %c0_45, %c0_46] : memref<2x8x4xf32, #tpu.memory_space<vmem>>, vector<2x8x4xf32>
    %71 = vector.shape_cast %70 : vector<2x8x4xf32> to vector<16x4xf32>
    %c0_47 = arith.constant 0 : index
    %c0_48 = arith.constant 0 : index
    %c0_49 = arith.constant 0 : index
    %72 = vector.load %arg2[%c0_47, %c0_48, %c0_49] : memref<2x8x4xf32, #tpu.memory_space<vmem>>, vector<2x8x4xf32>
    %73 = vector.shape_cast %72 : vector<2x8x4xf32> to vector<16x4xf32>
    %cst = arith.constant dense<0.000000e+00> : vector<16x8xf32>
    %74 = tpu.matmul %73, %65, %cst {dimension_numbers = #tpu.dot_dimension_numbers<[1], [0], [0], [1], [0, 0, 1, 1], [], []>} : vector<16x4xf32>, vector<4x8xf32>, vector<16x8xf32> -> vector<16x8xf32>
    %75 = vector.shape_cast %74 : vector<16x8xf32> to vector<2x8x8xf32>
    %cst_50 = arith.constant dense<0.000000e+00> : vector<16x8xf32>
    %76 = tpu.matmul %71, %63, %cst_50 {dimension_numbers = #tpu.dot_dimension_numbers<[1], [0], [0], [1], [0, 0, 1, 1], [], []>} : vector<16x4xf32>, vector<4x8xf32>, vector<16x8xf32> -> vector<16x8xf32>
    %77 = vector.shape_cast %76 : vector<16x8xf32> to vector<2x8x8xf32>
    %78 = vector.shape_cast %62 : vector<8x8xf32> to vector<1x8x8xf32>
    %79 = vector.broadcast %78 : vector<1x8x8xf32> to vector<2x8x8xf32>
    %80 = arith.addf %77, %79 : vector<2x8x8xf32>
    %81 = vector.shape_cast %80 : vector<2x8x8xf32> to vector<16x8xf32>
    %cst_51 = arith.constant dense<0.000000e+00> : vector<16x8xf32>
    %82 = tpu.matmul %81, %1, %cst_51 {dimension_numbers = #tpu.dot_dimension_numbers<[1], [0], [0], [1], [0, 0, 1, 1], [], []>} : vector<16x8xf32>, vector<8x8xf32>, vector<16x8xf32> -> vector<16x8xf32>
    %83 = vector.broadcast %5 : vector<1x8xf32> to vector<16x8xf32>
    %84 = arith.addf %82, %83 : vector<16x8xf32>
    %85 = vector.shape_cast %84 : vector<16x8xf32> to vector<2x8x8xf32>
    %86 = vector.shape_cast %80 : vector<2x8x8xf32> to vector<16x8xf32>
    %cst_52 = arith.constant dense<0.000000e+00> : vector<16x8xf32>
    %87 = tpu.matmul %86, %2, %cst_52 {dimension_numbers = #tpu.dot_dimension_numbers<[1], [0], [0], [1], [0, 0, 1, 1], [], []>} : vector<16x8xf32>, vector<8x8xf32>, vector<16x8xf32> -> vector<16x8xf32>
    %88 = vector.broadcast %6 : vector<1x8xf32> to vector<16x8xf32>
    %89 = arith.addf %87, %88 : vector<16x8xf32>
    %90 = vector.shape_cast %89 : vector<16x8xf32> to vector<2x8x8xf32>
    %91 = vector.shape_cast %80 : vector<2x8x8xf32> to vector<16x8xf32>
    %cst_53 = arith.constant dense<0.000000e+00> : vector<16x8xf32>
    %92 = tpu.matmul %91, %3, %cst_53 {dimension_numbers = #tpu.dot_dimension_numbers<[1], [0], [0], [1], [0, 0, 1, 1], [], []>} : vector<16x8xf32>, vector<8x8xf32>, vector<16x8xf32> -> vector<16x8xf32>
    %93 = vector.broadcast %7 : vector<1x8xf32> to vector<16x8xf32>
    %94 = arith.addf %92, %93 : vector<16x8xf32>
    %95 = vector.shape_cast %94 : vector<16x8xf32> to vector<2x8x8xf32>
    %96 = tpu.concatenate %85, %85, %85, %85 in 1 : vector<2x8x8xf32>, vector<2x8x8xf32>, vector<2x8x8xf32>, vector<2x8x8xf32> -> vector<2x32x8xf32>
    %97 = vector.shape_cast %66 : vector<32x8xf32> to vector<1x32x8xf32>
    %98 = vector.broadcast %97 : vector<1x32x8xf32> to vector<2x32x8xf32>
    %99 = arith.mulf %96, %98 : vector<2x32x8xf32>
    "tpu.trace_start"() <{level = 10 : i32, message = "bqd,bkd->bqk"}> : () -> ()
    %cst_54 = arith.constant dense<0.000000e+00> : vector<2x32x8xf32>
    %100 = tpu.matmul %99, %90, %cst_54 {dimension_numbers = #tpu.dot_dimension_numbers<[2], [2], [1], [1], [0, 0, 0, 1, 1, 1], [0], [0]>} : vector<2x32x8xf32>, vector<2x8x8xf32>, vector<2x32x8xf32> -> vector<2x32x8xf32>
    "tpu.trace_stop"() : () -> ()
    %cst_55 = arith.constant dense<0xFF800000> : vector<2x32xf32>
    %101 = vector.multi_reduction <maximumf>, %100, %cst_55 [2] : vector<2x32x8xf32> to vector<2x32xf32>
    %102 = vector.shape_cast %101 : vector<2x32xf32> to vector<2x32x1xf32>
    %103 = vector.broadcast %102 : vector<2x32x1xf32> to vector<2x32x8xf32>
    %104 = arith.subf %100, %103 : vector<2x32x8xf32>
    %105 = math.exp %104 : vector<2x32x8xf32>
    %cst_56 = arith.constant dense<0.000000e+00> : vector<2x32xf32>
    %106 = vector.multi_reduction <add>, %105, %cst_56 [2] : vector<2x32x8xf32> to vector<2x32xf32>
    %107 = vector.shape_cast %106 : vector<2x32xf32> to vector<2x32x1xf32>
    %108 = tpu.reciprocal %107 {approx = true} : vector<2x32x1xf32> -> vector<2x32x1xf32>
    %109 = arith.mulf %107, %108 : vector<2x32x1xf32>
    %cst_57 = arith.constant 2.000000e+00 : f32
    %110 = vector.broadcast %cst_57 : f32 to vector<2x32x1xf32>
    %111 = arith.subf %110, %109 : vector<2x32x1xf32>
    %112 = arith.mulf %108, %111 : vector<2x32x1xf32>
    %113 = vector.broadcast %112 : vector<2x32x1xf32> to vector<2x32x8xf32>
    %114 = arith.mulf %105, %113 : vector<2x32x8xf32>
    "tpu.trace_start"() <{level = 10 : i32, message = "bqk,bkd->bqd"}> : () -> ()
    %cst_58 = arith.constant dense<0.000000e+00> : vector<2x32x8xf32>
    %115 = tpu.matmul %114, %95, %cst_58 {dimension_numbers = #tpu.dot_dimension_numbers<[2], [1], [1], [2], [0, 0, 0, 1, 1, 2], [0], [0]>} : vector<2x32x8xf32>, vector<2x8x8xf32>, vector<2x32x8xf32> -> vector<2x32x8xf32>
    "tpu.trace_stop"() : () -> ()
    %116 = vector.shape_cast %66 : vector<32x8xf32> to vector<1x32x8xf32>
    %117 = vector.broadcast %116 : vector<1x32x8xf32> to vector<2x32x8xf32>
    %118 = arith.mulf %115, %117 : vector<2x32x8xf32>
    %119 = vector.extract_strided_slice %118 {offsets = [0, 0, 0], sizes = [2, 8, 8], strides = [1, 1, 1]} : vector<2x32x8xf32> to vector<2x8x8xf32>
    %120 = vector.extract_strided_slice %118 {offsets = [0, 8, 0], sizes = [2, 8, 8], strides = [1, 1, 1]} : vector<2x32x8xf32> to vector<2x8x8xf32>
    %121 = arith.addf %119, %120 : vector<2x8x8xf32>
    %122 = vector.extract_strided_slice %118 {offsets = [0, 16, 0], sizes = [2, 8, 8], strides = [1, 1, 1]} : vector<2x32x8xf32> to vector<2x8x8xf32>
    %123 = arith.addf %121, %122 : vector<2x8x8xf32>
    %124 = vector.extract_strided_slice %118 {offsets = [0, 24, 0], sizes = [2, 8, 8], strides = [1, 1, 1]} : vector<2x32x8xf32> to vector<2x8x8xf32>
    %125 = arith.addf %123, %124 : vector<2x8x8xf32>
    %126 = vector.shape_cast %125 : vector<2x8x8xf32> to vector<16x8xf32>
    %cst_59 = arith.constant dense<0.000000e+00> : vector<16x8xf32>
    %127 = tpu.matmul %126, %4, %cst_59 {dimension_numbers = #tpu.dot_dimension_numbers<[1], [0], [0], [1], [0, 0, 1, 1], [], []>} : vector<16x8xf32>, vector<8x8xf32>, vector<16x8xf32> -> vector<16x8xf32>
    %128 = vector.broadcast %8 : vector<1x8xf32> to vector<16x8xf32>
    %129 = arith.addf %127, %128 : vector<16x8xf32>
    %130 = vector.shape_cast %129 : vector<16x8xf32> to vector<2x8x8xf32>
    %131 = arith.addf %80, %130 : vector<2x8x8xf32>
    %132 = vector.shape_cast %131 : vector<2x8x8xf32> to vector<16x8xf32>
    %cst_60 = arith.constant dense<0.000000e+00> : vector<16x16xf32>
    %133 = tpu.matmul %132, %46, %cst_60 {dimension_numbers = #tpu.dot_dimension_numbers<[1], [0], [0], [1], [0, 0, 1, 1], [], []>} : vector<16x8xf32>, vector<8x16xf32>, vector<16x16xf32> -> vector<16x16xf32>
    %134 = vector.broadcast %47 : vector<1x16xf32> to vector<16x16xf32>
    %135 = arith.addf %133, %134 : vector<16x16xf32>
    %cst_61 = arith.constant dense<0.000000e+00> : vector<16x8xf32>
    %136 = tpu.matmul %135, %48, %cst_61 {dimension_numbers = #tpu.dot_dimension_numbers<[1], [0], [0], [1], [0, 0, 1, 1], [], []>} : vector<16x16xf32>, vector<16x8xf32>, vector<16x8xf32> -> vector<16x8xf32>
    %137 = vector.broadcast %49 : vector<1x8xf32> to vector<16x8xf32>
    %138 = arith.addf %136, %137 : vector<16x8xf32>
    %139 = vector.shape_cast %138 : vector<16x8xf32> to vector<2x8x8xf32>
    %140 = arith.addf %131, %139 : vector<2x8x8xf32>
    %141 = vector.shape_cast %75 : vector<2x8x8xf32> to vector<16x8xf32>
    %cst_62 = arith.constant dense<0.000000e+00> : vector<16x8xf32>
    %142 = tpu.matmul %141, %10, %cst_62 {dimension_numbers = #tpu.dot_dimension_numbers<[1], [0], [0], [1], [0, 0, 1, 1], [], []>} : vector<16x8xf32>, vector<8x8xf32>, vector<16x8xf32> -> vector<16x8xf32>
    %143 = vector.broadcast %14 : vector<1x8xf32> to vector<16x8xf32>
    %144 = arith.addf %142, %143 : vector<16x8xf32>
    %145 = vector.shape_cast %144 : vector<16x8xf32> to vector<2x8x8xf32>
    %146 = vector.shape_cast %75 : vector<2x8x8xf32> to vector<16x8xf32>
    %cst_63 = arith.constant dense<0.000000e+00> : vector<16x8xf32>
    %147 = tpu.matmul %146, %11, %cst_63 {dimension_numbers = #tpu.dot_dimension_numbers<[1], [0], [0], [1], [0, 0, 1, 1], [], []>} : vector<16x8xf32>, vector<8x8xf32>, vector<16x8xf32> -> vector<16x8xf32>
    %148 = vector.broadcast %15 : vector<1x8xf32> to vector<16x8xf32>
    %149 = arith.addf %147, %148 : vector<16x8xf32>
    %150 = vector.shape_cast %149 : vector<16x8xf32> to vector<2x8x8xf32>
    %151 = vector.shape_cast %75 : vector<2x8x8xf32> to vector<16x8xf32>
    %cst_64 = arith.constant dense<0.000000e+00> : vector<16x8xf32>
    %152 = tpu.matmul %151, %12, %cst_64 {dimension_numbers = #tpu.dot_dimension_numbers<[1], [0], [0], [1], [0, 0, 1, 1], [], []>} : vector<16x8xf32>, vector<8x8xf32>, vector<16x8xf32> -> vector<16x8xf32>
    %153 = vector.broadcast %16 : vector<1x8xf32> to vector<16x8xf32>
    %154 = arith.addf %152, %153 : vector<16x8xf32>
    %155 = vector.shape_cast %154 : vector<16x8xf32> to vector<2x8x8xf32>
    %156 = tpu.concatenate %145, %145, %145, %145 in 1 : vector<2x8x8xf32>, vector<2x8x8xf32>, vector<2x8x8xf32>, vector<2x8x8xf32> -> vector<2x32x8xf32>
    %157 = vector.shape_cast %66 : vector<32x8xf32> to vector<1x32x8xf32>
    %158 = vector.broadcast %157 : vector<1x32x8xf32> to vector<2x32x8xf32>
    %159 = arith.mulf %156, %158 : vector<2x32x8xf32>
    "tpu.trace_start"() <{level = 10 : i32, message = "bqd,bkd->bqk"}> : () -> ()
    %cst_65 = arith.constant dense<0.000000e+00> : vector<2x32x8xf32>
    %160 = tpu.matmul %159, %150, %cst_65 {dimension_numbers = #tpu.dot_dimension_numbers<[2], [2], [1], [1], [0, 0, 0, 1, 1, 1], [0], [0]>} : vector<2x32x8xf32>, vector<2x8x8xf32>, vector<2x32x8xf32> -> vector<2x32x8xf32>
    "tpu.trace_stop"() : () -> ()
    %cst_66 = arith.constant dense<0xFF800000> : vector<2x32xf32>
    %161 = vector.multi_reduction <maximumf>, %160, %cst_66 [2] : vector<2x32x8xf32> to vector<2x32xf32>
    %162 = vector.shape_cast %161 : vector<2x32xf32> to vector<2x32x1xf32>
    %163 = vector.broadcast %162 : vector<2x32x1xf32> to vector<2x32x8xf32>
    %164 = arith.subf %160, %163 : vector<2x32x8xf32>
    %165 = math.exp %164 : vector<2x32x8xf32>
    %cst_67 = arith.constant dense<0.000000e+00> : vector<2x32xf32>
    %166 = vector.multi_reduction <add>, %165, %cst_67 [2] : vector<2x32x8xf32> to vector<2x32xf32>
    %167 = vector.shape_cast %166 : vector<2x32xf32> to vector<2x32x1xf32>
    %168 = tpu.reciprocal %167 {approx = true} : vector<2x32x1xf32> -> vector<2x32x1xf32>
    %169 = arith.mulf %167, %168 : vector<2x32x1xf32>
    %cst_68 = arith.constant 2.000000e+00 : f32
    %170 = vector.broadcast %cst_68 : f32 to vector<2x32x1xf32>
    %171 = arith.subf %170, %169 : vector<2x32x1xf32>
    %172 = arith.mulf %168, %171 : vector<2x32x1xf32>
    %173 = vector.broadcast %172 : vector<2x32x1xf32> to vector<2x32x8xf32>
    %174 = arith.mulf %165, %173 : vector<2x32x8xf32>
    "tpu.trace_start"() <{level = 10 : i32, message = "bqk,bkd->bqd"}> : () -> ()
    %cst_69 = arith.constant dense<0.000000e+00> : vector<2x32x8xf32>
    %175 = tpu.matmul %174, %155, %cst_69 {dimension_numbers = #tpu.dot_dimension_numbers<[2], [1], [1], [2], [0, 0, 0, 1, 1, 2], [0], [0]>} : vector<2x32x8xf32>, vector<2x8x8xf32>, vector<2x32x8xf32> -> vector<2x32x8xf32>
    "tpu.trace_stop"() : () -> ()
    %176 = vector.shape_cast %66 : vector<32x8xf32> to vector<1x32x8xf32>
    %177 = vector.broadcast %176 : vector<1x32x8xf32> to vector<2x32x8xf32>
    %178 = arith.mulf %175, %177 : vector<2x32x8xf32>
    %179 = vector.extract_strided_slice %178 {offsets = [0, 0, 0], sizes = [2, 8, 8], strides = [1, 1, 1]} : vector<2x32x8xf32> to vector<2x8x8xf32>
    %180 = vector.extract_strided_slice %178 {offsets = [0, 8, 0], sizes = [2, 8, 8], strides = [1, 1, 1]} : vector<2x32x8xf32> to vector<2x8x8xf32>
    %181 = arith.addf %179, %180 : vector<2x8x8xf32>
    %182 = vector.extract_strided_slice %178 {offsets = [0, 16, 0], sizes = [2, 8, 8], strides = [1, 1, 1]} : vector<2x32x8xf32> to vector<2x8x8xf32>
    %183 = arith.addf %181, %182 : vector<2x8x8xf32>
    %184 = vector.extract_strided_slice %178 {offsets = [0, 24, 0], sizes = [2, 8, 8], strides = [1, 1, 1]} : vector<2x32x8xf32> to vector<2x8x8xf32>
    %185 = arith.addf %183, %184 : vector<2x8x8xf32>
    %186 = vector.shape_cast %185 : vector<2x8x8xf32> to vector<16x8xf32>
    %cst_70 = arith.constant dense<0.000000e+00> : vector<16x8xf32>
    %187 = tpu.matmul %186, %13, %cst_70 {dimension_numbers = #tpu.dot_dimension_numbers<[1], [0], [0], [1], [0, 0, 1, 1], [], []>} : vector<16x8xf32>, vector<8x8xf32>, vector<16x8xf32> -> vector<16x8xf32>
    %188 = vector.broadcast %17 : vector<1x8xf32> to vector<16x8xf32>
    %189 = arith.addf %187, %188 : vector<16x8xf32>
    %190 = vector.shape_cast %189 : vector<16x8xf32> to vector<2x8x8xf32>
    %191 = arith.addf %75, %190 : vector<2x8x8xf32>
    %192 = vector.shape_cast %191 : vector<2x8x8xf32> to vector<16x8xf32>
    %cst_71 = arith.constant dense<0.000000e+00> : vector<16x8xf32>
    %193 = tpu.matmul %192, %19, %cst_71 {dimension_numbers = #tpu.dot_dimension_numbers<[1], [0], [0], [1], [0, 0, 1, 1], [], []>} : vector<16x8xf32>, vector<8x8xf32>, vector<16x8xf32> -> vector<16x8xf32>
    %194 = vector.broadcast %23 : vector<1x8xf32> to vector<16x8xf32>
    %195 = arith.addf %193, %194 : vector<16x8xf32>
    %196 = vector.shape_cast %195 : vector<16x8xf32> to vector<2x8x8xf32>
    %197 = vector.shape_cast %140 : vector<2x8x8xf32> to vector<16x8xf32>
    %cst_72 = arith.constant dense<0.000000e+00> : vector<16x8xf32>
    %198 = tpu.matmul %197, %20, %cst_72 {dimension_numbers = #tpu.dot_dimension_numbers<[1], [0], [0], [1], [0, 0, 1, 1], [], []>} : vector<16x8xf32>, vector<8x8xf32>, vector<16x8xf32> -> vector<16x8xf32>
    %199 = vector.broadcast %24 : vector<1x8xf32> to vector<16x8xf32>
    %200 = arith.addf %198, %199 : vector<16x8xf32>
    %201 = vector.shape_cast %200 : vector<16x8xf32> to vector<2x8x8xf32>
    %202 = vector.shape_cast %140 : vector<2x8x8xf32> to vector<16x8xf32>
    %cst_73 = arith.constant dense<0.000000e+00> : vector<16x8xf32>
    %203 = tpu.matmul %202, %21, %cst_73 {dimension_numbers = #tpu.dot_dimension_numbers<[1], [0], [0], [1], [0, 0, 1, 1], [], []>} : vector<16x8xf32>, vector<8x8xf32>, vector<16x8xf32> -> vector<16x8xf32>
    %204 = vector.broadcast %25 : vector<1x8xf32> to vector<16x8xf32>
    %205 = arith.addf %203, %204 : vector<16x8xf32>
    %206 = vector.shape_cast %205 : vector<16x8xf32> to vector<2x8x8xf32>
    %207 = tpu.concatenate %196, %196, %196, %196 in 1 : vector<2x8x8xf32>, vector<2x8x8xf32>, vector<2x8x8xf32>, vector<2x8x8xf32> -> vector<2x32x8xf32>
    %208 = vector.shape_cast %66 : vector<32x8xf32> to vector<1x32x8xf32>
    %209 = vector.broadcast %208 : vector<1x32x8xf32> to vector<2x32x8xf32>
    %210 = arith.mulf %207, %209 : vector<2x32x8xf32>
    "tpu.trace_start"() <{level = 10 : i32, message = "bqd,bkd->bqk"}> : () -> ()
    %cst_74 = arith.constant dense<0.000000e+00> : vector<2x32x8xf32>
    %211 = tpu.matmul %210, %201, %cst_74 {dimension_numbers = #tpu.dot_dimension_numbers<[2], [2], [1], [1], [0, 0, 0, 1, 1, 1], [0], [0]>} : vector<2x32x8xf32>, vector<2x8x8xf32>, vector<2x32x8xf32> -> vector<2x32x8xf32>
    "tpu.trace_stop"() : () -> ()
    %cst_75 = arith.constant dense<0xFF800000> : vector<2x32xf32>
    %212 = vector.multi_reduction <maximumf>, %211, %cst_75 [2] : vector<2x32x8xf32> to vector<2x32xf32>
    %213 = vector.shape_cast %212 : vector<2x32xf32> to vector<2x32x1xf32>
    %214 = vector.broadcast %213 : vector<2x32x1xf32> to vector<2x32x8xf32>
    %215 = arith.subf %211, %214 : vector<2x32x8xf32>
    %216 = math.exp %215 : vector<2x32x8xf32>
    %cst_76 = arith.constant dense<0.000000e+00> : vector<2x32xf32>
    %217 = vector.multi_reduction <add>, %216, %cst_76 [2] : vector<2x32x8xf32> to vector<2x32xf32>
    %218 = vector.shape_cast %217 : vector<2x32xf32> to vector<2x32x1xf32>
    %219 = tpu.reciprocal %218 {approx = true} : vector<2x32x1xf32> -> vector<2x32x1xf32>
    %220 = arith.mulf %218, %219 : vector<2x32x1xf32>
    %cst_77 = arith.constant 2.000000e+00 : f32
    %221 = vector.broadcast %cst_77 : f32 to vector<2x32x1xf32>
    %222 = arith.subf %221, %220 : vector<2x32x1xf32>
    %223 = arith.mulf %219, %222 : vector<2x32x1xf32>
    %224 = vector.broadcast %223 : vector<2x32x1xf32> to vector<2x32x8xf32>
    %225 = arith.mulf %216, %224 : vector<2x32x8xf32>
    "tpu.trace_start"() <{level = 10 : i32, message = "bqk,bkd->bqd"}> : () -> ()
    %cst_78 = arith.constant dense<0.000000e+00> : vector<2x32x8xf32>
    %226 = tpu.matmul %225, %206, %cst_78 {dimension_numbers = #tpu.dot_dimension_numbers<[2], [1], [1], [2], [0, 0, 0, 1, 1, 2], [0], [0]>} : vector<2x32x8xf32>, vector<2x8x8xf32>, vector<2x32x8xf32> -> vector<2x32x8xf32>
    "tpu.trace_stop"() : () -> ()
    %227 = vector.shape_cast %66 : vector<32x8xf32> to vector<1x32x8xf32>
    %228 = vector.broadcast %227 : vector<1x32x8xf32> to vector<2x32x8xf32>
    %229 = arith.mulf %226, %228 : vector<2x32x8xf32>
    %230 = vector.extract_strided_slice %229 {offsets = [0, 0, 0], sizes = [2, 8, 8], strides = [1, 1, 1]} : vector<2x32x8xf32> to vector<2x8x8xf32>
    %231 = vector.extract_strided_slice %229 {offsets = [0, 8, 0], sizes = [2, 8, 8], strides = [1, 1, 1]} : vector<2x32x8xf32> to vector<2x8x8xf32>
    %232 = arith.addf %230, %231 : vector<2x8x8xf32>
    %233 = vector.extract_strided_slice %229 {offsets = [0, 16, 0], sizes = [2, 8, 8], strides = [1, 1, 1]} : vector<2x32x8xf32> to vector<2x8x8xf32>
    %234 = arith.addf %232, %233 : vector<2x8x8xf32>
    %235 = vector.extract_strided_slice %229 {offsets = [0, 24, 0], sizes = [2, 8, 8], strides = [1, 1, 1]} : vector<2x32x8xf32> to vector<2x8x8xf32>
    %236 = arith.addf %234, %235 : vector<2x8x8xf32>
    %237 = vector.shape_cast %236 : vector<2x8x8xf32> to vector<16x8xf32>
    %cst_79 = arith.constant dense<0.000000e+00> : vector<16x8xf32>
    %238 = tpu.matmul %237, %22, %cst_79 {dimension_numbers = #tpu.dot_dimension_numbers<[1], [0], [0], [1], [0, 0, 1, 1], [], []>} : vector<16x8xf32>, vector<8x8xf32>, vector<16x8xf32> -> vector<16x8xf32>
    %239 = vector.broadcast %26 : vector<1x8xf32> to vector<16x8xf32>
    %240 = arith.addf %238, %239 : vector<16x8xf32>
    %241 = vector.shape_cast %240 : vector<16x8xf32> to vector<2x8x8xf32>
    %242 = arith.addf %191, %241 : vector<2x8x8xf32>
    %243 = vector.shape_cast %242 : vector<2x8x8xf32> to vector<16x8xf32>
    %cst_80 = arith.constant dense<0.000000e+00> : vector<16x16xf32>
    %244 = tpu.matmul %243, %51, %cst_80 {dimension_numbers = #tpu.dot_dimension_numbers<[1], [0], [0], [1], [0, 0, 1, 1], [], []>} : vector<16x8xf32>, vector<8x16xf32>, vector<16x16xf32> -> vector<16x16xf32>
    %245 = vector.broadcast %52 : vector<1x16xf32> to vector<16x16xf32>
    %246 = arith.addf %244, %245 : vector<16x16xf32>
    %cst_81 = arith.constant dense<0.000000e+00> : vector<16x8xf32>
    %247 = tpu.matmul %246, %53, %cst_81 {dimension_numbers = #tpu.dot_dimension_numbers<[1], [0], [0], [1], [0, 0, 1, 1], [], []>} : vector<16x16xf32>, vector<16x8xf32>, vector<16x8xf32> -> vector<16x8xf32>
    %248 = vector.broadcast %54 : vector<1x8xf32> to vector<16x8xf32>
    %249 = arith.addf %247, %248 : vector<16x8xf32>
    %250 = vector.shape_cast %249 : vector<16x8xf32> to vector<2x8x8xf32>
    %251 = arith.addf %242, %250 : vector<2x8x8xf32>
    %252 = vector.shape_cast %251 : vector<2x8x8xf32> to vector<16x8xf32>
    %cst_82 = arith.constant dense<0.000000e+00> : vector<16x4xf32>
    %253 = tpu.matmul %252, %60, %cst_82 {dimension_numbers = #tpu.dot_dimension_numbers<[1], [0], [0], [1], [0, 0, 1, 1], [], []>} : vector<16x8xf32>, vector<8x4xf32>, vector<16x4xf32> -> vector<16x4xf32>
    %254 = vector.broadcast %61 : vector<1x4xf32> to vector<16x4xf32>
    %255 = arith.addf %253, %254 : vector<16x4xf32>
    %cst_83 = arith.constant -6.000000e+01 : f32
    %cst_84 = arith.constant 6.000000e+01 : f32
    %256 = vector.broadcast %cst_83 : f32 to vector<16x4xf32>
    %257 = arith.maximumf %256, %255 : vector<16x4xf32>
    %258 = vector.broadcast %cst_84 : f32 to vector<16x4xf32>
    %259 = arith.minimumf %258, %257 : vector<16x4xf32>
    %cst_85 = arith.constant 0.000000e+00 : f32
    %260 = vector.broadcast %cst_85 : f32 to vector<16x4xf32>
    %261 = arith.subf %260, %259 : vector<16x4xf32>
    %262 = math.exp %261 : vector<16x4xf32>
    %cst_86 = arith.constant 1.000000e+00 : f32
    %263 = vector.broadcast %cst_86 : f32 to vector<16x4xf32>
    %264 = arith.addf %263, %262 : vector<16x4xf32>
    %265 = tpu.reciprocal %264 {approx = true} : vector<16x4xf32> -> vector<16x4xf32>
    %266 = arith.mulf %264, %265 : vector<16x4xf32>
    %cst_87 = arith.constant 2.000000e+00 : f32
    %267 = vector.broadcast %cst_87 : f32 to vector<16x4xf32>
    %268 = arith.subf %267, %266 : vector<16x4xf32>
    %269 = arith.mulf %265, %268 : vector<16x4xf32>
    %270 = arith.subf %269, %71 : vector<16x4xf32>
    %271 = arith.mulf %270, %270 : vector<16x4xf32>
    %cst_88 = arith.constant dense<0.000000e+00> : vector<16x8xf32>
    %272 = tpu.matmul %271, %64, %cst_88 {dimension_numbers = #tpu.dot_dimension_numbers<[1], [0], [0], [1], [0, 0, 1, 1], [], []>} : vector<16x4xf32>, vector<4x8xf32>, vector<16x8xf32> -> vector<16x8xf32>
    %273 = arith.addf %76, %272 : vector<16x8xf32>
    %274 = vector.shape_cast %273 : vector<16x8xf32> to vector<2x8x8xf32>
    %275 = vector.shape_cast %62 : vector<8x8xf32> to vector<1x8x8xf32>
    %276 = vector.broadcast %275 : vector<1x8x8xf32> to vector<2x8x8xf32>
    %277 = arith.addf %274, %276 : vector<2x8x8xf32>
    %278 = vector.shape_cast %277 : vector<2x8x8xf32> to vector<16x8xf32>
    %cst_89 = arith.constant dense<0.000000e+00> : vector<16x8xf32>
    %279 = tpu.matmul %278, %1, %cst_89 {dimension_numbers = #tpu.dot_dimension_numbers<[1], [0], [0], [1], [0, 0, 1, 1], [], []>} : vector<16x8xf32>, vector<8x8xf32>, vector<16x8xf32> -> vector<16x8xf32>
    %280 = vector.broadcast %5 : vector<1x8xf32> to vector<16x8xf32>
    %281 = arith.addf %279, %280 : vector<16x8xf32>
    %282 = vector.shape_cast %281 : vector<16x8xf32> to vector<2x8x8xf32>
    %283 = vector.shape_cast %277 : vector<2x8x8xf32> to vector<16x8xf32>
    %cst_90 = arith.constant dense<0.000000e+00> : vector<16x8xf32>
    %284 = tpu.matmul %283, %2, %cst_90 {dimension_numbers = #tpu.dot_dimension_numbers<[1], [0], [0], [1], [0, 0, 1, 1], [], []>} : vector<16x8xf32>, vector<8x8xf32>, vector<16x8xf32> -> vector<16x8xf32>
    %285 = vector.broadcast %6 : vector<1x8xf32> to vector<16x8xf32>
    %286 = arith.addf %284, %285 : vector<16x8xf32>
    %287 = vector.shape_cast %286 : vector<16x8xf32> to vector<2x8x8xf32>
    %288 = vector.shape_cast %277 : vector<2x8x8xf32> to vector<16x8xf32>
    %cst_91 = arith.constant dense<0.000000e+00> : vector<16x8xf32>
    %289 = tpu.matmul %288, %3, %cst_91 {dimension_numbers = #tpu.dot_dimension_numbers<[1], [0], [0], [1], [0, 0, 1, 1], [], []>} : vector<16x8xf32>, vector<8x8xf32>, vector<16x8xf32> -> vector<16x8xf32>
    %290 = vector.broadcast %7 : vector<1x8xf32> to vector<16x8xf32>
    %291 = arith.addf %289, %290 : vector<16x8xf32>
    %292 = vector.shape_cast %291 : vector<16x8xf32> to vector<2x8x8xf32>
    %293 = tpu.concatenate %282, %282, %282, %282 in 1 : vector<2x8x8xf32>, vector<2x8x8xf32>, vector<2x8x8xf32>, vector<2x8x8xf32> -> vector<2x32x8xf32>
    %294 = vector.shape_cast %66 : vector<32x8xf32> to vector<1x32x8xf32>
    %295 = vector.broadcast %294 : vector<1x32x8xf32> to vector<2x32x8xf32>
    %296 = arith.mulf %293, %295 : vector<2x32x8xf32>
    "tpu.trace_start"() <{level = 10 : i32, message = "bqd,bkd->bqk"}> : () -> ()
    %cst_92 = arith.constant dense<0.000000e+00> : vector<2x32x8xf32>
    %297 = tpu.matmul %296, %287, %cst_92 {dimension_numbers = #tpu.dot_dimension_numbers<[2], [2], [1], [1], [0, 0, 0, 1, 1, 1], [0], [0]>} : vector<2x32x8xf32>, vector<2x8x8xf32>, vector<2x32x8xf32> -> vector<2x32x8xf32>
    "tpu.trace_stop"() : () -> ()
    %cst_93 = arith.constant dense<0xFF800000> : vector<2x32xf32>
    %298 = vector.multi_reduction <maximumf>, %297, %cst_93 [2] : vector<2x32x8xf32> to vector<2x32xf32>
    %299 = vector.shape_cast %298 : vector<2x32xf32> to vector<2x32x1xf32>
    %300 = vector.broadcast %299 : vector<2x32x1xf32> to vector<2x32x8xf32>
    %301 = arith.subf %297, %300 : vector<2x32x8xf32>
    %302 = math.exp %301 : vector<2x32x8xf32>
    %cst_94 = arith.constant dense<0.000000e+00> : vector<2x32xf32>
    %303 = vector.multi_reduction <add>, %302, %cst_94 [2] : vector<2x32x8xf32> to vector<2x32xf32>
    %304 = vector.shape_cast %303 : vector<2x32xf32> to vector<2x32x1xf32>
    %305 = tpu.reciprocal %304 {approx = true} : vector<2x32x1xf32> -> vector<2x32x1xf32>
    %306 = arith.mulf %304, %305 : vector<2x32x1xf32>
    %cst_95 = arith.constant 2.000000e+00 : f32
    %307 = vector.broadcast %cst_95 : f32 to vector<2x32x1xf32>
    %308 = arith.subf %307, %306 : vector<2x32x1xf32>
    %309 = arith.mulf %305, %308 : vector<2x32x1xf32>
    %310 = vector.broadcast %309 : vector<2x32x1xf32> to vector<2x32x8xf32>
    %311 = arith.mulf %302, %310 : vector<2x32x8xf32>
    "tpu.trace_start"() <{level = 10 : i32, message = "bqk,bkd->bqd"}> : () -> ()
    %cst_96 = arith.constant dense<0.000000e+00> : vector<2x32x8xf32>
    %312 = tpu.matmul %311, %292, %cst_96 {dimension_numbers = #tpu.dot_dimension_numbers<[2], [1], [1], [2], [0, 0, 0, 1, 1, 2], [0], [0]>} : vector<2x32x8xf32>, vector<2x8x8xf32>, vector<2x32x8xf32> -> vector<2x32x8xf32>
    "tpu.trace_stop"() : () -> ()
    %313 = vector.shape_cast %66 : vector<32x8xf32> to vector<1x32x8xf32>
    %314 = vector.broadcast %313 : vector<1x32x8xf32> to vector<2x32x8xf32>
    %315 = arith.mulf %312, %314 : vector<2x32x8xf32>
    %316 = vector.extract_strided_slice %315 {offsets = [0, 0, 0], sizes = [2, 8, 8], strides = [1, 1, 1]} : vector<2x32x8xf32> to vector<2x8x8xf32>
    %317 = vector.extract_strided_slice %315 {offsets = [0, 8, 0], sizes = [2, 8, 8], strides = [1, 1, 1]} : vector<2x32x8xf32> to vector<2x8x8xf32>
    %318 = arith.addf %316, %317 : vector<2x8x8xf32>
    %319 = vector.extract_strided_slice %315 {offsets = [0, 16, 0], sizes = [2, 8, 8], strides = [1, 1, 1]} : vector<2x32x8xf32> to vector<2x8x8xf32>
    %320 = arith.addf %318, %319 : vector<2x8x8xf32>
    %321 = vector.extract_strided_slice %315 {offsets = [0, 24, 0], sizes = [2, 8, 8], strides = [1, 1, 1]} : vector<2x32x8xf32> to vector<2x8x8xf32>
    %322 = arith.addf %320, %321 : vector<2x8x8xf32>
    %323 = vector.shape_cast %322 : vector<2x8x8xf32> to vector<16x8xf32>
    %cst_97 = arith.constant dense<0.000000e+00> : vector<16x8xf32>
    %324 = tpu.matmul %323, %4, %cst_97 {dimension_numbers = #tpu.dot_dimension_numbers<[1], [0], [0], [1], [0, 0, 1, 1], [], []>} : vector<16x8xf32>, vector<8x8xf32>, vector<16x8xf32> -> vector<16x8xf32>
    %325 = vector.broadcast %8 : vector<1x8xf32> to vector<16x8xf32>
    %326 = arith.addf %324, %325 : vector<16x8xf32>
    %327 = vector.shape_cast %326 : vector<16x8xf32> to vector<2x8x8xf32>
    %328 = arith.addf %277, %327 : vector<2x8x8xf32>
    %329 = vector.shape_cast %328 : vector<2x8x8xf32> to vector<16x8xf32>
    %cst_98 = arith.constant dense<0.000000e+00> : vector<16x16xf32>
    %330 = tpu.matmul %329, %46, %cst_98 {dimension_numbers = #tpu.dot_dimension_numbers<[1], [0], [0], [1], [0, 0, 1, 1], [], []>} : vector<16x8xf32>, vector<8x16xf32>, vector<16x16xf32> -> vector<16x16xf32>
    %331 = vector.broadcast %47 : vector<1x16xf32> to vector<16x16xf32>
    %332 = arith.addf %330, %331 : vector<16x16xf32>
    %cst_99 = arith.constant dense<0.000000e+00> : vector<16x8xf32>
    %333 = tpu.matmul %332, %48, %cst_99 {dimension_numbers = #tpu.dot_dimension_numbers<[1], [0], [0], [1], [0, 0, 1, 1], [], []>} : vector<16x16xf32>, vector<16x8xf32>, vector<16x8xf32> -> vector<16x8xf32>
    %334 = vector.broadcast %49 : vector<1x8xf32> to vector<16x8xf32>
    %335 = arith.addf %333, %334 : vector<16x8xf32>
    %336 = vector.shape_cast %335 : vector<16x8xf32> to vector<2x8x8xf32>
    %337 = arith.addf %328, %336 : vector<2x8x8xf32>
    %338 = vector.shape_cast %75 : vector<2x8x8xf32> to vector<16x8xf32>
    %cst_100 = arith.constant dense<0.000000e+00> : vector<16x8xf32>
    %339 = tpu.matmul %338, %28, %cst_100 {dimension_numbers = #tpu.dot_dimension_numbers<[1], [0], [0], [1], [0, 0, 1, 1], [], []>} : vector<16x8xf32>, vector<8x8xf32>, vector<16x8xf32> -> vector<16x8xf32>
    %340 = vector.broadcast %32 : vector<1x8xf32> to vector<16x8xf32>
    %341 = arith.addf %339, %340 : vector<16x8xf32>
    %342 = vector.shape_cast %341 : vector<16x8xf32> to vector<2x8x8xf32>
    %343 = vector.shape_cast %75 : vector<2x8x8xf32> to vector<16x8xf32>
    %cst_101 = arith.constant dense<0.000000e+00> : vector<16x8xf32>
    %344 = tpu.matmul %343, %29, %cst_101 {dimension_numbers = #tpu.dot_dimension_numbers<[1], [0], [0], [1], [0, 0, 1, 1], [], []>} : vector<16x8xf32>, vector<8x8xf32>, vector<16x8xf32> -> vector<16x8xf32>
    %345 = vector.broadcast %33 : vector<1x8xf32> to vector<16x8xf32>
    %346 = arith.addf %344, %345 : vector<16x8xf32>
    %347 = vector.shape_cast %346 : vector<16x8xf32> to vector<2x8x8xf32>
    %348 = vector.shape_cast %75 : vector<2x8x8xf32> to vector<16x8xf32>
    %cst_102 = arith.constant dense<0.000000e+00> : vector<16x8xf32>
    %349 = tpu.matmul %348, %30, %cst_102 {dimension_numbers = #tpu.dot_dimension_numbers<[1], [0], [0], [1], [0, 0, 1, 1], [], []>} : vector<16x8xf32>, vector<8x8xf32>, vector<16x8xf32> -> vector<16x8xf32>
    %350 = vector.broadcast %34 : vector<1x8xf32> to vector<16x8xf32>
    %351 = arith.addf %349, %350 : vector<16x8xf32>
    %352 = vector.shape_cast %351 : vector<16x8xf32> to vector<2x8x8xf32>
    %353 = tpu.concatenate %342, %342, %342, %342 in 1 : vector<2x8x8xf32>, vector<2x8x8xf32>, vector<2x8x8xf32>, vector<2x8x8xf32> -> vector<2x32x8xf32>
    %354 = vector.shape_cast %66 : vector<32x8xf32> to vector<1x32x8xf32>
    %355 = vector.broadcast %354 : vector<1x32x8xf32> to vector<2x32x8xf32>
    %356 = arith.mulf %353, %355 : vector<2x32x8xf32>
    "tpu.trace_start"() <{level = 10 : i32, message = "bqd,bkd->bqk"}> : () -> ()
    %cst_103 = arith.constant dense<0.000000e+00> : vector<2x32x8xf32>
    %357 = tpu.matmul %356, %347, %cst_103 {dimension_numbers = #tpu.dot_dimension_numbers<[2], [2], [1], [1], [0, 0, 0, 1, 1, 1], [0], [0]>} : vector<2x32x8xf32>, vector<2x8x8xf32>, vector<2x32x8xf32> -> vector<2x32x8xf32>
    "tpu.trace_stop"() : () -> ()
    %cst_104 = arith.constant dense<0xFF800000> : vector<2x32xf32>
    %358 = vector.multi_reduction <maximumf>, %357, %cst_104 [2] : vector<2x32x8xf32> to vector<2x32xf32>
    %359 = vector.shape_cast %358 : vector<2x32xf32> to vector<2x32x1xf32>
    %360 = vector.broadcast %359 : vector<2x32x1xf32> to vector<2x32x8xf32>
    %361 = arith.subf %357, %360 : vector<2x32x8xf32>
    %362 = math.exp %361 : vector<2x32x8xf32>
    %cst_105 = arith.constant dense<0.000000e+00> : vector<2x32xf32>
    %363 = vector.multi_reduction <add>, %362, %cst_105 [2] : vector<2x32x8xf32> to vector<2x32xf32>
    %364 = vector.shape_cast %363 : vector<2x32xf32> to vector<2x32x1xf32>
    %365 = tpu.reciprocal %364 {approx = true} : vector<2x32x1xf32> -> vector<2x32x1xf32>
    %366 = arith.mulf %364, %365 : vector<2x32x1xf32>
    %cst_106 = arith.constant 2.000000e+00 : f32
    %367 = vector.broadcast %cst_106 : f32 to vector<2x32x1xf32>
    %368 = arith.subf %367, %366 : vector<2x32x1xf32>
    %369 = arith.mulf %365, %368 : vector<2x32x1xf32>
    %370 = vector.broadcast %369 : vector<2x32x1xf32> to vector<2x32x8xf32>
    %371 = arith.mulf %362, %370 : vector<2x32x8xf32>
    "tpu.trace_start"() <{level = 10 : i32, message = "bqk,bkd->bqd"}> : () -> ()
    %cst_107 = arith.constant dense<0.000000e+00> : vector<2x32x8xf32>
    %372 = tpu.matmul %371, %352, %cst_107 {dimension_numbers = #tpu.dot_dimension_numbers<[2], [1], [1], [2], [0, 0, 0, 1, 1, 2], [0], [0]>} : vector<2x32x8xf32>, vector<2x8x8xf32>, vector<2x32x8xf32> -> vector<2x32x8xf32>
    "tpu.trace_stop"() : () -> ()
    %373 = vector.shape_cast %66 : vector<32x8xf32> to vector<1x32x8xf32>
    %374 = vector.broadcast %373 : vector<1x32x8xf32> to vector<2x32x8xf32>
    %375 = arith.mulf %372, %374 : vector<2x32x8xf32>
    %376 = vector.extract_strided_slice %375 {offsets = [0, 0, 0], sizes = [2, 8, 8], strides = [1, 1, 1]} : vector<2x32x8xf32> to vector<2x8x8xf32>
    %377 = vector.extract_strided_slice %375 {offsets = [0, 8, 0], sizes = [2, 8, 8], strides = [1, 1, 1]} : vector<2x32x8xf32> to vector<2x8x8xf32>
    %378 = arith.addf %376, %377 : vector<2x8x8xf32>
    %379 = vector.extract_strided_slice %375 {offsets = [0, 16, 0], sizes = [2, 8, 8], strides = [1, 1, 1]} : vector<2x32x8xf32> to vector<2x8x8xf32>
    %380 = arith.addf %378, %379 : vector<2x8x8xf32>
    %381 = vector.extract_strided_slice %375 {offsets = [0, 24, 0], sizes = [2, 8, 8], strides = [1, 1, 1]} : vector<2x32x8xf32> to vector<2x8x8xf32>
    %382 = arith.addf %380, %381 : vector<2x8x8xf32>
    %383 = vector.shape_cast %382 : vector<2x8x8xf32> to vector<16x8xf32>
    %cst_108 = arith.constant dense<0.000000e+00> : vector<16x8xf32>
    %384 = tpu.matmul %383, %31, %cst_108 {dimension_numbers = #tpu.dot_dimension_numbers<[1], [0], [0], [1], [0, 0, 1, 1], [], []>} : vector<16x8xf32>, vector<8x8xf32>, vector<16x8xf32> -> vector<16x8xf32>
    %385 = vector.broadcast %35 : vector<1x8xf32> to vector<16x8xf32>
    %386 = arith.addf %384, %385 : vector<16x8xf32>
    %387 = vector.shape_cast %386 : vector<16x8xf32> to vector<2x8x8xf32>
    %388 = arith.addf %75, %387 : vector<2x8x8xf32>
    %389 = vector.shape_cast %388 : vector<2x8x8xf32> to vector<16x8xf32>
    %cst_109 = arith.constant dense<0.000000e+00> : vector<16x8xf32>
    %390 = tpu.matmul %389, %37, %cst_109 {dimension_numbers = #tpu.dot_dimension_numbers<[1], [0], [0], [1], [0, 0, 1, 1], [], []>} : vector<16x8xf32>, vector<8x8xf32>, vector<16x8xf32> -> vector<16x8xf32>
    %391 = vector.broadcast %41 : vector<1x8xf32> to vector<16x8xf32>
    %392 = arith.addf %390, %391 : vector<16x8xf32>
    %393 = vector.shape_cast %392 : vector<16x8xf32> to vector<2x8x8xf32>
    %394 = vector.shape_cast %337 : vector<2x8x8xf32> to vector<16x8xf32>
    %cst_110 = arith.constant dense<0.000000e+00> : vector<16x8xf32>
    %395 = tpu.matmul %394, %38, %cst_110 {dimension_numbers = #tpu.dot_dimension_numbers<[1], [0], [0], [1], [0, 0, 1, 1], [], []>} : vector<16x8xf32>, vector<8x8xf32>, vector<16x8xf32> -> vector<16x8xf32>
    %396 = vector.broadcast %42 : vector<1x8xf32> to vector<16x8xf32>
    %397 = arith.addf %395, %396 : vector<16x8xf32>
    %398 = vector.shape_cast %397 : vector<16x8xf32> to vector<2x8x8xf32>
    %399 = vector.shape_cast %337 : vector<2x8x8xf32> to vector<16x8xf32>
    %cst_111 = arith.constant dense<0.000000e+00> : vector<16x8xf32>
    %400 = tpu.matmul %399, %39, %cst_111 {dimension_numbers = #tpu.dot_dimension_numbers<[1], [0], [0], [1], [0, 0, 1, 1], [], []>} : vector<16x8xf32>, vector<8x8xf32>, vector<16x8xf32> -> vector<16x8xf32>
    %401 = vector.broadcast %43 : vector<1x8xf32> to vector<16x8xf32>
    %402 = arith.addf %400, %401 : vector<16x8xf32>
    %403 = vector.shape_cast %402 : vector<16x8xf32> to vector<2x8x8xf32>
    %404 = tpu.concatenate %393, %393, %393, %393 in 1 : vector<2x8x8xf32>, vector<2x8x8xf32>, vector<2x8x8xf32>, vector<2x8x8xf32> -> vector<2x32x8xf32>
    %405 = vector.shape_cast %66 : vector<32x8xf32> to vector<1x32x8xf32>
    %406 = vector.broadcast %405 : vector<1x32x8xf32> to vector<2x32x8xf32>
    %407 = arith.mulf %404, %406 : vector<2x32x8xf32>
    "tpu.trace_start"() <{level = 10 : i32, message = "bqd,bkd->bqk"}> : () -> ()
    %cst_112 = arith.constant dense<0.000000e+00> : vector<2x32x8xf32>
    %408 = tpu.matmul %407, %398, %cst_112 {dimension_numbers = #tpu.dot_dimension_numbers<[2], [2], [1], [1], [0, 0, 0, 1, 1, 1], [0], [0]>} : vector<2x32x8xf32>, vector<2x8x8xf32>, vector<2x32x8xf32> -> vector<2x32x8xf32>
    "tpu.trace_stop"() : () -> ()
    %cst_113 = arith.constant dense<0xFF800000> : vector<2x32xf32>
    %409 = vector.multi_reduction <maximumf>, %408, %cst_113 [2] : vector<2x32x8xf32> to vector<2x32xf32>
    %410 = vector.shape_cast %409 : vector<2x32xf32> to vector<2x32x1xf32>
    %411 = vector.broadcast %410 : vector<2x32x1xf32> to vector<2x32x8xf32>
    %412 = arith.subf %408, %411 : vector<2x32x8xf32>
    %413 = math.exp %412 : vector<2x32x8xf32>
    %cst_114 = arith.constant dense<0.000000e+00> : vector<2x32xf32>
    %414 = vector.multi_reduction <add>, %413, %cst_114 [2] : vector<2x32x8xf32> to vector<2x32xf32>
    %415 = vector.shape_cast %414 : vector<2x32xf32> to vector<2x32x1xf32>
    %416 = tpu.reciprocal %415 {approx = true} : vector<2x32x1xf32> -> vector<2x32x1xf32>
    %417 = arith.mulf %415, %416 : vector<2x32x1xf32>
    %cst_115 = arith.constant 2.000000e+00 : f32
    %418 = vector.broadcast %cst_115 : f32 to vector<2x32x1xf32>
    %419 = arith.subf %418, %417 : vector<2x32x1xf32>
    %420 = arith.mulf %416, %419 : vector<2x32x1xf32>
    %421 = vector.broadcast %420 : vector<2x32x1xf32> to vector<2x32x8xf32>
    %422 = arith.mulf %413, %421 : vector<2x32x8xf32>
    "tpu.trace_start"() <{level = 10 : i32, message = "bqk,bkd->bqd"}> : () -> ()
    %cst_116 = arith.constant dense<0.000000e+00> : vector<2x32x8xf32>
    %423 = tpu.matmul %422, %403, %cst_116 {dimension_numbers = #tpu.dot_dimension_numbers<[2], [1], [1], [2], [0, 0, 0, 1, 1, 2], [0], [0]>} : vector<2x32x8xf32>, vector<2x8x8xf32>, vector<2x32x8xf32> -> vector<2x32x8xf32>
    "tpu.trace_stop"() : () -> ()
    %424 = vector.shape_cast %66 : vector<32x8xf32> to vector<1x32x8xf32>
    %425 = vector.broadcast %424 : vector<1x32x8xf32> to vector<2x32x8xf32>
    %426 = arith.mulf %423, %425 : vector<2x32x8xf32>
    %427 = vector.extract_strided_slice %426 {offsets = [0, 0, 0], sizes = [2, 8, 8], strides = [1, 1, 1]} : vector<2x32x8xf32> to vector<2x8x8xf32>
    %428 = vector.extract_strided_slice %426 {offsets = [0, 8, 0], sizes = [2, 8, 8], strides = [1, 1, 1]} : vector<2x32x8xf32> to vector<2x8x8xf32>
    %429 = arith.addf %427, %428 : vector<2x8x8xf32>
    %430 = vector.extract_strided_slice %426 {offsets = [0, 16, 0], sizes = [2, 8, 8], strides = [1, 1, 1]} : vector<2x32x8xf32> to vector<2x8x8xf32>
    %431 = arith.addf %429, %430 : vector<2x8x8xf32>
    %432 = vector.extract_strided_slice %426 {offsets = [0, 24, 0], sizes = [2, 8, 8], strides = [1, 1, 1]} : vector<2x32x8xf32> to vector<2x8x8xf32>
    %433 = arith.addf %431, %432 : vector<2x8x8xf32>
    %434 = vector.shape_cast %433 : vector<2x8x8xf32> to vector<16x8xf32>
    %cst_117 = arith.constant dense<0.000000e+00> : vector<16x8xf32>
    %435 = tpu.matmul %434, %40, %cst_117 {dimension_numbers = #tpu.dot_dimension_numbers<[1], [0], [0], [1], [0, 0, 1, 1], [], []>} : vector<16x8xf32>, vector<8x8xf32>, vector<16x8xf32> -> vector<16x8xf32>
    %436 = vector.broadcast %44 : vector<1x8xf32> to vector<16x8xf32>
    %437 = arith.addf %435, %436 : vector<16x8xf32>
    %438 = vector.shape_cast %437 : vector<16x8xf32> to vector<2x8x8xf32>
    %439 = arith.addf %388, %438 : vector<2x8x8xf32>
    %440 = vector.shape_cast %439 : vector<2x8x8xf32> to vector<16x8xf32>
    %cst_118 = arith.constant dense<0.000000e+00> : vector<16x16xf32>
    %441 = tpu.matmul %440, %56, %cst_118 {dimension_numbers = #tpu.dot_dimension_numbers<[1], [0], [0], [1], [0, 0, 1, 1], [], []>} : vector<16x8xf32>, vector<8x16xf32>, vector<16x16xf32> -> vector<16x16xf32>
    %442 = vector.broadcast %57 : vector<1x16xf32> to vector<16x16xf32>
    %443 = arith.addf %441, %442 : vector<16x16xf32>
    %cst_119 = arith.constant dense<0.000000e+00> : vector<16x8xf32>
    %444 = tpu.matmul %443, %58, %cst_119 {dimension_numbers = #tpu.dot_dimension_numbers<[1], [0], [0], [1], [0, 0, 1, 1], [], []>} : vector<16x16xf32>, vector<16x8xf32>, vector<16x8xf32> -> vector<16x8xf32>
    %445 = vector.broadcast %59 : vector<1x8xf32> to vector<16x8xf32>
    %446 = arith.addf %444, %445 : vector<16x8xf32>
    %447 = vector.shape_cast %446 : vector<16x8xf32> to vector<2x8x8xf32>
    %448 = arith.addf %439, %447 : vector<2x8x8xf32>
    %449 = vector.shape_cast %448 : vector<2x8x8xf32> to vector<16x8xf32>
    %cst_120 = arith.constant dense<0.000000e+00> : vector<16x4xf32>
    %450 = tpu.matmul %449, %60, %cst_120 {dimension_numbers = #tpu.dot_dimension_numbers<[1], [0], [0], [1], [0, 0, 1, 1], [], []>} : vector<16x8xf32>, vector<8x4xf32>, vector<16x4xf32> -> vector<16x4xf32>
    %451 = vector.broadcast %61 : vector<1x4xf32> to vector<16x4xf32>
    %452 = arith.addf %450, %451 : vector<16x4xf32>
    %cst_121 = arith.constant -6.000000e+01 : f32
    %cst_122 = arith.constant 6.000000e+01 : f32
    %453 = vector.broadcast %cst_121 : f32 to vector<16x4xf32>
    %454 = arith.maximumf %453, %452 : vector<16x4xf32>
    %455 = vector.broadcast %cst_122 : f32 to vector<16x4xf32>
    %456 = arith.minimumf %455, %454 : vector<16x4xf32>
    %cst_123 = arith.constant 0.000000e+00 : f32
    %457 = vector.broadcast %cst_123 : f32 to vector<16x4xf32>
    %458 = arith.subf %457, %456 : vector<16x4xf32>
    %459 = math.exp %458 : vector<16x4xf32>
    %cst_124 = arith.constant 1.000000e+00 : f32
    %460 = vector.broadcast %cst_124 : f32 to vector<16x4xf32>
    %461 = arith.addf %460, %459 : vector<16x4xf32>
    %462 = tpu.reciprocal %461 {approx = true} : vector<16x4xf32> -> vector<16x4xf32>
    %463 = arith.mulf %461, %462 : vector<16x4xf32>
    %cst_125 = arith.constant 2.000000e+00 : f32
    %464 = vector.broadcast %cst_125 : f32 to vector<16x4xf32>
    %465 = arith.subf %464, %463 : vector<16x4xf32>
    %466 = arith.mulf %462, %465 : vector<16x4xf32>
    %467 = arith.subf %466, %73 : vector<16x4xf32>
    %468 = arith.mulf %467, %467 : vector<16x4xf32>
    %cst_126 = arith.constant dense<0.000000e+00> : vector<16x128xf32>
    %469 = tpu.matmul %269, %67, %cst_126 {dimension_numbers = #tpu.dot_dimension_numbers<[1], [0], [0], [1], [0, 0, 1, 1], [], []>} : vector<16x4xf32>, vector<4x128xf32>, vector<16x128xf32> -> vector<16x128xf32>
    %cst_127 = arith.constant dense<0.000000e+00> : vector<16x128xf32>
    %470 = tpu.matmul %466, %68, %cst_127 {dimension_numbers = #tpu.dot_dimension_numbers<[1], [0], [0], [1], [0, 0, 1, 1], [], []>} : vector<16x4xf32>, vector<4x128xf32>, vector<16x128xf32> -> vector<16x128xf32>
    %471 = arith.addf %469, %470 : vector<16x128xf32>
    %cst_128 = arith.constant dense<0.000000e+00> : vector<16x128xf32>
    %472 = tpu.matmul %468, %69, %cst_128 {dimension_numbers = #tpu.dot_dimension_numbers<[1], [0], [0], [1], [0, 0, 1, 1], [], []>} : vector<16x4xf32>, vector<4x128xf32>, vector<16x128xf32> -> vector<16x128xf32>
    %473 = arith.addf %471, %472 : vector<16x128xf32>
    %474 = vector.shape_cast %473 : vector<16x128xf32> to vector<2x8x128xf32>
    %c0_129 = arith.constant 0 : index
    %c0_130 = arith.constant 0 : index
    %c0_131 = arith.constant 0 : index
    %475 = vector.load %arg4[%c0_129, %c0_130, %c0_131] : memref<2x8x128xf32, #tpu.memory_space<vmem>>, vector<2x8x128xf32>
    tpu.vector_store %arg4[%c0_129, %c0_130, %c0_131], %474 {strides = array<i32>} : memref<2x8x128xf32, #tpu.memory_space<vmem>>, vector<2x8x128xf32>,
    return
  }
  func.func @transform_0(%arg0: i32) -> (i32, i32, i32) {
    %c0_i32 = arith.constant 0 : i32
    %c0_i32_0 = arith.constant 0 : i32
    %c0_i32_1 = arith.constant 0 : i32
    return %arg0, %c0_i32, %c0_i32_0 : i32, i32, i32
  }
  func.func @transform_1(%arg0: i32) -> (i32, i32, i32) {
    %c0_i32 = arith.constant 0 : i32
    %c0_i32_0 = arith.constant 0 : i32
    %c0_i32_1 = arith.constant 0 : i32
    return %arg0, %c0_i32, %c0_i32_0 : i32, i32, i32
  }
  func.func @transform_2(%arg0: i32) -> (i32, i32) {
    %c0_i32 = arith.constant 0 : i32
    %c0_i32_0 = arith.constant 0 : i32
    %c0_i32_1 = arith.constant 0 : i32
    return %c0_i32, %c0_i32_0 : i32, i32
  }
  func.func @transform_3(%arg0: i32) -> (i32, i32, i32) {
    %c0_i32 = arith.constant 0 : i32
    %c0_i32_0 = arith.constant 0 : i32
    %c0_i32_1 = arith.constant 0 : i32
    return %arg0, %c0_i32, %c0_i32_0 : i32, i32, i32
  }
}

</mosaic_0001>

<bundles_post_ra>
// kernel: eq.10
= control target key start
LH: loop header
LB: loop body
LE: loop exit
PB: predicated region body
PF: predicated region fallthrough
CT: control target
= control target key end

     0   :  { %vm7_vm0 = vcmask 64512   ;;  %s37_s8 = smov 8   ;;  %s38_s9 = smov 16   ;;  %vm13_vm1 = vcmask 261312   ;;  %vm19_vm2 = vcmask 195712   ;;  %vm25_vm3 = vcmask 130112   ;;  %s55_s0 = inlined_call_operand.vmem [shape: s32[4,8], index: 0, kind: input, shape index: {}]   ;;  %s56_s1 = inlined_call_operand.vmem [shape: s32[32], index: 1, kind: output, shape index: {}]  }
   0x1   :  { %v4_v0 = vld [vmem:[%s55_s0] sm:$0xf]  ;;  %s36_s0 = smov 24  }
   0x2   :  { %5 = vst [vmem:[#allocation1] sm:$0xf] %v4_v0 }
   0x9   :  { %v10_v1 = vld [vmem:[#allocation1 + $0x3] sm:$0x1]   ;;  %v22_v2 = vld [vmem:[#allocation1 + $0x1] sm:$0x1]   ;;  %v6_v3 = vld [vmem:[#allocation1] sm:$0x1]  }
   0xa   :  { %11 = vrot.lane.b32.xlu0 %v10_v1, %s36_s0  ;;  %23 = vrot.lane.b32.xlu1 %v22_v2, %s37_s8  ;;  %v16_v4 = vld [vmem:[#allocation1 + $0x2] sm:$0x1]   ;;  %8 = vst.msk [vmem:[#allocation0] sm:$0x1] %vm7_vm0, %v6_v3  }
   0xe   :  { %17 = vrot.lane.b32.xlu0 %v16_v4, %s38_s9 }
  0x7c   :  { %v12_v5 = vpop.permute.xlu0 %11   ;;  %v24_v6 = vpop.permute.xlu1 %23  }
  0x7d   :  { %14 = vst.msk [vmem:[#allocation0] sm:$0x1] %vm13_vm1, %v12_v5  }
  0x80   :  { %v18_v7 = vpop.permute.xlu0 %17  }
  0x81   :  { %20 = vst.msk [vmem:[#allocation0] sm:$0x1] %vm19_vm2, %v18_v7  }
  0x82   :  { %26 = vst.msk [vmem:[#allocation0] sm:$0x1] %vm25_vm3, %v24_v6  }
  0x89   :  { %v30_v8 = vld [vmem:[#allocation0] sm:$0x1] }
  0x8a   :  { %32 = vst [vmem:[%s56_s1] sm:$0x1] %v30_v8 }

// kernel: tranad_forward.1
= control target key start
LH: loop header
LB: loop body
LE: loop exit
PB: predicated region body
PF: predicated region fallthrough
CT: control target
= control target key end

     0   :  { %vm75_vm0 = vcmask 1043456   ;;  %vm68_vm1 = vcmask 31744   ;;  %vm244_vm2 = vcmask 64512   ;;  %v240_v16 = vlaneseq  ;;  %s8741_s2 = inlined_call_operand.vmem [shape: f32[400,128], index: 2, kind: input, shape index: {}]   ;;  %s8742_s1 = inlined_call_operand.vmem [shape: f32[2,8,4], index: 1, kind: input, shape index: {}]   ;;  %s8743_s0 = inlined_call_operand.vmem [shape: f32[2,8,4], index: 0, kind: input, shape index: {}]   ;;  %s8744_s3 = inlined_call_operand.vmem [shape: f32[2,8,128], index: 3, kind: output, shape index: {}]  }
   0x1   :  { %v56_v0 = vld [vmem:[%s8741_s2 + $0x150] sm:$0xf]  ;;  %v66_v1 = vld [vmem:[%s8742_s1] sm:$0xff]  ;;  %v67_v2 = vld [vmem:[%s8742_s1 + $0x8] sm:$0xff]  ;;  %vm1188_vm3 = vcmask 130048  }
   0x2   :  { %7065 = vmatprep.subr.msk.mxu0 %vm75_vm0, %v56_v0  ;;  %7067 = vmatprep.mubr.msk.f32.mxu0 %vm68_vm1, %v66_v1  ;;  %v54_v3 = vld [vmem:[%s8741_s2 + $0x140] sm:$0xf]  ;;  %v65_v5 = vld [vmem:[%s8743_s0 + $0x8] sm:$0xff]  ;;  %v17_v8 = vld [vmem:[%s8741_s2 + $0x10] sm:$0xff]  ;;  %v7797_v17 = vshrl.u32 %v240_v16, 7 }
   0x3   :  { %v64_v4 = vld [vmem:[%s8743_s0] sm:$0xff]  ;;  %7066 = vmatpush3.msk.msra.mxu0 %vm75_vm0, %v56_v0  ;;  %v16_v7 = vld [vmem:[%s8741_s2 + $0x8] sm:$0xff]  ;;  %v53_v11 = vld [vmem:[%s8741_s2 + $0x138] sm:$0xff] }
   0x4   :  { %7068 = vmatmul.mubr.msk.f32.vlgmr.msra.gmra.mrb[0].mxu0 %vm68_vm1, %v67_v2  ;;  %7070 = vmatprep.subr.msk.mxu0 %vm75_vm0, %v54_v3  ;;  %v15_v6 = vld [vmem:[%s8741_s2] sm:$0xff]  ;;  %v7800_v18 = vsub.s32 0, %v7797_v17  ;;  %v7803_v19 = vsub.s32 1, %v7797_v17  ;;  %v7819_v23 = vsub.s32 2, %v7797_v17  ;;  %v7824_v26 = vld [vmem:[%s8741_s2 + $0x158] sm:$0xff]  ;;  %v7844_v36 = vld [vmem:[%s8741_s2 + $0x168] sm:$0xff] }
   0x5   :  { %7071 = vmatpush3.msk.msra.mxu0 %vm75_vm0, %v54_v3  ;;  %7072 = vmatprep.mubr.msk.f32.mxu0 %vm68_vm1, %v64_v4  ;;  %v7808_v20 = vld [vmem:[%s8741_s2 + $0x20] sm:$0xf]  ;;  %v7860_v45 = vld [vmem:[%s8741_s2 + $0x170] sm:$0xff] }
   0x6   :  { %7075 = vmatprep.subr.mxu0 %v15_v6  ;;  %7080 = vmatprep.subr.mxu1 %v16_v7  ;;  %v7812_v21 = vrot.slane %v7808_v20, %v7800_v18  ;;  %v7816_v22 = vrot.slane %v7808_v20, %v7803_v19  ;;  %v7830_v31 = vrot.slane %v7808_v20, %v7819_v23  ;;  %v7835_v32 = vld [vmem:[%s8741_s2 + $0x160] sm:$0xff] }
   0x7   :  { %7081 = vmatpush3.msra.mxu1 %v16_v7 }
   0x8   :  { %7073 = vmatmul.mubr.msk.f32.vlgmr.msra.gmra.mrb[2].mxu0 %vm68_vm1, %v65_v5 }
   0x9   :  { %7076 = vmatpush3.msra.mxu0 %v15_v6 }
   0xa   :  { %7085 = vmatprep.subr.mxu0 %v17_v8 }
  0xd7   :  { %v7768_v9 = vpop.f32.mrb[0].mxu0 }
  0xd8   :  { %v7770_v10 = vpop.f32.mrb[1].mxu0 }
  0xdb   :  { %v7775_v12 = vpop.f32.mrb[2].mxu0 }
  0xdc   :  { %v7777_v13 = vpop.f32.mrb[3].mxu0  ;;  %v7783_v15 = vadd.f32 %v7775_v12, %v53_v11 }
  0xdd   :  { %v7780_v14 = vadd.f32 %v7777_v13, %v53_v11 }
  0xdf   :  { %7077 = vmatprep.mubr.msk.f32.mxu0 %vm244_vm2, %v7780_v14  ;;  %7082 = vmatprep.mubr.msk.f32.mxu1 %vm244_vm2, %v7780_v14 }
  0xe0   :  { %7078 = vmatmul.mubr.msk.f32.vlgmr.msra.gmra.mrb[4].mxu0 %vm244_vm2, %v7783_v15  ;;  %7083 = vmatmul.mubr.msk.f32.vlgmr.msra.gmra.mrb[0].mxu1 %vm244_vm2, %v7783_v15 }
  0xe1   :  { %7087 = vmatprep.mubr.msk.f32.mxu0 %vm244_vm2, %v7780_v14  ;;  %7086 = vmatpush3.msra.mxu0 %v17_v8 }
  0xe4   :  { %7088 = vmatmul.mubr.msk.f32.vlgmr.msra.gmra.mrb[6].mxu0 %vm244_vm2, %v7783_v15 }
 0x1b3   :  { %v7079_v24 = vpop.f32.mrb[4].mxu0  ;;  %v7084_v25 = vpop.f32.mrb[0].mxu1 }
 0x1b4   :  { %v323_v27 = vadd.f32 %v7079_v24, %v7812_v21  ;;  %v402_v28 = vadd.f32 %v7084_v25, %v7816_v22  ;;  %v317_v29 = vpop.f32.mrb[5].mxu0  ;;  %v396_v30 = vpop.f32.mrb[1].mxu1 }
 0x1b5   :  { %v318_v33 = vadd.f32 %v317_v29, %v7812_v21  ;;  %v397_v34 = vadd.f32 %v396_v30, %v7816_v22 }
 0x1b6   :  { %7098 = vmatprep.subr.msk.mxu0 %vm244_vm2, %v402_v28  ;;  %v488_v35 = vmul.f32 %v323_v27, %v7824_v26  ;;  %v489_v39 = vmul.f32 %v323_v27, %v7835_v32  ;;  %v490_v44 = vmul.f32 %v323_v27, %v7844_v36  ;;  %v491_v47 = vmul.f32 %v323_v27, %v7860_v45 }
 0x1b7   :  { %v7089_v37 = vpop.f32.mrb[6].mxu0  ;;  %7090 = vmatprep.subr.msk.mxu1 %vm244_vm2, %v397_v34  ;;  %7099 = vmatpush3.xpose.msk.msra.mxu0 %vm244_vm2, %v402_v28  ;;  %v484_v38 = vmul.f32 %v318_v33, %v7824_v26  ;;  %v485_v42 = vmul.f32 %v318_v33, %v7835_v32  ;;  %v486_v46 = vmul.f32 %v318_v33, %v7844_v36 }
 0x1b8   :  { %v481_v40 = vadd.f32 %v7089_v37, %v7830_v31  ;;  %v475_v41 = vpop.f32.mrb[7].mxu0  ;;  %7091 = vmatpush3.xpose.msk.msra.mxu1 %vm244_vm2, %v397_v34  ;;  %7100 = vmatprep.mubr.msk.f32.mxu0 %vm244_vm2, %v488_v35  ;;  %v487_v48 = vmul.f32 %v318_v33, %v7860_v45 }
 0x1b9   :  { %v476_v43 = vadd.f32 %v475_v41, %v7830_v31  ;;  %7092 = vmatprep.mubr.msk.f32.mxu1 %vm244_vm2, %v484_v38 }
 0x1ba   :  { %7101 = vmatmul.mubr.msk.f32.vlgmr.msra.gmra.mrb[8].mxu0 %vm244_vm2, %v489_v39  ;;  %7114 = vmatprep.subr.mxu0 %v481_v40 }
 0x1bb   :  { %7093 = vmatmul.mubr.msk.f32.vlgmr.msra.gmra.mrb[2].mxu1 %vm244_vm2, %v485_v42  ;;  %7103 = vmatprep.mubr.msk.f32.mxu0 %vm244_vm2, %v490_v44 }
 0x1bc   :  { %7106 = vmatprep.subr.mxu1 %v476_v43  ;;  %7115 = vmatpush3.msra.mxu0 %v481_v40 }
 0x1bd   :  { %7095 = vmatprep.mubr.msk.f32.mxu1 %vm244_vm2, %v486_v46  ;;  %7107 = vmatpush3.msra.mxu1 %v476_v43 }
 0x1be   :  { %7104 = vmatmul.mubr.msk.f32.gmra.mrb[10].mxu0 %vm244_vm2, %v491_v47 }
 0x1bf   :  { %7096 = vmatmul.mubr.msk.f32.gmra.mrb[4].mxu1 %vm244_vm2, %v487_v48 }
 0x28d   :  { %v7102_v49 = vpop.f32.mrb[8].mxu0 }
 0x28e   :  { %v7094_v50 = vpop.f32.mrb[2].mxu1  ;;  %v673_v51 = vpop.f32.mrb[9].mxu0  ;;  %v707_v52 = vsel %vm244_vm2, %v7102_v49, -inf }
 0x28f   :  { %708 = vmax.xlane.f32.xlu1 %v707_v52  ;;  %v573_v53 = vpop.f32.mrb[3].mxu1  ;;  %v695_v54 = vsel %vm244_vm2, %v7094_v50, -inf  ;;  %v704_v58 = vsel %vm244_vm2, %v673_v51, -inf }
 0x290   :  { %696 = vmax.xlane.f32.xlu0 %v695_v54  ;;  %v692_v60 = vsel %vm244_vm2, %v573_v53, -inf }
 0x291   :  { %v7105_v55 = vpop.f32.mrb[10].mxu0 }
 0x292   :  { %v7097_v56 = vpop.f32.mrb[4].mxu1  ;;  %v683_v57 = vpop.f32.mrb[11].mxu0  ;;  %v713_v63 = vsel %vm244_vm2, %v7105_v55, -inf }
 0x293   :  { %705 = vmax.xlane.f32.xlu1 %v704_v58  ;;  %v583_v59 = vpop.f32.mrb[5].mxu1  ;;  %v701_v61 = vsel %vm244_vm2, %v7097_v56, -inf  ;;  %v710_v0 = vsel %vm244_vm2, %v683_v57, -inf }
 0x294   :  { %693 = vmax.xlane.f32.xlu0 %v692_v60  ;;  %v698_v62 = vsel %vm244_vm2, %v583_v59, -inf }
 0x297   :  { %702 = vmax.xlane.f32.xlu1 %v701_v61 }
 0x298   :  { %699 = vmax.xlane.f32.xlu0 %v698_v62 }
 0x29b   :  { %714 = vmax.xlane.f32.xlu1 %v713_v63 }
 0x29c   :  { %711 = vmax.xlane.f32.xlu0 %v710_v0 }
 0x31c   :  { %v709_v1 = vpop.xlane.xlu1 %708 }
 0x31d   :  { %v721_v2 = vsub.f32 %v7102_v49, %v709_v1  ;;  %v697_v3 = vpop.xlane.xlu0 %696 }
 0x31e   :  { %v717_v4 = vsub.f32 %v7094_v50, %v697_v3 }
 0x31f   :  { %v734_v5 = vmul.f32 1.442695, %v721_v2 }
 0x320   :  { %v726_v6 = vmul.f32 1.442695, %v717_v4  ;;  %v706_v7 = vpop.xlane.xlu1 %705 }
 0x321   :  { %7485 = vpow2.f32 %v734_v5  ;;  %v720_v8 = vsub.f32 %v673_v51, %v706_v7  ;;  %v694_v11 = vpop.xlane.xlu0 %693 }
 0x322   :  { %v716_v16 = vsub.f32 %v573_v53, %v694_v11  ;;  %7487 = vpow2.f32 %v726_v6 }
 0x323   :  { %v732_v24 = vmul.f32 1.442695, %v720_v8 }
 0x324   :  { %v724_v25 = vmul.f32 1.442695, %v716_v16  ;;  %v703_v27 = vpop.xlane.xlu1 %702 }
 0x325   :  { %7489 = vpow2.f32 %v732_v24  ;;  %v719_v28 = vsub.f32 %v7097_v56, %v703_v27  ;;  %v700_v29 = vpop.xlane.xlu0 %699 }
 0x326   :  { %v718_v30 = vsub.f32 %v583_v59, %v700_v29  ;;  %7491 = vpow2.f32 %v724_v25 }
 0x327   :  { %v730_v33 = vmul.f32 1.442695, %v719_v28 }
 0x328   :  { %v728_v34 = vmul.f32 1.442695, %v718_v30  ;;  %v715_v35 = vpop.xlane.xlu1 %714 }
 0x329   :  { %7493 = vpow2.f32 %v730_v33  ;;  %v723_v37 = vsub.f32 %v7105_v55, %v715_v35  ;;  %v712_v38 = vpop.xlane.xlu0 %711 }
 0x32a   :  { %v722_v39 = vsub.f32 %v683_v57, %v712_v38  ;;  %7495 = vpow2.f32 %v728_v34 }
 0x32b   :  { %v7879_v40 = vpop.eup %7485  ;;  %v738_v41 = vmul.f32 1.442695, %v723_v37 }
 0x32c   :  { %v736_v42 = vmul.f32 1.442695, %v722_v39  ;;  %v755_v43 = vsel %vm244_vm2, %v7879_v40, 0.0  ;;  %v7883_v44 = vpop.eup %7487 }
 0x32d   :  { %7497 = vpow2.f32 %v738_v41  ;;  %756 = vadd.xlane.f32.xlu1 %v755_v43  ;;  %v743_v47 = vsel %vm244_vm2, %v7883_v44, 0.0 }
 0x32e   :  { %7499 = vpow2.f32 %v736_v42 }
 0x32f   :  { %v7490_v46 = vpop.eup %7489 }
 0x330   :  { %v752_v48 = vsel %vm244_vm2, %v7490_v46, 0.0  ;;  %v7492_v49 = vpop.eup %7491 }
 0x331   :  { %744 = vadd.xlane.f32.xlu1 %v743_v47  ;;  %753 = vadd.xlane.f32.xlu0 %v752_v48  ;;  %v740_v52 = vsel %vm244_vm2, %v7492_v49, 0.0 }
 0x333   :  { %v7888_v50 = vpop.eup %7493 }
 0x334   :  { %v749_v51 = vsel %vm244_vm2, %v7888_v50, 0.0  ;;  %v7893_v53 = vpop.eup %7495 }
 0x335   :  { %750 = vadd.xlane.f32.xlu1 %v749_v51  ;;  %741 = vadd.xlane.f32.xlu0 %v740_v52  ;;  %v746_v56 = vsel %vm244_vm2, %v7893_v53, 0.0 }
 0x337   :  { %v7895_v54 = vpop.eup %7497 }
 0x338   :  { %v761_v55 = vsel %vm244_vm2, %v7895_v54, 0.0  ;;  %v7901_v57 = vpop.eup %7499 }
 0x339   :  { %762 = vadd.xlane.f32.xlu1 %v761_v55  ;;  %747 = vadd.xlane.f32.xlu0 %v746_v56  ;;  %v758_v58 = vsel %vm244_vm2, %v7901_v57, 0.0 }
 0x33d   :  { %759 = vadd.xlane.f32.xlu0 %v758_v58 }
 0x3ba   :  { %v757_v59 = vpop.xlane.xlu1 %756 }
 0x3bb   :  { %7501 = vrcp.f32 %v757_v59 }
 0x3be   :  { %v745_v60 = vpop.xlane.xlu1 %744  ;;  %v754_v61 = vpop.xlane.xlu0 %753 }
 0x3bf   :  { %7503 = vrcp.f32 %v745_v60 }
 0x3c0   :  { %7505 = vrcp.f32 %v754_v61 }
 0x3c2   :  { %v751_v62 = vpop.xlane.xlu1 %750  ;;  %v742_v63 = vpop.xlane.xlu0 %741 }
 0x3c3   :  { %7507 = vrcp.f32 %v751_v62 }
 0x3c4   :  { %7509 = vrcp.f32 %v742_v63 }
 0x3c5   :  { %v7502_v0 = vpop.eup %7501 }
 0x3c6   :  { %v777_v1 = vmul.f32 %v7502_v0, %v757_v59  ;;  %v763_v2 = vpop.xlane.xlu1 %762  ;;  %v748_v3 = vpop.xlane.xlu0 %747 }
 0x3c7   :  { %7511 = vrcp.f32 %v763_v2 }
 0x3c8   :  { %7513 = vrcp.f32 %v748_v3  ;;  %v785_v6 = vsub.f32 2.0, %v777_v1  ;;  %v18_v1 = vld [vmem:[%s8741_s2 + $0x18] sm:$0xff] }
 0x3c9   :  { %v7504_v4 = vpop.eup %7503  ;;  %7122 = vmatprep.subr.mxu1 %v18_v1 }
 0x3ca   :  { %v7506_v5 = vpop.eup %7505  ;;  %v773_v7 = vmul.f32 %v7504_v4, %v745_v60  ;;  %v760_v8 = vpop.xlane.xlu0 %759  ;;  %v793_v27 = vmul.f32 %v7502_v0, %v785_v6 }
 0x3cb   :  { %v776_v11 = vmul.f32 %v7506_v5, %v754_v61  ;;  %7515 = vrcp.f32 %v760_v8 }
 0x3cc   :  { %v781_v28 = vsub.f32 2.0, %v773_v7  ;;  %v801_v39 = vmul.f32 %v7879_v40, %v793_v27 }
 0x3cd   :  { %v7508_v16 = vpop.eup %7507  ;;  %v784_v24 = vsub.f32 2.0, %v776_v11 }
 0x3ce   :  { %v7510_v25 = vpop.eup %7509  ;;  %v775_v29 = vmul.f32 %v7508_v16, %v751_v62  ;;  %v789_v41 = vmul.f32 %v7504_v4, %v781_v28 }
 0x3cf   :  { %v792_v30 = vmul.f32 %v7506_v5, %v784_v24  ;;  %v772_v33 = vmul.f32 %v7510_v25, %v742_v63 }
 0x3d0   :  { %v783_v42 = vsub.f32 2.0, %v775_v29  ;;  %v797_v58 = vmul.f32 %v7883_v44, %v789_v41 }
 0x3d1   :  { %v7512_v34 = vpop.eup %7511  ;;  %v800_v35 = vmul.f32 %v7490_v46, %v792_v30  ;;  %v780_v37 = vsub.f32 2.0, %v772_v33 }
 0x3d2   :  { %v7514_v38 = vpop.eup %7513  ;;  %v779_v43 = vmul.f32 %v7512_v34, %v763_v2  ;;  %v791_v46 = vmul.f32 %v7508_v16, %v783_v42 }
 0x3d3   :  { %v788_v47 = vmul.f32 %v7510_v25, %v780_v37  ;;  %v774_v48 = vmul.f32 %v7514_v38, %v748_v3  ;;  %7116 = vmatprep.mubr.msk.f32.mxu0 %vm244_vm2, %v800_v35 }
 0x3d4   :  { %7117 = vmatmul.mubr.msk.f32.vlgmr.msra.gmra.mrb[12].mxu0 %vm244_vm2, %v801_v39  ;;  %v787_v55 = vsub.f32 2.0, %v779_v43  ;;  %v799_v63 = vmul.f32 %v7888_v50, %v791_v46  ;;  %v40_v50 = vld [vmem:[%s8741_s2 + $0xc8] sm:$0xff]  ;;  %v7939_v39 = vsub.s32 3, %v7797_v17  ;;  %v22_v17 = vld [vmem:[%s8741_s2 + $0x38] sm:$0xff] }
 0x3d5   :  { %v7516_v51 = vpop.eup %7515  ;;  %v796_v52 = vmul.f32 %v7492_v49, %v788_v47  ;;  %v782_v56 = vsub.f32 2.0, %v774_v48  ;;  %7127 = vmatprep.subr.mxu0 %v40_v50  ;;  %v7993_v46 = vld [vmem:[%s8741_s2 + $0x48] sm:$0xf] }
 0x3d6   :  { %v778_v59 = vmul.f32 %v7516_v51, %v760_v8  ;;  %v795_v61 = vmul.f32 %v7512_v34, %v787_v55  ;;  %7128 = vmatpush3.msra.mxu0 %v40_v50  ;;  %v7943_v41 = vrot.slane %v7808_v20, %v7939_v39  ;;  %v21_v55 = vld [vmem:[%s8741_s2 + $0x30] sm:$0xff] }
 0x3d7   :  { %v790_v60 = vmul.f32 %v7514_v38, %v782_v56  ;;  %7108 = vmatprep.mubr.msk.f32.mxu1 %vm244_vm2, %v796_v52  ;;  %v20_v38 = vld [vmem:[%s8741_s2 + $0x28] sm:$0xff]  ;;  %v7984_v56 = vld [vmem:[%s8741_s2 + $0xe0] sm:$0x3] }
 0x3d8   :  { %v786_v40 = vsub.f32 2.0, %v778_v59  ;;  %7109 = vmatmul.mubr.msk.f32.vlgmr.msra.gmra.mrb[6].mxu1 %vm244_vm2, %v797_v58  ;;  %v803_v44 = vmul.f32 %v7895_v54, %v795_v61  ;;  %7139 = vmatprep.subr.mxu0 %v20_v38  ;;  %v7988_v58 = vrot.slane %v7984_v56, %v7800_v18 }
 0x3d9   :  { %v798_v62 = vmul.f32 %v7893_v53, %v790_v60  ;;  %7123 = vmatpush3.msra.mxu1 %v18_v1 }
 0x3da   :  { %v794_v0 = vmul.f32 %v7516_v51, %v786_v40  ;;  %v1275_v40 = vrot.slane %v7993_v46, %v7800_v18 }
 0x3db   :  { %7111 = vmatprep.mubr.msk.f32.mxu1 %vm244_vm2, %v798_v62 }
 0x3dc   :  { %v802_v49 = vmul.f32 %v7901_v57, %v794_v0  ;;  %7112 = vmatmul.mubr.msk.f32.gmra.mrb[8].mxu1 %vm244_vm2, %v799_v63 }
 0x3de   :  { %7119 = vmatprep.mubr.msk.f32.mxu0 %vm244_vm2, %v802_v49 }
 0x3df   :  { %7120 = vmatmul.mubr.msk.f32.gmra.mrb[14].mxu0 %vm244_vm2, %v803_v44 }
 0x4a7   :  { %v7118_v53 = vpop.f32.mrb[12].mxu0 }
 0x4a8   :  { %v1003_v57 = vmul.f32 %v7118_v53, %v7835_v32  ;;  %v979_v54 = vpop.f32.mrb[13].mxu0 }
 0x4a9   :  { %v1002_v2 = vmul.f32 %v979_v54, %v7824_v26 }
 0x4ab   :  { %v1007_v3 = vadd.f32 %v1003_v57, %v1002_v2  ;;  %v7110_v4 = vpop.f32.mrb[6].mxu1 }
 0x4ac   :  { %v999_v5 = vmul.f32 %v7110_v4, %v7835_v32  ;;  %v882_v6 = vpop.f32.mrb[7].mxu1  ;;  %v1439_v4 = vrot.slane %v7993_v46, %v7819_v23 }
 0x4ad   :  { %v998_v7 = vmul.f32 %v882_v6, %v7824_v26 }
 0x4af   :  { %v1006_v8 = vadd.f32 %v999_v5, %v998_v7  ;;  %v7113_v11 = vpop.f32.mrb[8].mxu1 }
 0x4b0   :  { %v892_v16 = vpop.f32.mrb[9].mxu1  ;;  %v1001_v27 = vmul.f32 %v7113_v11, %v7860_v45 }
 0x4b1   :  { %v1000_v24 = vmul.f32 %v892_v16, %v7844_v36 }
 0x4b2   :  { %v7121_v25 = vpop.f32.mrb[14].mxu0 }
 0x4b3   :  { %v1008_v28 = vadd.f32 %v1006_v8, %v1000_v24  ;;  %v989_v29 = vpop.f32.mrb[15].mxu0  ;;  %v1005_v34 = vmul.f32 %v7121_v25, %v7860_v45 }
 0x4b4   :  { %v1004_v30 = vmul.f32 %v989_v29, %v7844_v36 }
 0x4b5   :  { %v1010_v33 = vadd.f32 %v1008_v28, %v1001_v27 }
 0x4b6   :  { %v1009_v35 = vadd.f32 %v1007_v3, %v1004_v30  ;;  %v1360_v3 = vrot.slane %v7993_v46, %v7803_v19 }
 0x4b7   :  { %7124 = vmatprep.mubr.msk.f32.mxu1 %vm244_vm2, %v1010_v33 }
 0x4b8   :  { %v1011_v37 = vadd.f32 %v1009_v35, %v1005_v34 }
 0x4ba   :  { %7125 = vmatmul.mubr.msk.f32.vlgmr.msra.gmra.mrb[10].mxu1 %vm244_vm2, %v1011_v37 }
 0x58d   :  { %v7126_v42 = vpop.f32.mrb[10].mxu1 }
 0x58e   :  { %v1094_v43 = vadd.f32 %v7126_v42, %v7943_v41  ;;  %v1088_v47 = vpop.f32.mrb[11].mxu1 }
 0x58f   :  { %v1089_v48 = vadd.f32 %v1088_v47, %v7943_v41 }
 0x590   :  { %v7951_v52 = vadd.f32 %v1094_v43, %v7783_v15  ;;  %v42_v15 = vld [vmem:[%s8741_s2 + $0xd8] sm:$0xff] }
 0x591   :  { %v7948_v51 = vadd.f32 %v1089_v48, %v7780_v14  ;;  %v41_v14 = vld [vmem:[%s8741_s2 + $0xd0] sm:$0xff] }
 0x592   :  { %v7974_v20 = vpack.c.bf16 %v42_v15, %v41_v14 }
 0x593   :  { %7129 = vmatprep.mubr.msk.f32.mxu0 %vm244_vm2, %v7948_v51 }
 0x594   :  { %7130 = vmatmul.mubr.msk.f32.vlgmr.msra.gmra.mrb[16].mxu0 %vm244_vm2, %v7951_v52  ;;  %7466 = vmatprep.subr.bf16.mxu1 %v7974_v20 }
 0x595   :  { %7141 = vmatprep.mubr.msk.f32.mxu0 %vm244_vm2, %v7770_v10  ;;  %7140 = vmatpush3.msra.mxu0 %v20_v38 }
 0x596   :  { %7149 = vmatprep.subr.mxu0 %v22_v17  ;;  %7468 = vmatpush3.bf16.msra.mxu1 %v7974_v20 }
 0x597   :  { %7144 = vmatprep.subr.mxu1 %v21_v55 }
 0x598   :  { %7142 = vmatmul.mubr.msk.f32.vlgmr.msra.gmra.mrb[18].mxu0 %vm244_vm2, %v7768_v9 }
 0x599   :  { %7151 = vmatprep.mubr.msk.f32.mxu0 %vm244_vm2, %v7770_v10  ;;  %7150 = vmatpush3.msra.mxu0 %v22_v17 }
 0x59c   :  { %7152 = vmatmul.mubr.msk.f32.vlgmr.msra.gmra.mrb[20].mxu0 %vm244_vm2, %v7768_v9 }
 0x667   :  { %v7131_v59 = vpop.f32.mrb[16].mxu0 }
 0x668   :  { %v1175_v60 = vpop.f32.mrb[17].mxu0  ;;  %v1181_v62 = vadd.f32 %v7131_v59, %v7988_v58 }
 0x669   :  { %v1176_v61 = vadd.f32 %v1175_v60, %v7988_v58 }
 0x66b   :  { %7136 = vmatprep.mubr.msk.f32.mxu1 %vm1188_vm3, %v1176_v61  ;;  %v7143_v63 = vpop.f32.mrb[18].mxu0 }
 0x66c   :  { %v1354_v0 = vadd.f32 %v7143_v63, %v1275_v40  ;;  %7137 = vmatmul.mubr.msk.f32.vlgmr.msra.gmra.mrb[12].mxu1 %vm1188_vm3, %v1181_v62  ;;  %v1348_v49 = vpop.f32.mrb[19].mxu0 }
 0x66d   :  { %v1349_v44 = vadd.f32 %v1348_v49, %v1275_v40  ;;  %7145 = vmatpush3.msra.mxu1 %v21_v55  ;;  %7146 = vmatprep.mubr.msk.f32.mxu1 %vm244_vm2, %v7770_v10 }
 0x66e   :  { %v1519_v1 = vmul.f32 %v1354_v0, %v7824_v26  ;;  %v1520_v24 = vmul.f32 %v1354_v0, %v7835_v32  ;;  %v1521_v27 = vmul.f32 %v1354_v0, %v7844_v36  ;;  %v1522_v29 = vmul.f32 %v1354_v0, %v7860_v45 }
 0x66f   :  { %v7153_v50 = vpop.f32.mrb[20].mxu0  ;;  %v1515_v53 = vmul.f32 %v1349_v44, %v7824_v26  ;;  %v1516_v25 = vmul.f32 %v1349_v44, %v7835_v32  ;;  %v1517_v28 = vmul.f32 %v1349_v44, %v7844_v36  ;;  %v1518_v30 = vmul.f32 %v1349_v44, %v7860_v45 }
 0x670   :  { %7147 = vmatmul.mubr.msk.f32.vlgmr.msra.gmra.mrb[14].mxu1 %vm244_vm2, %v7768_v9  ;;  %v1506_v57 = vpop.f32.mrb[21].mxu0  ;;  %7164 = vmatprep.mubr.msk.f32.mxu0 %vm244_vm2, %v1519_v1  ;;  %v1512_v11 = vadd.f32 %v7153_v50, %v1439_v4 }
 0x671   :  { %7156 = vmatprep.mubr.msk.f32.mxu1 %vm244_vm2, %v1515_v53  ;;  %v1507_v16 = vadd.f32 %v1506_v57, %v1439_v4 }
 0x73f   :  { %v8009_v54 = vpop.f32.mrb[12].mxu1 }
 0x740   :  { %v8011_v2 = vpop.f32.mrb[13].mxu1 }
 0x743   :  { %v7148_v5 = vpop.f32.mrb[14].mxu1 }
 0x744   :  { %v1433_v6 = vadd.f32 %v7148_v5, %v1360_v3  ;;  %v1427_v7 = vpop.f32.mrb[15].mxu1 }
 0x745   :  { %v1428_v8 = vadd.f32 %v1427_v7, %v1360_v3 }
 0x746   :  { %7162 = vmatprep.subr.msk.mxu0 %vm244_vm2, %v1433_v6 }
 0x747   :  { %7154 = vmatprep.subr.msk.mxu1 %vm244_vm2, %v1428_v8  ;;  %7163 = vmatpush3.xpose.msk.msra.mxu0 %vm244_vm2, %v1433_v6 }
 0x748   :  { %7155 = vmatpush3.xpose.msk.msra.mxu1 %vm244_vm2, %v1428_v8  ;;  %7178 = vmatprep.subr.mxu0 %v1512_v11 }
 0x749   :  { %7170 = vmatprep.subr.mxu1 %v1507_v16 }
 0x74a   :  { %7165 = vmatmul.mubr.msk.f32.vlgmr.msra.gmra.mrb[22].mxu0 %vm244_vm2, %v1520_v24 }
 0x74b   :  { %7157 = vmatmul.mubr.msk.f32.vlgmr.msra.gmra.mrb[16].mxu1 %vm244_vm2, %v1516_v25  ;;  %7167 = vmatprep.mubr.msk.f32.mxu0 %vm244_vm2, %v1521_v27 }
 0x74c   :  { %7179 = vmatpush3.msra.mxu0 %v1512_v11  ;;  %7159 = vmatprep.mubr.msk.f32.mxu1 %vm244_vm2, %v1517_v28 }
 0x74d   :  { %7171 = vmatpush3.msra.mxu1 %v1507_v16 }
 0x74e   :  { %7168 = vmatmul.mubr.msk.f32.gmra.mrb[24].mxu0 %vm244_vm2, %v1522_v29 }
 0x74f   :  { %7160 = vmatmul.mubr.msk.f32.gmra.mrb[18].mxu1 %vm244_vm2, %v1518_v30 }
 0x81d   :  { %v7166_v33 = vpop.f32.mrb[22].mxu0 }
 0x81e   :  { %v7158_v34 = vpop.f32.mrb[16].mxu1  ;;  %v1704_v35 = vpop.f32.mrb[23].mxu0  ;;  %v1738_v37 = vsel %vm244_vm2, %v7166_v33, -inf }
 0x81f   :  { %1739 = vmax.xlane.f32.xlu1 %v1738_v37  ;;  %v1604_v38 = vpop.f32.mrb[17].mxu1  ;;  %v1735_v42 = vsel %vm244_vm2, %v1704_v35, -inf  ;;  %v1726_v17 = vsel %vm244_vm2, %v7158_v34, -inf }
 0x820   :  { %1736 = vmax.xlane.f32.xlu0 %v1735_v42  ;;  %v1723_v15 = vsel %vm244_vm2, %v1604_v38, -inf }
 0x821   :  { %v7169_v43 = vpop.f32.mrb[24].mxu0 }
 0x822   :  { %v7161_v47 = vpop.f32.mrb[18].mxu1  ;;  %v1714_v48 = vpop.f32.mrb[25].mxu0  ;;  %v1744_v60 = vsel %vm244_vm2, %v7169_v43, -inf }
 0x823   :  { %1727 = vmax.xlane.f32.xlu1 %v1726_v17  ;;  %v1614_v14 = vpop.f32.mrb[19].mxu1  ;;  %v1732_v55 = vsel %vm244_vm2, %v7161_v47, -inf  ;;  %v1741_v40 = vsel %vm244_vm2, %v1714_v48, -inf }
 0x824   :  { %1724 = vmax.xlane.f32.xlu0 %v1723_v15  ;;  %v1729_v59 = vsel %vm244_vm2, %v1614_v14, -inf }
 0x827   :  { %1733 = vmax.xlane.f32.xlu1 %v1732_v55 }
 0x828   :  { %1730 = vmax.xlane.f32.xlu0 %v1729_v59 }
 0x82b   :  { %1745 = vmax.xlane.f32.xlu1 %v1744_v60 }
 0x82c   :  { %1742 = vmax.xlane.f32.xlu0 %v1741_v40 }
 0x8ac   :  { %v1740_v61 = vpop.xlane.xlu1 %1739 }
 0x8ad   :  { %v1752_v62 = vsub.f32 %v7166_v33, %v1740_v61  ;;  %v1737_v63 = vpop.xlane.xlu0 %1736 }
 0x8ae   :  { %v1751_v0 = vsub.f32 %v1704_v35, %v1737_v63 }
 0x8af   :  { %v1765_v49 = vmul.f32 1.442695, %v1752_v62 }
 0x8b0   :  { %v1763_v44 = vmul.f32 1.442695, %v1751_v0  ;;  %v1728_v1 = vpop.xlane.xlu1 %1727 }
 0x8b1   :  { %7517 = vpow2.f32 %v1765_v49  ;;  %v1748_v50 = vsub.f32 %v7158_v34, %v1728_v1  ;;  %v1725_v53 = vpop.xlane.xlu0 %1724 }
 0x8b2   :  { %7519 = vpow2.f32 %v1763_v44  ;;  %v1747_v57 = vsub.f32 %v1604_v38, %v1725_v53 }
 0x8b3   :  { %v1757_v3 = vmul.f32 1.442695, %v1748_v50 }
 0x8b4   :  { %v1755_v4 = vmul.f32 1.442695, %v1747_v57  ;;  %v1734_v5 = vpop.xlane.xlu1 %1733 }
 0x8b5   :  { %7521 = vpow2.f32 %v1757_v3  ;;  %v1750_v6 = vsub.f32 %v7161_v47, %v1734_v5  ;;  %v1731_v7 = vpop.xlane.xlu0 %1730 }
 0x8b6   :  { %7523 = vpow2.f32 %v1755_v4  ;;  %v1749_v8 = vsub.f32 %v1614_v14, %v1731_v7 }
 0x8b7   :  { %v1761_v11 = vmul.f32 1.442695, %v1750_v6 }
 0x8b8   :  { %v1759_v16 = vmul.f32 1.442695, %v1749_v8  ;;  %v1746_v24 = vpop.xlane.xlu1 %1745 }
 0x8b9   :  { %7525 = vpow2.f32 %v1761_v11  ;;  %v1754_v25 = vsub.f32 %v7169_v43, %v1746_v24  ;;  %v1743_v27 = vpop.xlane.xlu0 %1742 }
 0x8ba   :  { %7527 = vpow2.f32 %v1759_v16  ;;  %v1753_v28 = vsub.f32 %v1714_v48, %v1743_v27 }
 0x8bb   :  { %v7518_v29 = vpop.eup %7517  ;;  %v1769_v30 = vmul.f32 1.442695, %v1754_v25 }
 0x8bc   :  { %v7520_v33 = vpop.eup %7519  ;;  %v1767_v34 = vmul.f32 1.442695, %v1753_v28  ;;  %v1786_v35 = vsel %vm244_vm2, %v7518_v29, 0.0 }
 0x8bd   :  { %7529 = vpow2.f32 %v1769_v30  ;;  %1787 = vadd.xlane.f32.xlu1 %v1786_v35  ;;  %v1783_v37 = vsel %vm244_vm2, %v7520_v33, 0.0 }
 0x8be   :  { %7531 = vpow2.f32 %v1767_v34  ;;  %1784 = vadd.xlane.f32.xlu0 %v1783_v37 }
 0x8bf   :  { %v8043_v38 = vpop.eup %7521 }
 0x8c0   :  { %v7524_v42 = vpop.eup %7523  ;;  %v1774_v43 = vsel %vm244_vm2, %v8043_v38, 0.0 }
 0x8c1   :  { %1775 = vadd.xlane.f32.xlu1 %v1774_v43  ;;  %v1771_v47 = vsel %vm244_vm2, %v7524_v42, 0.0 }
 0x8c2   :  { %1772 = vadd.xlane.f32.xlu0 %v1771_v47 }
 0x8c3   :  { %v8048_v48 = vpop.eup %7525 }
 0x8c4   :  { %v8050_v17 = vpop.eup %7527  ;;  %v1780_v14 = vsel %vm244_vm2, %v8048_v48, 0.0 }
 0x8c5   :  { %1781 = vadd.xlane.f32.xlu1 %v1780_v14  ;;  %v1777_v15 = vsel %vm244_vm2, %v8050_v17, 0.0 }
 0x8c6   :  { %1778 = vadd.xlane.f32.xlu0 %v1777_v15 }
 0x8c7   :  { %v8056_v55 = vpop.eup %7529 }
 0x8c8   :  { %v8058_v59 = vpop.eup %7531  ;;  %v1792_v60 = vsel %vm244_vm2, %v8056_v55, 0.0 }
 0x8c9   :  { %1793 = vadd.xlane.f32.xlu1 %v1792_v60  ;;  %v1789_v40 = vsel %vm244_vm2, %v8058_v59, 0.0 }
 0x8ca   :  { %1790 = vadd.xlane.f32.xlu0 %v1789_v40 }
 0x94a   :  { %v1788_v61 = vpop.xlane.xlu1 %1787 }
 0x94b   :  { %7533 = vrcp.f32 %v1788_v61  ;;  %v1785_v62 = vpop.xlane.xlu0 %1784 }
 0x94c   :  { %7535 = vrcp.f32 %v1785_v62 }
 0x94e   :  { %v1776_v63 = vpop.xlane.xlu1 %1775 }
 0x94f   :  { %7537 = vrcp.f32 %v1776_v63  ;;  %v1773_v0 = vpop.xlane.xlu0 %1772 }
 0x950   :  { %7539 = vrcp.f32 %v1773_v0 }
 0x952   :  { %v1782_v49 = vpop.xlane.xlu1 %1781 }
 0x953   :  { %7541 = vrcp.f32 %v1782_v49  ;;  %v1779_v44 = vpop.xlane.xlu0 %1778 }
 0x954   :  { %7543 = vrcp.f32 %v1779_v44 }
 0x955   :  { %v7534_v1 = vpop.eup %7533 }
 0x956   :  { %v7536_v50 = vpop.eup %7535  ;;  %v1808_v53 = vmul.f32 %v7534_v1, %v1788_v61  ;;  %v1794_v57 = vpop.xlane.xlu1 %1793 }
 0x957   :  { %v1807_v3 = vmul.f32 %v7536_v50, %v1785_v62  ;;  %7545 = vrcp.f32 %v1794_v57  ;;  %v1791_v4 = vpop.xlane.xlu0 %1790 }
 0x958   :  { %v1816_v5 = vsub.f32 2.0, %v1808_v53  ;;  %7547 = vrcp.f32 %v1791_v4 }
 0x959   :  { %v7538_v6 = vpop.eup %7537  ;;  %v1815_v7 = vsub.f32 2.0, %v1807_v3 }
 0x95a   :  { %v7540_v8 = vpop.eup %7539  ;;  %v1824_v11 = vmul.f32 %v7534_v1, %v1816_v5  ;;  %v1804_v16 = vmul.f32 %v7538_v6, %v1776_v63 }
 0x95b   :  { %v1823_v24 = vmul.f32 %v7536_v50, %v1815_v7  ;;  %v1803_v25 = vmul.f32 %v7540_v8, %v1773_v0 }
 0x95c   :  { %v1812_v27 = vsub.f32 2.0, %v1804_v16  ;;  %v1832_v37 = vmul.f32 %v7518_v29, %v1824_v11 }
 0x95d   :  { %v7542_v28 = vpop.eup %7541  ;;  %v1831_v30 = vmul.f32 %v7520_v33, %v1823_v24  ;;  %v1811_v34 = vsub.f32 2.0, %v1803_v25 }
 0x95e   :  { %v7544_v35 = vpop.eup %7543  ;;  %v1820_v43 = vmul.f32 %v7538_v6, %v1812_v27  ;;  %v1806_v47 = vmul.f32 %v7542_v28, %v1782_v49 }
 0x95f   :  { %v1819_v14 = vmul.f32 %v7540_v8, %v1811_v34  ;;  %v1805_v15 = vmul.f32 %v7544_v35, %v1779_v44  ;;  %7180 = vmatprep.mubr.msk.f32.mxu0 %vm244_vm2, %v1831_v30 }
 0x960   :  { %v1814_v60 = vsub.f32 2.0, %v1806_v47  ;;  %7181 = vmatmul.mubr.msk.f32.vlgmr.msra.gmra.mrb[26].mxu0 %vm244_vm2, %v1832_v37  ;;  %v1828_v0 = vmul.f32 %v8043_v38, %v1820_v43 }
 0x961   :  { %v7546_v40 = vpop.eup %7545  ;;  %v1827_v61 = vmul.f32 %v7524_v42, %v1819_v14  ;;  %v1813_v62 = vsub.f32 2.0, %v1805_v15 }
 0x962   :  { %v7548_v63 = vpop.eup %7547  ;;  %v1822_v1 = vmul.f32 %v7542_v28, %v1814_v60  ;;  %v1810_v33 = vmul.f32 %v7546_v40, %v1794_v57 }
 0x963   :  { %v1821_v50 = vmul.f32 %v7544_v35, %v1813_v62  ;;  %v1809_v53 = vmul.f32 %v7548_v63, %v1791_v4  ;;  %7172 = vmatprep.mubr.msk.f32.mxu1 %vm244_vm2, %v1827_v61  ;;  %v8093_v35 = vrot.slane %v7984_v56, %v7803_v19 }
 0x964   :  { %v1818_v29 = vsub.f32 2.0, %v1810_v33  ;;  %7173 = vmatmul.mubr.msk.f32.vlgmr.msra.gmra.mrb[20].mxu1 %vm244_vm2, %v1828_v0  ;;  %v1830_v3 = vmul.f32 %v8048_v48, %v1822_v1  ;;  %v26_v48 = vld [vmem:[%s8741_s2 + $0x58] sm:$0xff] }
 0x965   :  { %v1829_v49 = vmul.f32 %v8050_v17, %v1821_v50  ;;  %v1817_v44 = vsub.f32 2.0, %v1809_v53  ;;  %v23_v17 = vld [vmem:[%s8741_s2 + $0x40] sm:$0xff]  ;;  %v1267_v56 = vadd.f32 %v8009_v54, %v8093_v35  ;;  %v2046_v54 = vrot.slane %v7993_v46, %v7939_v39 }
 0x966   :  { %v1826_v5 = vmul.f32 %v7546_v40, %v1818_v29  ;;  %7186 = vmatprep.subr.mxu1 %v23_v17  ;;  %v1262_v40 = vadd.f32 %v8011_v2, %v8093_v35  ;;  %v27_v2 = vld [vmem:[%s8741_s2 + $0x60] sm:$0xff] }
 0x967   :  { %v1825_v42 = vmul.f32 %v7548_v63, %v1817_v44  ;;  %7175 = vmatprep.mubr.msk.f32.mxu1 %vm244_vm2, %v1829_v49  ;;  %7187 = vmatpush3.msra.mxu1 %v23_v17  ;;  %v1271_v1 = vadd.f32 %v1267_v56, %v7951_v52 }
 0x968   :  { %7176 = vmatmul.mubr.msk.f32.gmra.mrb[22].mxu1 %vm244_vm2, %v1830_v3  ;;  %v1834_v57 = vmul.f32 %v8056_v55, %v1826_v5  ;;  %7196 = vmatprep.subr.mxu1 %v26_v48  ;;  %v1270_v0 = vadd.f32 %v1262_v40, %v7948_v51  ;;  %v8116_v51 = vld [vmem:[%s8741_s2 + $0x70] sm:$0xf] }
 0x969   :  { %v1833_v38 = vmul.f32 %v8058_v59, %v1825_v42  ;;  %v25_v59 = vld [vmem:[%s8741_s2 + $0x50] sm:$0xff]  ;;  %v2218_v52 = vrot.slane %v8116_v51, %v7803_v19 }
 0x96a   :  { %7191 = vmatprep.subr.mxu0 %v25_v59 }
 0x96b   :  { %7183 = vmatprep.mubr.msk.f32.mxu0 %vm244_vm2, %v1833_v38  ;;  %7192 = vmatpush3.msra.mxu0 %v25_v59  ;;  %v2133_v38 = vrot.slane %v8116_v51, %v7800_v18  ;;  %v2303_v59 = vrot.slane %v8116_v51, %v7819_v23 }
 0x96c   :  { %7184 = vmatmul.mubr.msk.f32.gmra.mrb[28].mxu0 %vm244_vm2, %v1834_v57  ;;  %7201 = vmatprep.subr.mxu0 %v27_v2 }
 0xa33   :  { %v7182_v55 = vpop.f32.mrb[26].mxu0 }
 0xa34   :  { %v2034_v4 = vmul.f32 %v7182_v55, %v7835_v32  ;;  %v2010_v6 = vpop.f32.mrb[27].mxu0 }
 0xa35   :  { %v2033_v7 = vmul.f32 %v2010_v6, %v7824_v26 }
 0xa37   :  { %v2038_v8 = vadd.f32 %v2034_v4, %v2033_v7  ;;  %v7174_v11 = vpop.f32.mrb[20].mxu1 }
 0xa38   :  { %v2030_v16 = vmul.f32 %v7174_v11, %v7835_v32  ;;  %v1913_v24 = vpop.f32.mrb[21].mxu1  ;;  %v8146_v11 = vld [vmem:[%s8741_s2 + $0x158] sm:$0xff] }
 0xa39   :  { %v2029_v25 = vmul.f32 %v1913_v24, %v7824_v26 }
 0xa3b   :  { %v2037_v27 = vadd.f32 %v2030_v16, %v2029_v25  ;;  %v7177_v28 = vpop.f32.mrb[22].mxu1 }
 0xa3c   :  { %v1923_v30 = vpop.f32.mrb[23].mxu1  ;;  %v2032_v37 = vmul.f32 %v7177_v28, %v7860_v45 }
 0xa3d   :  { %v2031_v34 = vmul.f32 %v1923_v30, %v7844_v36 }
 0xa3f   :  { %v2039_v43 = vadd.f32 %v2037_v27, %v2031_v34  ;;  %v7185_v47 = vpop.f32.mrb[28].mxu0 }
 0xa40   :  { %v2020_v14 = vpop.f32.mrb[29].mxu0  ;;  %v2036_v61 = vmul.f32 %v7185_v47, %v7860_v45 }
 0xa41   :  { %v2041_v15 = vadd.f32 %v2039_v43, %v2032_v37  ;;  %v2035_v60 = vmul.f32 %v2020_v14, %v7844_v36 }
 0xa43   :  { %v2040_v62 = vadd.f32 %v2038_v8, %v2035_v60  ;;  %7188 = vmatprep.mubr.msk.f32.mxu1 %vm244_vm2, %v2041_v15 }
 0xa45   :  { %v2042_v63 = vadd.f32 %v2040_v62, %v2036_v61 }
 0xa47   :  { %7189 = vmatmul.mubr.msk.f32.vlgmr.msra.gmra.mrb[24].mxu1 %vm244_vm2, %v2042_v63 }
 0xa48   :  { %7198 = vmatprep.mubr.msk.f32.mxu1 %vm244_vm2, %v1270_v0  ;;  %7197 = vmatpush3.msra.mxu1 %v26_v48 }
 0xa4b   :  { %7199 = vmatmul.mubr.msk.f32.vlgmr.msra.gmra.mrb[26].mxu1 %vm244_vm2, %v1271_v1 }
 0xb1a   :  { %v7190_v33 = vpop.f32.mrb[24].mxu1 }
 0xb1b   :  { %v2125_v50 = vadd.f32 %v7190_v33, %v2046_v54  ;;  %v2119_v53 = vpop.f32.mrb[25].mxu1 }
 0xb1c   :  { %v2120_v29 = vadd.f32 %v2119_v53, %v2046_v54 }
 0xb1d   :  { %v8121_v49 = vadd.f32 %v7768_v9, %v2125_v50 }
 0xb1e   :  { %v8124_v44 = vadd.f32 %v2120_v29, %v7770_v10  ;;  %v7200_v3 = vpop.f32.mrb[26].mxu1 }
 0xb1f   :  { %v2297_v46 = vadd.f32 %v7200_v3, %v2218_v52  ;;  %v2291_v5 = vpop.f32.mrb[27].mxu1 }
 0xb20   :  { %v2292_v42 = vadd.f32 %v2291_v5, %v2218_v52  ;;  %7193 = vmatprep.mubr.msk.f32.mxu0 %vm244_vm2, %v8124_v44 }
 0xb21   :  { %7194 = vmatmul.mubr.msk.f32.vlgmr.msra.gmra.mrb[30].mxu0 %vm244_vm2, %v8121_v49 }
 0xb22   :  { %7202 = vmatpush3.msra.mxu0 %v27_v2  ;;  %7203 = vmatprep.mubr.msk.f32.mxu0 %vm244_vm2, %v1270_v0 }
 0xb23   :  { %7206 = vmatprep.subr.msk.mxu1 %vm244_vm2, %v2292_v42  ;;  %7214 = vmatprep.subr.msk.mxu0 %vm244_vm2, %v2297_v46 }
 0xb24   :  { %7207 = vmatpush3.xpose.msk.msra.mxu1 %vm244_vm2, %v2292_v42 }
 0xb25   :  { %7204 = vmatmul.mubr.msk.f32.vlgmr.msra.gmra.mrb[32].mxu0 %vm244_vm2, %v1271_v1 }
 0xb29   :  { %7215 = vmatpush3.xpose.msk.msra.mxu0 %vm244_vm2, %v2297_v46 }
 0xbf4   :  { %v7195_v57 = vpop.f32.mrb[30].mxu0 }
 0xbf5   :  { %v2212_v17 = vadd.f32 %v7195_v57, %v2133_v38  ;;  %v2206_v48 = vpop.f32.mrb[31].mxu0 }
 0xbf6   :  { %v2207_v55 = vadd.f32 %v2206_v48, %v2133_v38 }
 0xbf7   :  { %v2384_v4 = vmul.f32 %v2212_v17, %v7835_v32  ;;  %v2383_v6 = vmul.f32 %v2212_v17, %v7824_v26  ;;  %v2385_v27 = vmul.f32 %v2212_v17, %v7844_v36 }
 0xbf8   :  { %v2380_v7 = vmul.f32 %v2207_v55, %v7835_v32  ;;  %v7205_v8 = vpop.f32.mrb[32].mxu0  ;;  %v2379_v16 = vmul.f32 %v8146_v11, %v2207_v55  ;;  %v2381_v26 = vmul.f32 %v2207_v55, %v7844_v36  ;;  %v2386_v32 = vmul.f32 %v2212_v17, %v7860_v45 }
 0xbf9   :  { %v2376_v24 = vadd.f32 %v7205_v8, %v2303_v59  ;;  %v2370_v25 = vpop.f32.mrb[33].mxu0  ;;  %7216 = vmatprep.mubr.msk.f32.mxu0 %vm244_vm2, %v2383_v6  ;;  %v2382_v30 = vmul.f32 %v2207_v55, %v7860_v45 }
 0xbfa   :  { %v2371_v28 = vadd.f32 %v2370_v25, %v2303_v59  ;;  %7208 = vmatprep.mubr.msk.f32.mxu1 %vm244_vm2, %v2379_v16  ;;  %7217 = vmatmul.mubr.msk.f32.vlgmr.msra.gmra.mrb[34].mxu0 %vm244_vm2, %v2384_v4 }
 0xbfb   :  { %7209 = vmatmul.mubr.msk.f32.vlgmr.msra.gmra.mrb[28].mxu1 %vm244_vm2, %v2380_v7  ;;  %7219 = vmatprep.mubr.msk.f32.mxu0 %vm244_vm2, %v2385_v27 }
 0xbfc   :  { %7230 = vmatprep.subr.mxu0 %v2376_v24  ;;  %7211 = vmatprep.mubr.msk.f32.mxu1 %vm244_vm2, %v2381_v26 }
 0xbfd   :  { %7222 = vmatprep.subr.mxu1 %v2371_v28  ;;  %7231 = vmatpush3.msra.mxu0 %v2376_v24 }
 0xbfe   :  { %7223 = vmatpush3.msra.mxu1 %v2371_v28  ;;  %7220 = vmatmul.mubr.msk.f32.gmra.mrb[36].mxu0 %vm244_vm2, %v2386_v32 }
 0xbff   :  { %7212 = vmatmul.mubr.msk.f32.gmra.mrb[30].mxu1 %vm244_vm2, %v2382_v30 }
 0xccd   :  { %v7218_v34 = vpop.f32.mrb[34].mxu0 }
 0xcce   :  { %v7210_v36 = vpop.f32.mrb[28].mxu1  ;;  %v2568_v37 = vpop.f32.mrb[35].mxu0  ;;  %v2602_v43 = vsel %vm244_vm2, %v7218_v34, -inf }
 0xccf   :  { %2603 = vmax.xlane.f32.xlu1 %v2602_v43  ;;  %v2468_v47 = vpop.f32.mrb[29].mxu1  ;;  %v2599_v14 = vsel %vm244_vm2, %v2568_v37, -inf  ;;  %v2590_v45 = vsel %vm244_vm2, %v7210_v36, -inf }
 0xcd0   :  { %2600 = vmax.xlane.f32.xlu0 %v2599_v14  ;;  %v2587_v62 = vsel %vm244_vm2, %v2468_v47, -inf }
 0xcd1   :  { %v7221_v15 = vpop.f32.mrb[36].mxu0 }
 0xcd2   :  { %v7213_v60 = vpop.f32.mrb[30].mxu1  ;;  %v2578_v40 = vpop.f32.mrb[37].mxu0  ;;  %v2608_v0 = vsel %vm244_vm2, %v7221_v15, -inf }
 0xcd3   :  { %2591 = vmax.xlane.f32.xlu1 %v2590_v45  ;;  %v2478_v61 = vpop.f32.mrb[31].mxu1  ;;  %v2596_v56 = vsel %vm244_vm2, %v7213_v60, -inf  ;;  %v2605_v1 = vsel %vm244_vm2, %v2578_v40, -inf }
 0xcd4   :  { %2588 = vmax.xlane.f32.xlu0 %v2587_v62  ;;  %v2593_v63 = vsel %vm244_vm2, %v2478_v61, -inf }
 0xcd7   :  { %2597 = vmax.xlane.f32.xlu1 %v2596_v56 }
 0xcd8   :  { %2594 = vmax.xlane.f32.xlu0 %v2593_v63 }
 0xcdb   :  { %2609 = vmax.xlane.f32.xlu1 %v2608_v0 }
 0xcdc   :  { %2606 = vmax.xlane.f32.xlu0 %v2605_v1 }
 0xd5c   :  { %v2604_v2 = vpop.xlane.xlu1 %2603 }
 0xd5d   :  { %v2616_v54 = vsub.f32 %v7218_v34, %v2604_v2  ;;  %v2601_v33 = vpop.xlane.xlu0 %2600 }
 0xd5e   :  { %v2615_v50 = vsub.f32 %v2568_v37, %v2601_v33 }
 0xd5f   :  { %v2629_v53 = vmul.f32 1.442695, %v2616_v54 }
 0xd60   :  { %v2627_v52 = vmul.f32 1.442695, %v2615_v50  ;;  %v2592_v29 = vpop.xlane.xlu1 %2591 }
 0xd61   :  { %7549 = vpow2.f32 %v2629_v53  ;;  %v2612_v3 = vsub.f32 %v7210_v36, %v2592_v29  ;;  %v2589_v46 = vpop.xlane.xlu0 %2588 }
 0xd62   :  { %7551 = vpow2.f32 %v2627_v52  ;;  %v2611_v5 = vsub.f32 %v2468_v47, %v2589_v46 }
 0xd63   :  { %v2621_v42 = vmul.f32 1.442695, %v2612_v3 }
 0xd64   :  { %v2619_v38 = vmul.f32 1.442695, %v2611_v5  ;;  %v2598_v57 = vpop.xlane.xlu1 %2597 }
 0xd65   :  { %7553 = vpow2.f32 %v2621_v42  ;;  %v2614_v17 = vsub.f32 %v7213_v60, %v2598_v57  ;;  %v2595_v48 = vpop.xlane.xlu0 %2594 }
 0xd66   :  { %7555 = vpow2.f32 %v2619_v38  ;;  %v2613_v59 = vsub.f32 %v2478_v61, %v2595_v48 }
 0xd67   :  { %v2625_v55 = vmul.f32 1.442695, %v2614_v17 }
 0xd68   :  { %v2623_v4 = vmul.f32 1.442695, %v2613_v59  ;;  %v2610_v6 = vpop.xlane.xlu1 %2609 }
 0xd69   :  { %7557 = vpow2.f32 %v2625_v55  ;;  %v2618_v7 = vsub.f32 %v7221_v15, %v2610_v6  ;;  %v2607_v8 = vpop.xlane.xlu0 %2606 }
 0xd6a   :  { %7559 = vpow2.f32 %v2623_v4  ;;  %v2617_v16 = vsub.f32 %v2578_v40, %v2607_v8 }
 0xd6b   :  { %v7550_v24 = vpop.eup %7549  ;;  %v2633_v25 = vmul.f32 1.442695, %v2618_v7 }
 0xd6c   :  { %v7552_v27 = vpop.eup %7551  ;;  %v2631_v28 = vmul.f32 1.442695, %v2617_v16  ;;  %v2650_v26 = vsel %vm244_vm2, %v7550_v24, 0.0 }
 0xd6d   :  { %7561 = vpow2.f32 %v2633_v25  ;;  %2651 = vadd.xlane.f32.xlu1 %v2650_v26  ;;  %v2647_v32 = vsel %vm244_vm2, %v7552_v27, 0.0 }
 0xd6e   :  { %7563 = vpow2.f32 %v2631_v28  ;;  %2648 = vadd.xlane.f32.xlu0 %v2647_v32 }
 0xd6f   :  { %v8171_v30 = vpop.eup %7553 }
 0xd70   :  { %v7556_v34 = vpop.eup %7555  ;;  %v2638_v36 = vsel %vm244_vm2, %v8171_v30, 0.0 }
 0xd71   :  { %2639 = vadd.xlane.f32.xlu1 %v2638_v36  ;;  %v2635_v37 = vsel %vm244_vm2, %v7556_v34, 0.0 }
 0xd72   :  { %2636 = vadd.xlane.f32.xlu0 %v2635_v37 }
 0xd73   :  { %v8176_v43 = vpop.eup %7557 }
 0xd74   :  { %v8178_v47 = vpop.eup %7559  ;;  %v2644_v14 = vsel %vm244_vm2, %v8176_v43, 0.0 }
 0xd75   :  { %2645 = vadd.xlane.f32.xlu1 %v2644_v14  ;;  %v2641_v15 = vsel %vm244_vm2, %v8178_v47, 0.0 }
 0xd76   :  { %2642 = vadd.xlane.f32.xlu0 %v2641_v15 }
 0xd77   :  { %v8184_v60 = vpop.eup %7561 }
 0xd78   :  { %v8186_v40 = vpop.eup %7563  ;;  %v2656_v45 = vsel %vm244_vm2, %v8184_v60, 0.0 }
 0xd79   :  { %2657 = vadd.xlane.f32.xlu1 %v2656_v45  ;;  %v2653_v61 = vsel %vm244_vm2, %v8186_v40, 0.0 }
 0xd7a   :  { %2654 = vadd.xlane.f32.xlu0 %v2653_v61 }
 0xdfa   :  { %v2652_v62 = vpop.xlane.xlu1 %2651 }
 0xdfb   :  { %7565 = vrcp.f32 %v2652_v62  ;;  %v2649_v56 = vpop.xlane.xlu0 %2648 }
 0xdfc   :  { %7567 = vrcp.f32 %v2649_v56 }
 0xdfe   :  { %v2640_v63 = vpop.xlane.xlu1 %2639 }
 0xdff   :  { %7569 = vrcp.f32 %v2640_v63  ;;  %v2637_v0 = vpop.xlane.xlu0 %2636 }
 0xe00   :  { %7571 = vrcp.f32 %v2637_v0 }
 0xe02   :  { %v2646_v1 = vpop.xlane.xlu1 %2645 }
 0xe03   :  { %7573 = vrcp.f32 %v2646_v1  ;;  %v2643_v2 = vpop.xlane.xlu0 %2642 }
 0xe04   :  { %7575 = vrcp.f32 %v2643_v2 }
 0xe05   :  { %v7566_v54 = vpop.eup %7565 }
 0xe06   :  { %v7568_v33 = vpop.eup %7567  ;;  %v2672_v50 = vmul.f32 %v7566_v54, %v2652_v62  ;;  %v2658_v53 = vpop.xlane.xlu1 %2657 }
 0xe07   :  { %v2671_v52 = vmul.f32 %v7568_v33, %v2649_v56  ;;  %7577 = vrcp.f32 %v2658_v53  ;;  %v2655_v29 = vpop.xlane.xlu0 %2654 }
 0xe08   :  { %v2680_v3 = vsub.f32 2.0, %v2672_v50  ;;  %7579 = vrcp.f32 %v2655_v29 }
 0xe09   :  { %v7570_v46 = vpop.eup %7569  ;;  %v2679_v5 = vsub.f32 2.0, %v2671_v52 }
 0xe0a   :  { %v7572_v42 = vpop.eup %7571  ;;  %v2688_v38 = vmul.f32 %v7566_v54, %v2680_v3  ;;  %v2668_v57 = vmul.f32 %v7570_v46, %v2640_v63 }
 0xe0b   :  { %v2687_v17 = vmul.f32 %v7568_v33, %v2679_v5  ;;  %v2667_v48 = vmul.f32 %v7572_v42, %v2637_v0 }
 0xe0c   :  { %v2676_v59 = vsub.f32 2.0, %v2668_v57  ;;  %v2696_v8 = vmul.f32 %v7550_v24, %v2688_v38 }
 0xe0d   :  { %v7574_v55 = vpop.eup %7573  ;;  %v2695_v4 = vmul.f32 %v7552_v27, %v2687_v17  ;;  %v2675_v6 = vsub.f32 2.0, %v2667_v48  ;;  %v8223_v17 = vld [vmem:[%s8741_s2 + $0x168] sm:$0xff] }
 0xe0e   :  { %v7576_v7 = vpop.eup %7575  ;;  %v2684_v16 = vmul.f32 %v7570_v46, %v2676_v59  ;;  %v2670_v25 = vmul.f32 %v7574_v55, %v2646_v1  ;;  %v8229_v59 = vld [vmem:[%s8741_s2 + $0x170] sm:$0xff] }
 0xe0f   :  { %v2683_v28 = vmul.f32 %v7572_v42, %v2675_v6  ;;  %v2669_v26 = vmul.f32 %v7576_v7, %v2643_v2  ;;  %7232 = vmatprep.mubr.msk.f32.mxu0 %vm244_vm2, %v2695_v4 }
 0xe10   :  { %v2678_v32 = vsub.f32 2.0, %v2670_v25  ;;  %7233 = vmatmul.mubr.msk.f32.vlgmr.msra.gmra.mrb[38].mxu0 %vm244_vm2, %v2696_v8  ;;  %v2692_v45 = vmul.f32 %v8171_v30, %v2684_v16 }
 0xe11   :  { %v7578_v36 = vpop.eup %7577  ;;  %v2691_v37 = vmul.f32 %v7556_v34, %v2683_v28  ;;  %v2677_v14 = vsub.f32 2.0, %v2669_v26 }
 0xe12   :  { %v7580_v15 = vpop.eup %7579  ;;  %v2686_v61 = vmul.f32 %v7574_v55, %v2678_v32  ;;  %v2674_v27 = vmul.f32 %v7578_v36, %v2658_v53  ;;  %v2910_v32 = vrot.slane %v8116_v51, %v7939_v39  ;;  %v46_v51 = vld [vmem:[%s8741_s2 + $0xf8] sm:$0xff] }
 0xe13   :  { %v2685_v62 = vmul.f32 %v7576_v7, %v2677_v14  ;;  %v2673_v56 = vmul.f32 %v7580_v15, %v2655_v29  ;;  %7224 = vmatprep.mubr.msk.f32.mxu1 %vm244_vm2, %v2691_v37 }
 0xe14   :  { %v2682_v24 = vsub.f32 2.0, %v2674_v27  ;;  %7225 = vmatmul.mubr.msk.f32.vlgmr.msra.gmra.mrb[32].mxu1 %vm244_vm2, %v2692_v45  ;;  %v2694_v1 = vmul.f32 %v8176_v43, %v2686_v61  ;;  %v44_v43 = vld [vmem:[%s8741_s2 + $0xe8] sm:$0xff]  ;;  %v45_v27 = vld [vmem:[%s8741_s2 + $0xf0] sm:$0xff] }
 0xe15   :  { %v2693_v63 = vmul.f32 %v8178_v47, %v2685_v62  ;;  %v2681_v0 = vsub.f32 2.0, %v2673_v56  ;;  %v28_v47 = vld [vmem:[%s8741_s2 + $0x68] sm:$0xff]  ;;  %7243 = vmatprep.subr.mxu0 %v44_v43  ;;  %v7469_v62 = vpack.c.bf16 %v46_v51, %v45_v27  ;;  %v7701_v51 = vld [vmem:[%s8743_s0] sm:$0xff] }
 0xe16   :  { %v2690_v2 = vmul.f32 %v7578_v36, %v2682_v24  ;;  %7238 = vmatprep.subr.mxu1 %v28_v47  ;;  %7244 = vmatpush3.msra.mxu0 %v44_v43 }
 0xe17   :  { %v2689_v34 = vmul.f32 %v7580_v15, %v2681_v0  ;;  %7227 = vmatprep.mubr.msk.f32.mxu1 %vm244_vm2, %v2693_v63  ;;  %7239 = vmatpush3.msra.mxu1 %v28_v47 }
 0xe18   :  { %7228 = vmatmul.mubr.msk.f32.gmra.mrb[34].mxu1 %vm244_vm2, %v2694_v1  ;;  %v2698_v54 = vmul.f32 %v8184_v60, %v2690_v2  ;;  %v8214_v60 = vld [vmem:[%s8741_s2 + $0x160] sm:$0xff]  ;;  %7470 = vmatprep.subr.bf16.mxu1 %v7469_v62  ;;  %v51_v1 = vld [vmem:[%s8741_s2 + $0x128] sm:$0xff] }
 0xe19   :  { %v2697_v30 = vmul.f32 %v8186_v40, %v2689_v34  ;;  %7255 = vmatprep.subr.mxu0 %v51_v1  ;;  %v7697_v2 = vld [vmem:[%s8741_s2] sm:$0xff] }
 0xe1b   :  { %7235 = vmatprep.mubr.msk.f32.mxu0 %vm244_vm2, %v2697_v30 }
 0xe1c   :  { %7236 = vmatmul.mubr.msk.f32.gmra.mrb[40].mxu0 %vm244_vm2, %v2698_v54 }
 0xee3   :  { %v7234_v33 = vpop.f32.mrb[38].mxu0 }
 0xee4   :  { %v2898_v40 = vmul.f32 %v8214_v60, %v7234_v33  ;;  %v2874_v50 = vpop.f32.mrb[39].mxu0 }
 0xee5   :  { %v2897_v53 = vmul.f32 %v8146_v11, %v2874_v50  ;;  %v7698_v50 = vld [vmem:[%s8741_s2 + $0x10] sm:$0xff] }
 0xee7   :  { %v2902_v52 = vadd.f32 %v2898_v40, %v2897_v53  ;;  %v7226_v29 = vpop.f32.mrb[32].mxu1  ;;  %v55_v53 = vld [vmem:[%s8741_s2 + $0x148] sm:$0xf] }
 0xee8   :  { %v2894_v3 = vmul.f32 %v8214_v60, %v7226_v29  ;;  %v2777_v46 = vpop.f32.mrb[33].mxu1  ;;  %v6714_v29 = vld [vmem:[%s8741_s2 + $0x130] ss:$0 sm:$0xff] }
 0xee9   :  { %v2893_v5 = vmul.f32 %v8146_v11, %v2777_v46 }
 0xeeb   :  { %v2901_v42 = vadd.f32 %v2894_v3, %v2893_v5  ;;  %v7229_v38 = vpop.f32.mrb[34].mxu1 }
 0xeec   :  { %v2787_v57 = vpop.f32.mrb[35].mxu1  ;;  %v2896_v55 = vmul.f32 %v8229_v59, %v7229_v38 }
 0xeed   :  { %v2895_v48 = vmul.f32 %v8223_v17, %v2787_v57 }
 0xeef   :  { %v2903_v4 = vadd.f32 %v2901_v42, %v2895_v48  ;;  %v7237_v6 = vpop.f32.mrb[40].mxu0 }
 0xef0   :  { %v2884_v7 = vpop.f32.mrb[41].mxu0  ;;  %v2900_v25 = vmul.f32 %v8229_v59, %v7237_v6 }
 0xef1   :  { %v2905_v8 = vadd.f32 %v2903_v4, %v2896_v55  ;;  %v2899_v16 = vmul.f32 %v8223_v17, %v2884_v7 }
 0xef3   :  { %v2904_v28 = vadd.f32 %v2902_v52, %v2899_v16  ;;  %7240 = vmatprep.mubr.msk.f32.mxu1 %vm244_vm2, %v2905_v8  ;;  %v7699_v52 = vld [vmem:[%s8741_s2 + $0x8] sm:$0xff] }
 0xef5   :  { %v2906_v26 = vadd.f32 %v2904_v28, %v2900_v25 }
 0xef7   :  { %7241 = vmatmul.mubr.msk.f32.vlgmr.msra.gmra.mrb[36].mxu1 %vm244_vm2, %v2906_v26 }
 0xef8   :  { %7472 = vmatpush3.bf16.msra.mxu1 %v7469_v62 }
 0xef9   :  { %7260 = vmatprep.subr.msk.mxu1 %vm75_vm0, %v55_v53 }
 0xfca   :  { %v7242_v36 = vpop.f32.mrb[36].mxu1 }
 0xfcb   :  { %v2989_v37 = vadd.f32 %v7242_v36, %v2910_v32  ;;  %v2983_v14 = vpop.f32.mrb[37].mxu1 }
 0xfcc   :  { %v2984_v15 = vadd.f32 %v2983_v14, %v2910_v32 }
 0xfcd   :  { %v2993_v61 = vadd.f32 %v2989_v37, %v8121_v49 }
 0xfce   :  { %v2992_v45 = vadd.f32 %v2984_v15, %v8124_v44  ;;  %v43_v44 = vld [vmem:[%s8741_s2 + $0x100] sm:$0x3] }
 0xfcf   :  { %v2997_v49 = vrot.slane %v43_v44, %v7800_v18  ;;  %v3082_v34 = vrot.slane %v43_v44, %v7803_v19 }
 0xfd0   :  { %7245 = vmatprep.mubr.msk.f32.mxu0 %vm244_vm2, %v2992_v45 }
 0xfd1   :  { %7246 = vmatmul.mubr.msk.f32.vlgmr.msra.gmra.mrb[42].mxu0 %vm244_vm2, %v2993_v61 }
 0xfd2   :  { %7256 = vmatpush3.msra.mxu0 %v51_v1  ;;  %v7702_v1 = vld [vmem:[%s8741_s2 + $0x138] sm:$0xff] }
 0xfd3   :  { %7265 = vmatprep.subr.mxu0 %v7697_v2 }
0x10a4   :  { %v7247_v56 = vpop.f32.mrb[42].mxu0 }
0x10a5   :  { %v3070_v24 = vpop.f32.mrb[43].mxu0  ;;  %v3076_v0 = vadd.f32 %v7247_v56, %v2997_v49 }
0x10a6   :  { %v3071_v63 = vadd.f32 %v3070_v24, %v2997_v49 }
0x10a8   :  { %7252 = vmatprep.mubr.msk.f32.mxu1 %vm1188_vm3, %v3071_v63 }
0x10a9   :  { %7253 = vmatmul.mubr.msk.f32.vlgmr.msra.gmra.mrb[38].mxu1 %vm1188_vm3, %v3076_v0 }
0x10aa   :  { %7261 = vmatpush3.msk.msra.mxu1 %vm75_vm0, %v55_v53 }
0x10ab   :  { %7270 = vmatprep.subr.mxu1 %v7699_v52 }
0x117c   :  { %v7254_v30 = vpop.f32.mrb[38].mxu1 }
0x117d   :  { %v3161_v54 = vadd.f32 %v7254_v30, %v3082_v34  ;;  %v3155_v47 = vpop.f32.mrb[39].mxu1 }
0x117e   :  { %v3156_v43 = vadd.f32 %v3155_v47, %v3082_v34 }
0x117f   :  { %v3165_v40 = vadd.f32 %v3161_v54, %v2993_v61  ;;  %v7700_v61 = vld [vmem:[%s8743_s0 + $0x8] sm:$0xff] }
0x1180   :  { %v3164_v33 = vadd.f32 %v3156_v43, %v2992_v45 }
0x1182   :  { %7257 = vmatprep.mubr.msk.f32.mxu0 %vm244_vm2, %v3164_v33 }
0x1183   :  { %7258 = vmatmul.mubr.msk.f32.vlgmr.msra.gmra.mrb[44].mxu0 %vm244_vm2, %v3165_v40 }
0x1184   :  { %7266 = vmatpush3.msra.mxu0 %v7697_v2 }
0x1185   :  { %7275 = vmatprep.subr.mxu0 %v7698_v50 }
0x1256   :  { %v7259_v3 = vpop.f32.mrb[44].mxu0 }
0x1257   :  { %v3248_v46 = vadd.f32 %v7259_v3, %v6714_v29  ;;  %v3242_v5 = vpop.f32.mrb[45].mxu0 }
0x1258   :  { %v3243_v42 = vadd.f32 %v6714_v29, %v3242_v5 }
0x1259   :  { %v6718_v38 = vclamps-f32 %v3248_v46, 60.0 }
0x125a   :  { %v6717_v57 = vclamps-f32 %v3243_v42, 60.0 }
0x125b   :  { %v3256_v48 = vsub.f32 0.0, %v6718_v38 }
0x125c   :  { %v3255_v55 = vsub.f32 0.0, %v6717_v57  ;;  %v8340_v57 = vld [vmem:[%s8741_s2 + $0x18] sm:$0xff] }
0x125d   :  { %v3259_v4 = vmul.f32 1.442695, %v3256_v48  ;;  %v8347_v48 = vld [vmem:[%s8741_s2 + $0xc8] sm:$0xff] }
0x125e   :  { %v3257_v6 = vmul.f32 1.442695, %v3255_v55 }
0x125f   :  { %7581 = vpow2.f32 %v3259_v4 }
0x1260   :  { %7583 = vpow2.f32 %v3257_v6 }
0x1269   :  { %v7582_v7 = vpop.eup %7581 }
0x126a   :  { %v7584_v8 = vpop.eup %7583  ;;  %v3262_v16 = vadd.f32 1.0, %v7582_v7 }
0x126b   :  { %v3261_v25 = vadd.f32 1.0, %v7584_v8 }
0x126c   :  { %7585 = vrcp.f32 %v3262_v16 }
0x126d   :  { %7587 = vrcp.f32 %v3261_v25 }
0x1276   :  { %v7586_v28 = vpop.eup %7585 }
0x1277   :  { %v7588_v26 = vpop.eup %7587  ;;  %v3266_v32 = vmul.f32 %v7586_v28, %v3262_v16 }
0x1278   :  { %v3265_v36 = vmul.f32 %v7588_v26, %v3261_v25 }
0x1279   :  { %v3268_v37 = vsub.f32 2.0, %v3266_v32 }
0x127a   :  { %v3267_v14 = vsub.f32 2.0, %v3265_v36 }
0x127b   :  { %v8277_v15 = vmul.f32 %v7586_v28, %v3268_v37 }
0x127c   :  { %v8279_v45 = vmul.f32 %v7588_v26, %v3267_v14 }
0x127d   :  { %v3272_v27 = vsub.f32 %v8277_v15, %v7700_v61 }
0x127e   :  { %v3271_v62 = vsub.f32 %v8279_v45, %v7701_v51 }
0x127f   :  { %v3274_v49 = vmul.f32 %v3272_v27, %v3272_v27 }
0x1280   :  { %v3273_v44 = vmul.f32 %v3271_v62, %v3271_v62 }
0x1282   :  { %7262 = vmatprep.mubr.msk.f32.mxu1 %vm68_vm1, %v3273_v44 }
0x1283   :  { %7263 = vmatmul.mubr.msk.f32.vlgmr.msra.gmra.mrb[40].mxu1 %vm68_vm1, %v3274_v49 }
0x1284   :  { %7271 = vmatpush3.msra.mxu1 %v7699_v52 }
0x1356   :  { %v7264_v56 = vpop.f32.mrb[40].mxu1 }
0x1357   :  { %v3360_v24 = vadd.f32 %v7264_v56, %v7775_v12  ;;  %v3350_v63 = vpop.f32.mrb[41].mxu1 }
0x1358   :  { %v3359_v0 = vadd.f32 %v3350_v63, %v7777_v13 }
0x1359   :  { %v8298_v34 = vadd.f32 %v7702_v1, %v3360_v24 }
0x135a   :  { %v8296_v2 = vadd.f32 %v7702_v1, %v3359_v0 }
0x135c   :  { %7267 = vmatprep.mubr.msk.f32.mxu0 %vm244_vm2, %v8296_v2  ;;  %7272 = vmatprep.mubr.msk.f32.mxu1 %vm244_vm2, %v8296_v2 }
0x135d   :  { %7268 = vmatmul.mubr.msk.f32.vlgmr.msra.gmra.mrb[46].mxu0 %vm244_vm2, %v8298_v34  ;;  %7273 = vmatmul.mubr.msk.f32.vlgmr.msra.gmra.mrb[42].mxu1 %vm244_vm2, %v8298_v34 }
0x135e   :  { %7277 = vmatprep.mubr.msk.f32.mxu0 %vm244_vm2, %v8296_v2  ;;  %7276 = vmatpush3.msra.mxu0 %v7698_v50 }
0x1361   :  { %7278 = vmatmul.mubr.msk.f32.vlgmr.msra.gmra.mrb[48].mxu0 %vm244_vm2, %v8298_v34 }
0x1430   :  { %v7269_v12 = vpop.f32.mrb[46].mxu0  ;;  %v7274_v13 = vpop.f32.mrb[42].mxu1 }
0x1431   :  { %v3441_v30 = vadd.f32 %v7269_v12, %v7812_v21  ;;  %v3516_v54 = vadd.f32 %v7274_v13, %v7816_v22  ;;  %v3435_v47 = vpop.f32.mrb[47].mxu0  ;;  %v3510_v43 = vpop.f32.mrb[43].mxu1 }
0x1432   :  { %v3436_v33 = vadd.f32 %v3435_v47, %v7812_v21  ;;  %v3511_v40 = vadd.f32 %v3510_v43, %v7816_v22 }
0x1433   :  { %7288 = vmatprep.subr.msk.mxu0 %vm244_vm2, %v3516_v54  ;;  %v3598_v53 = vmul.f32 %v8146_v11, %v3441_v30  ;;  %v3599_v29 = vmul.f32 %v8214_v60, %v3441_v30  ;;  %v3600_v5 = vmul.f32 %v8223_v17, %v3441_v30  ;;  %v3601_v38 = vmul.f32 %v8229_v59, %v3441_v30 }
0x1434   :  { %v7279_v50 = vpop.f32.mrb[48].mxu0  ;;  %7280 = vmatprep.subr.msk.mxu1 %vm244_vm2, %v3511_v40  ;;  %7289 = vmatpush3.xpose.msk.msra.mxu0 %vm244_vm2, %v3516_v54  ;;  %v3594_v52 = vmul.f32 %v8146_v11, %v3436_v33  ;;  %v3595_v21 = vmul.f32 %v8214_v60, %v3436_v33  ;;  %v3596_v42 = vmul.f32 %v8223_v17, %v3436_v33 }
0x1435   :  { %v3591_v3 = vadd.f32 %v7279_v50, %v7830_v31  ;;  %v3585_v46 = vpop.f32.mrb[49].mxu0  ;;  %7281 = vmatpush3.xpose.msk.msra.mxu1 %vm244_vm2, %v3511_v40  ;;  %7290 = vmatprep.mubr.msk.f32.mxu0 %vm244_vm2, %v3598_v53 }
0x1436   :  { %v3586_v22 = vadd.f32 %v3585_v46, %v7830_v31  ;;  %7282 = vmatprep.mubr.msk.f32.mxu1 %vm244_vm2, %v3594_v52  ;;  %v3597_v31 = vmul.f32 %v8229_v59, %v3436_v33 }
0x1437   :  { %7291 = vmatmul.mubr.msk.f32.vlgmr.msra.gmra.mrb[50].mxu0 %vm244_vm2, %v3599_v29  ;;  %7304 = vmatprep.subr.mxu0 %v3591_v3 }
0x1438   :  { %7283 = vmatmul.mubr.msk.f32.vlgmr.msra.gmra.mrb[44].mxu1 %vm244_vm2, %v3595_v21  ;;  %7293 = vmatprep.mubr.msk.f32.mxu0 %vm244_vm2, %v3600_v5 }
0x1439   :  { %7296 = vmatprep.subr.mxu1 %v3586_v22  ;;  %7305 = vmatpush3.msra.mxu0 %v3591_v3 }
0x143a   :  { %7285 = vmatprep.mubr.msk.f32.mxu1 %vm244_vm2, %v3596_v42  ;;  %7297 = vmatpush3.msra.mxu1 %v3586_v22 }
0x143b   :  { %7294 = vmatmul.mubr.msk.f32.gmra.mrb[52].mxu0 %vm244_vm2, %v3601_v38  ;;  %7312 = vmatprep.subr.mxu1 %v8340_v57 }
0x143c   :  { %7286 = vmatmul.mubr.msk.f32.gmra.mrb[46].mxu1 %vm244_vm2, %v3597_v31  ;;  %7317 = vmatprep.subr.mxu0 %v8347_v48 }
0x150a   :  { %v7292_v55 = vpop.f32.mrb[50].mxu0 }
0x150b   :  { %v7284_v4 = vpop.f32.mrb[44].mxu1  ;;  %v3783_v6 = vpop.f32.mrb[51].mxu0  ;;  %v3817_v7 = vsel %vm244_vm2, %v7292_v55, -inf }
0x150c   :  { %3818 = vmax.xlane.f32.xlu1 %v3817_v7  ;;  %v3683_v8 = vpop.f32.mrb[45].mxu1  ;;  %v3814_v16 = vsel %vm244_vm2, %v3783_v6, -inf  ;;  %v3805_v32 = vsel %vm244_vm2, %v7284_v4, -inf }
0x150d   :  { %3815 = vmax.xlane.f32.xlu0 %v3814_v16  ;;  %v3802_v37 = vsel %vm244_vm2, %v3683_v8, -inf }
0x150e   :  { %v7295_v25 = vpop.f32.mrb[52].mxu0 }
0x150f   :  { %v7287_v28 = vpop.f32.mrb[46].mxu1  ;;  %v3793_v26 = vpop.f32.mrb[53].mxu0  ;;  %v3823_v27 = vsel %vm244_vm2, %v7295_v25, -inf }
0x1510   :  { %3806 = vmax.xlane.f32.xlu1 %v3805_v32  ;;  %v3693_v36 = vpop.f32.mrb[47].mxu1  ;;  %v3811_v14 = vsel %vm244_vm2, %v7287_v28, -inf  ;;  %v3820_v51 = vsel %vm244_vm2, %v3793_v26, -inf }
0x1511   :  { %3803 = vmax.xlane.f32.xlu0 %v3802_v37  ;;  %v3808_v61 = vsel %vm244_vm2, %v3693_v36, -inf }
0x1514   :  { %3812 = vmax.xlane.f32.xlu1 %v3811_v14 }
0x1515   :  { %3809 = vmax.xlane.f32.xlu0 %v3808_v61 }
0x1518   :  { %3824 = vmax.xlane.f32.xlu1 %v3823_v27 }
0x1519   :  { %3821 = vmax.xlane.f32.xlu0 %v3820_v51 }
0x1599   :  { %v3819_v62 = vpop.xlane.xlu1 %3818 }
0x159a   :  { %v3831_v44 = vsub.f32 %v7292_v55, %v3819_v62  ;;  %v3816_v49 = vpop.xlane.xlu0 %3815 }
0x159b   :  { %v3830_v56 = vsub.f32 %v3783_v6, %v3816_v49 }
0x159c   :  { %v3844_v24 = vmul.f32 1.442695, %v3831_v44 }
0x159d   :  { %v3842_v63 = vmul.f32 1.442695, %v3830_v56  ;;  %v3807_v0 = vpop.xlane.xlu1 %3806 }
0x159e   :  { %7589 = vpow2.f32 %v3844_v24  ;;  %v3827_v1 = vsub.f32 %v7284_v4, %v3807_v0  ;;  %v3804_v12 = vpop.xlane.xlu0 %3803 }
0x159f   :  { %7591 = vpow2.f32 %v3842_v63  ;;  %v3826_v13 = vsub.f32 %v3683_v8, %v3804_v12 }
0x15a0   :  { %v3836_v30 = vmul.f32 1.442695, %v3827_v1 }
0x15a1   :  { %v3834_v54 = vmul.f32 1.442695, %v3826_v13  ;;  %v3813_v47 = vpop.xlane.xlu1 %3812 }
0x15a2   :  { %7593 = vpow2.f32 %v3836_v30  ;;  %v3829_v43 = vsub.f32 %v7287_v28, %v3813_v47  ;;  %v3810_v33 = vpop.xlane.xlu0 %3809 }
0x15a3   :  { %7595 = vpow2.f32 %v3834_v54  ;;  %v3828_v40 = vsub.f32 %v3693_v36, %v3810_v33 }
0x15a4   :  { %v3840_v53 = vmul.f32 1.442695, %v3829_v43 }
0x15a5   :  { %v3838_v50 = vmul.f32 1.442695, %v3828_v40  ;;  %v3825_v52 = vpop.xlane.xlu1 %3824 }
0x15a6   :  { %7597 = vpow2.f32 %v3840_v53  ;;  %v3833_v29 = vsub.f32 %v7295_v25, %v3825_v52  ;;  %v3822_v3 = vpop.xlane.xlu0 %3821 }
0x15a7   :  { %7599 = vpow2.f32 %v3838_v50  ;;  %v3832_v46 = vsub.f32 %v3793_v26, %v3822_v3 }
0x15a8   :  { %v7590_v21 = vpop.eup %7589  ;;  %v3848_v22 = vmul.f32 1.442695, %v3833_v29 }
0x15a9   :  { %v7592_v5 = vpop.eup %7591  ;;  %v3846_v42 = vmul.f32 1.442695, %v3832_v46  ;;  %v3865_v38 = vsel %vm244_vm2, %v7590_v21, 0.0 }
0x15aa   :  { %7601 = vpow2.f32 %v3848_v22  ;;  %3866 = vadd.xlane.f32.xlu1 %v3865_v38  ;;  %v3862_v31 = vsel %vm244_vm2, %v7592_v5, 0.0 }
0x15ab   :  { %7603 = vpow2.f32 %v3846_v42  ;;  %3863 = vadd.xlane.f32.xlu0 %v3862_v31 }
0x15ac   :  { %v8360_v55 = vpop.eup %7593 }
0x15ad   :  { %v7596_v4 = vpop.eup %7595  ;;  %v3853_v6 = vsel %vm244_vm2, %v8360_v55, 0.0 }
0x15ae   :  { %3854 = vadd.xlane.f32.xlu1 %v3853_v6  ;;  %v3850_v7 = vsel %vm244_vm2, %v7596_v4, 0.0 }
0x15af   :  { %3851 = vadd.xlane.f32.xlu0 %v3850_v7 }
0x15b0   :  { %v8365_v8 = vpop.eup %7597 }
0x15b1   :  { %v8367_v16 = vpop.eup %7599  ;;  %v3859_v25 = vsel %vm244_vm2, %v8365_v8, 0.0 }
0x15b2   :  { %3860 = vadd.xlane.f32.xlu1 %v3859_v25  ;;  %v3856_v28 = vsel %vm244_vm2, %v8367_v16, 0.0 }
0x15b3   :  { %3857 = vadd.xlane.f32.xlu0 %v3856_v28 }
0x15b4   :  { %v8373_v26 = vpop.eup %7601 }
0x15b5   :  { %v8375_v32 = vpop.eup %7603  ;;  %v3871_v36 = vsel %vm244_vm2, %v8373_v26, 0.0 }
0x15b6   :  { %3872 = vadd.xlane.f32.xlu1 %v3871_v36  ;;  %v3868_v37 = vsel %vm244_vm2, %v8375_v32, 0.0 }
0x15b7   :  { %3869 = vadd.xlane.f32.xlu0 %v3868_v37 }
0x1637   :  { %v3867_v14 = vpop.xlane.xlu1 %3866 }
0x1638   :  { %7605 = vrcp.f32 %v3867_v14  ;;  %v3864_v61 = vpop.xlane.xlu0 %3863 }
0x1639   :  { %7607 = vrcp.f32 %v3864_v61 }
0x163b   :  { %v3855_v27 = vpop.xlane.xlu1 %3854 }
0x163c   :  { %7609 = vrcp.f32 %v3855_v27  ;;  %v3852_v51 = vpop.xlane.xlu0 %3851 }
0x163d   :  { %7611 = vrcp.f32 %v3852_v51 }
0x163f   :  { %v3861_v62 = vpop.xlane.xlu1 %3860 }
0x1640   :  { %7613 = vrcp.f32 %v3861_v62  ;;  %v3858_v44 = vpop.xlane.xlu0 %3857 }
0x1641   :  { %7615 = vrcp.f32 %v3858_v44 }
0x1642   :  { %v7606_v49 = vpop.eup %7605 }
0x1643   :  { %v7608_v56 = vpop.eup %7607  ;;  %v3887_v24 = vmul.f32 %v7606_v49, %v3867_v14  ;;  %v3873_v63 = vpop.xlane.xlu1 %3872 }
0x1644   :  { %v3886_v0 = vmul.f32 %v7608_v56, %v3864_v61  ;;  %7617 = vrcp.f32 %v3873_v63  ;;  %v3870_v1 = vpop.xlane.xlu0 %3869 }
0x1645   :  { %v3895_v12 = vsub.f32 2.0, %v3887_v24  ;;  %7619 = vrcp.f32 %v3870_v1 }
0x1646   :  { %v7610_v13 = vpop.eup %7609  ;;  %v3894_v30 = vsub.f32 2.0, %v3886_v0 }
0x1647   :  { %v7612_v54 = vpop.eup %7611  ;;  %v3903_v47 = vmul.f32 %v7606_v49, %v3895_v12  ;;  %v3883_v43 = vmul.f32 %v7610_v13, %v3855_v27 }
0x1648   :  { %v3902_v33 = vmul.f32 %v7608_v56, %v3894_v30  ;;  %v3882_v40 = vmul.f32 %v7612_v54, %v3852_v51 }
0x1649   :  { %v3891_v53 = vsub.f32 2.0, %v3883_v43  ;;  %v3911_v46 = vmul.f32 %v7590_v21, %v3903_v47 }
0x164a   :  { %v7614_v50 = vpop.eup %7613  ;;  %v3910_v52 = vmul.f32 %v7592_v5, %v3902_v33  ;;  %v3890_v29 = vsub.f32 2.0, %v3882_v40 }
0x164b   :  { %v7616_v3 = vpop.eup %7615  ;;  %v3899_v22 = vmul.f32 %v7610_v13, %v3891_v53  ;;  %v3885_v42 = vmul.f32 %v7614_v50, %v3861_v62 }
0x164c   :  { %v3898_v38 = vmul.f32 %v7612_v54, %v3890_v29  ;;  %v3884_v31 = vmul.f32 %v7616_v3, %v3858_v44  ;;  %7306 = vmatprep.mubr.msk.f32.mxu0 %vm244_vm2, %v3910_v52 }
0x164d   :  { %v3893_v6 = vsub.f32 2.0, %v3885_v42  ;;  %7307 = vmatmul.mubr.msk.f32.vlgmr.msra.gmra.mrb[54].mxu0 %vm244_vm2, %v3911_v46  ;;  %v3907_v5 = vmul.f32 %v8360_v55, %v3899_v22 }
0x164e   :  { %v7618_v7 = vpop.eup %7617  ;;  %v3906_v25 = vmul.f32 %v7596_v4, %v3898_v38  ;;  %v3892_v28 = vsub.f32 2.0, %v3884_v31  ;;  %7318 = vmatpush3.msra.mxu0 %v8347_v48 }
0x164f   :  { %v7620_v36 = vpop.eup %7619  ;;  %v3901_v37 = vmul.f32 %v7614_v50, %v3893_v6  ;;  %v3889_v14 = vmul.f32 %v7618_v7, %v3873_v63 }
0x1650   :  { %v3900_v21 = vmul.f32 %v7616_v3, %v3892_v28  ;;  %v3888_v61 = vmul.f32 %v7620_v36, %v3870_v1  ;;  %7298 = vmatprep.mubr.msk.f32.mxu1 %vm244_vm2, %v3906_v25 }
0x1651   :  { %v3897_v27 = vsub.f32 2.0, %v3889_v14  ;;  %7299 = vmatmul.mubr.msk.f32.vlgmr.msra.gmra.mrb[48].mxu1 %vm244_vm2, %v3907_v5  ;;  %v3909_v4 = vmul.f32 %v8365_v8, %v3901_v37 }
0x1652   :  { %v3908_v51 = vmul.f32 %v8367_v16, %v3900_v21  ;;  %v3896_v62 = vsub.f32 2.0, %v3888_v61  ;;  %7313 = vmatpush3.msra.mxu1 %v8340_v57  ;;  %v8453_v21 = vld [vmem:[%s8741_s2 + $0x158] sm:$0xff] }
0x1653   :  { %v3905_v48 = vmul.f32 %v7618_v7, %v3897_v27  ;;  %7474 = vmatprep.subr.bf16.mxu1 %v7974_v20 }
0x1654   :  { %v3904_v55 = vmul.f32 %v7620_v36, %v3896_v62  ;;  %7301 = vmatprep.mubr.msk.f32.mxu1 %vm244_vm2, %v3908_v51 }
0x1655   :  { %7302 = vmatmul.mubr.msk.f32.gmra.mrb[50].mxu1 %vm244_vm2, %v3909_v4  ;;  %v3913_v49 = vmul.f32 %v8373_v26, %v3905_v48 }
0x1656   :  { %v3912_v44 = vmul.f32 %v8375_v32, %v3904_v55 }
0x1658   :  { %7309 = vmatprep.mubr.msk.f32.mxu0 %vm244_vm2, %v3912_v44 }
0x1659   :  { %7310 = vmatmul.mubr.msk.f32.gmra.mrb[56].mxu0 %vm244_vm2, %v3913_v49 }
0x1720   :  { %v7308_v16 = vpop.f32.mrb[54].mxu0 }
0x1721   :  { %v4113_v57 = vmul.f32 %v8214_v60, %v7308_v16  ;;  %v4089_v8 = vpop.f32.mrb[55].mxu0 }
0x1722   :  { %v4112_v56 = vmul.f32 %v8146_v11, %v4089_v8 }
0x1724   :  { %v4117_v24 = vadd.f32 %v4113_v57, %v4112_v56  ;;  %v7300_v63 = vpop.f32.mrb[48].mxu1 }
0x1725   :  { %v4109_v0 = vmul.f32 %v8214_v60, %v7300_v63  ;;  %v3992_v1 = vpop.f32.mrb[49].mxu1 }
0x1726   :  { %v4108_v12 = vmul.f32 %v8146_v11, %v3992_v1  ;;  %v30_v11 = vld [vmem:[%s8741_s2 + $0x78] sm:$0xff] }
0x1727   :  { %7329 = vmatprep.subr.mxu0 %v30_v11 }
0x1728   :  { %v4116_v32 = vadd.f32 %v4109_v0, %v4108_v12  ;;  %v7303_v13 = vpop.f32.mrb[50].mxu1 }
0x1729   :  { %v4002_v26 = vpop.f32.mrb[51].mxu1  ;;  %v4111_v54 = vmul.f32 %v8229_v59, %v7303_v13 }
0x172a   :  { %v4110_v30 = vmul.f32 %v8223_v17, %v4002_v26 }
0x172c   :  { %v4118_v47 = vadd.f32 %v4116_v32, %v4110_v30  ;;  %v7311_v43 = vpop.f32.mrb[56].mxu0 }
0x172d   :  { %v4099_v33 = vpop.f32.mrb[57].mxu0  ;;  %v4115_v50 = vmul.f32 %v8229_v59, %v7311_v43 }
0x172e   :  { %v4120_v40 = vadd.f32 %v4118_v47, %v4111_v54  ;;  %v4114_v53 = vmul.f32 %v8223_v17, %v4099_v33 }
0x1730   :  { %v4119_v52 = vadd.f32 %v4117_v24, %v4114_v53  ;;  %7314 = vmatprep.mubr.msk.f32.mxu1 %vm244_vm2, %v4120_v40 }
0x1732   :  { %v4121_v29 = vadd.f32 %v4119_v52, %v4115_v50 }
0x1734   :  { %7315 = vmatmul.mubr.msk.f32.vlgmr.msra.gmra.mrb[52].mxu1 %vm244_vm2, %v4121_v29 }
0x1735   :  { %7476 = vmatpush3.bf16.msra.mxu1 %v7974_v20  ;;  %v32_v20 = vld [vmem:[%s8741_s2 + $0x88] sm:$0xff] }
0x1807   :  { %v7316_v3 = vpop.f32.mrb[52].mxu1 }
0x1808   :  { %v4200_v46 = vadd.f32 %v7316_v3, %v7943_v41  ;;  %v4194_v22 = vpop.f32.mrb[53].mxu1 }
0x1809   :  { %v4195_v42 = vadd.f32 %v4194_v22, %v7943_v41  ;;  %v31_v41 = vld [vmem:[%s8741_s2 + $0x80] sm:$0xff] }
0x180a   :  { %v8417_v31 = vadd.f32 %v4200_v46, %v8298_v34  ;;  %7334 = vmatprep.subr.mxu1 %v31_v41 }
0x180b   :  { %v8414_v38 = vadd.f32 %v4195_v42, %v8296_v2  ;;  %v8440_v2 = vld [vmem:[%s8741_s2 + $0x98] sm:$0xf] }
0x180c   :  { %v4372_v7 = vrot.slane %v8440_v2, %v7800_v18  ;;  %v4451_v48 = vrot.slane %v8440_v2, %v7803_v19  ;;  %v4530_v55 = vrot.slane %v8440_v2, %v7819_v23 }
0x180d   :  { %7319 = vmatprep.mubr.msk.f32.mxu0 %vm244_vm2, %v8414_v38 }
0x180e   :  { %7320 = vmatmul.mubr.msk.f32.vlgmr.msra.gmra.mrb[58].mxu0 %vm244_vm2, %v8417_v31 }
0x180f   :  { %7331 = vmatprep.mubr.msk.f32.mxu0 %vm244_vm2, %v7770_v10  ;;  %7330 = vmatpush3.msra.mxu0 %v30_v11 }
0x1810   :  { %7339 = vmatprep.subr.mxu0 %v32_v20 }
0x1812   :  { %7332 = vmatmul.mubr.msk.f32.vlgmr.msra.gmra.mrb[60].mxu0 %vm244_vm2, %v7768_v9 }
0x1813   :  { %7341 = vmatprep.mubr.msk.f32.mxu0 %vm244_vm2, %v7770_v10  ;;  %7340 = vmatpush3.msra.mxu0 %v32_v20 }
0x1816   :  { %7342 = vmatmul.mubr.msk.f32.vlgmr.msra.gmra.mrb[62].mxu0 %vm244_vm2, %v7768_v9 }
0x18e1   :  { %v7321_v34 = vpop.f32.mrb[58].mxu0 }
0x18e2   :  { %v4277_v6 = vpop.f32.mrb[59].mxu0  ;;  %v4283_v28 = vadd.f32 %v7321_v34, %v7988_v58 }
0x18e3   :  { %v4278_v25 = vadd.f32 %v4277_v6, %v7988_v58 }
0x18e5   :  { %7326 = vmatprep.mubr.msk.f32.mxu1 %vm1188_vm3, %v4278_v25  ;;  %v7333_v36 = vpop.f32.mrb[60].mxu0 }
0x18e6   :  { %v4445_v5 = vadd.f32 %v7333_v36, %v4372_v7  ;;  %7327 = vmatmul.mubr.msk.f32.vlgmr.msra.gmra.mrb[54].mxu1 %vm1188_vm3, %v4283_v28  ;;  %v4439_v37 = vpop.f32.mrb[61].mxu0 }
0x18e7   :  { %v4440_v14 = vadd.f32 %v4439_v37, %v4372_v7  ;;  %7335 = vmatpush3.msra.mxu1 %v31_v41  ;;  %7336 = vmatprep.mubr.msk.f32.mxu1 %vm244_vm2, %v7770_v10 }
0x18e8   :  { %v4610_v61 = vmul.f32 %v8453_v21, %v4445_v5  ;;  %v4611_v24 = vmul.f32 %v8214_v60, %v4445_v5  ;;  %v4612_v0 = vmul.f32 %v8223_v17, %v4445_v5  ;;  %v4613_v12 = vmul.f32 %v8229_v59, %v4445_v5 }
0x18e9   :  { %v7343_v58 = vpop.f32.mrb[62].mxu0  ;;  %v4606_v27 = vmul.f32 %v8453_v21, %v4440_v14  ;;  %v4607_v63 = vmul.f32 %v8214_v60, %v4440_v14  ;;  %v4608_v1 = vmul.f32 %v8223_v17, %v4440_v14  ;;  %v4609_v32 = vmul.f32 %v8229_v59, %v4440_v14 }
0x18ea   :  { %7337 = vmatmul.mubr.msk.f32.vlgmr.msra.gmra.mrb[56].mxu1 %vm244_vm2, %v7768_v9  ;;  %v4597_v51 = vpop.f32.mrb[63].mxu0  ;;  %7354 = vmatprep.mubr.msk.f32.mxu0 %vm244_vm2, %v4610_v61  ;;  %v4603_v8 = vadd.f32 %v7343_v58, %v4530_v55 }
0x18eb   :  { %7346 = vmatprep.mubr.msk.f32.mxu1 %vm244_vm2, %v4606_v27  ;;  %v4598_v56 = vadd.f32 %v4597_v51, %v4530_v55 }
0x19b9   :  { %v8461_v62 = vpop.f32.mrb[54].mxu1 }
0x19ba   :  { %v8463_v4 = vpop.f32.mrb[55].mxu1 }
0x19bd   :  { %v7338_v44 = vpop.f32.mrb[56].mxu1 }
0x19be   :  { %v4524_v49 = vadd.f32 %v7338_v44, %v4451_v48  ;;  %v4518_v16 = vpop.f32.mrb[57].mxu1 }
0x19bf   :  { %v4519_v57 = vadd.f32 %v4518_v16, %v4451_v48 }
0x19c0   :  { %7352 = vmatprep.subr.msk.mxu0 %vm244_vm2, %v4524_v49 }
0x19c1   :  { %7344 = vmatprep.subr.msk.mxu1 %vm244_vm2, %v4519_v57  ;;  %7353 = vmatpush3.xpose.msk.msra.mxu0 %vm244_vm2, %v4524_v49 }
0x19c2   :  { %7345 = vmatpush3.xpose.msk.msra.mxu1 %vm244_vm2, %v4519_v57  ;;  %7368 = vmatprep.subr.mxu0 %v4603_v8 }
0x19c3   :  { %7360 = vmatprep.subr.mxu1 %v4598_v56 }
0x19c4   :  { %7355 = vmatmul.mubr.msk.f32.vlgmr.msra.gmra.mrb[64].mxu0 %vm244_vm2, %v4611_v24 }
0x19c5   :  { %7347 = vmatmul.mubr.msk.f32.vlgmr.msra.gmra.mrb[58].mxu1 %vm244_vm2, %v4607_v63  ;;  %7357 = vmatprep.mubr.msk.f32.mxu0 %vm244_vm2, %v4612_v0 }
0x19c6   :  { %7369 = vmatpush3.msra.mxu0 %v4603_v8  ;;  %7349 = vmatprep.mubr.msk.f32.mxu1 %vm244_vm2, %v4608_v1 }
0x19c7   :  { %7361 = vmatpush3.msra.mxu1 %v4598_v56 }
0x19c8   :  { %7358 = vmatmul.mubr.msk.f32.gmra.mrb[66].mxu0 %vm244_vm2, %v4613_v12 }
0x19c9   :  { %7350 = vmatmul.mubr.msk.f32.gmra.mrb[60].mxu1 %vm244_vm2, %v4609_v32 }
0x1a97   :  { %v7356_v60 = vpop.f32.mrb[64].mxu0 }
0x1a98   :  { %v7348_v13 = vpop.f32.mrb[58].mxu1  ;;  %v4795_v26 = vpop.f32.mrb[65].mxu0  ;;  %v4829_v17 = vsel %vm244_vm2, %v7356_v60, -inf }
0x1a99   :  { %4830 = vmax.xlane.f32.xlu1 %v4829_v17  ;;  %v4695_v30 = vpop.f32.mrb[59].mxu1  ;;  %v4826_v54 = vsel %vm244_vm2, %v4795_v26, -inf  ;;  %v4817_v40 = vsel %vm244_vm2, %v7348_v13, -inf }
0x1a9a   :  { %4827 = vmax.xlane.f32.xlu0 %v4826_v54  ;;  %v4814_v53 = vsel %vm244_vm2, %v4695_v30, -inf }
0x1a9b   :  { %v7359_v47 = vpop.f32.mrb[66].mxu0 }
0x1a9c   :  { %v7351_v43 = vpop.f32.mrb[60].mxu1  ;;  %v4805_v33 = vpop.f32.mrb[67].mxu0  ;;  %v4835_v29 = vsel %vm244_vm2, %v7359_v47, -inf }
0x1a9d   :  { %4818 = vmax.xlane.f32.xlu1 %v4817_v40  ;;  %v4705_v59 = vpop.f32.mrb[61].mxu1  ;;  %v4823_v50 = vsel %vm244_vm2, %v7351_v43, -inf  ;;  %v4832_v11 = vsel %vm244_vm2, %v4805_v33, -inf }
0x1a9e   :  { %4815 = vmax.xlane.f32.xlu0 %v4814_v53  ;;  %v4820_v52 = vsel %vm244_vm2, %v4705_v59, -inf }
0x1aa1   :  { %4824 = vmax.xlane.f32.xlu1 %v4823_v50 }
0x1aa2   :  { %4821 = vmax.xlane.f32.xlu0 %v4820_v52 }
0x1aa5   :  { %4836 = vmax.xlane.f32.xlu1 %v4835_v29 }
0x1aa6   :  { %4833 = vmax.xlane.f32.xlu0 %v4832_v11 }
0x1b26   :  { %v4831_v3 = vpop.xlane.xlu1 %4830 }
0x1b27   :  { %v4843_v46 = vsub.f32 %v7356_v60, %v4831_v3  ;;  %v4828_v22 = vpop.xlane.xlu0 %4827 }
0x1b28   :  { %v4842_v42 = vsub.f32 %v4795_v26, %v4828_v22 }
0x1b29   :  { %v4856_v20 = vmul.f32 1.442695, %v4843_v46 }
0x1b2a   :  { %v4854_v41 = vmul.f32 1.442695, %v4842_v42  ;;  %v4819_v34 = vpop.xlane.xlu1 %4818 }
0x1b2b   :  { %7621 = vpow2.f32 %v4856_v20  ;;  %v4839_v6 = vsub.f32 %v7348_v13, %v4819_v34  ;;  %v4816_v7 = vpop.xlane.xlu0 %4815 }
0x1b2c   :  { %7623 = vpow2.f32 %v4854_v41  ;;  %v4838_v25 = vsub.f32 %v4695_v30, %v4816_v7 }
0x1b2d   :  { %v4848_v28 = vmul.f32 1.442695, %v4839_v6 }
0x1b2e   :  { %v4846_v36 = vmul.f32 1.442695, %v4838_v25  ;;  %v4825_v5 = vpop.xlane.xlu1 %4824 }
0x1b2f   :  { %7625 = vpow2.f32 %v4848_v28  ;;  %v4841_v37 = vsub.f32 %v7351_v43, %v4825_v5  ;;  %v4822_v14 = vpop.xlane.xlu0 %4821 }
0x1b30   :  { %7627 = vpow2.f32 %v4846_v36  ;;  %v4840_v61 = vsub.f32 %v4705_v59, %v4822_v14 }
0x1b31   :  { %v4852_v58 = vmul.f32 1.442695, %v4841_v37 }
0x1b32   :  { %v4850_v27 = vmul.f32 1.442695, %v4840_v61  ;;  %v4837_v51 = vpop.xlane.xlu1 %4836 }
0x1b33   :  { %7629 = vpow2.f32 %v4852_v58  ;;  %v4845_v48 = vsub.f32 %v7359_v47, %v4837_v51  ;;  %v4834_v55 = vpop.xlane.xlu0 %4833 }
0x1b34   :  { %7631 = vpow2.f32 %v4850_v27  ;;  %v4844_v44 = vsub.f32 %v4805_v33, %v4834_v55 }
0x1b35   :  { %v7622_v49 = vpop.eup %7621  ;;  %v4860_v16 = vmul.f32 1.442695, %v4845_v48 }
0x1b36   :  { %v7624_v57 = vpop.eup %7623  ;;  %v4858_v8 = vmul.f32 1.442695, %v4844_v44  ;;  %v4877_v56 = vsel %vm244_vm2, %v7622_v49, 0.0 }
0x1b37   :  { %7633 = vpow2.f32 %v4860_v16  ;;  %4878 = vadd.xlane.f32.xlu1 %v4877_v56  ;;  %v4874_v24 = vsel %vm244_vm2, %v7624_v57, 0.0 }
0x1b38   :  { %7635 = vpow2.f32 %v4858_v8  ;;  %4875 = vadd.xlane.f32.xlu0 %v4874_v24 }
0x1b39   :  { %v8495_v63 = vpop.eup %7625 }
0x1b3a   :  { %v7628_v0 = vpop.eup %7627  ;;  %v4865_v1 = vsel %vm244_vm2, %v8495_v63, 0.0 }
0x1b3b   :  { %4866 = vadd.xlane.f32.xlu1 %v4865_v1  ;;  %v4862_v12 = vsel %vm244_vm2, %v7628_v0, 0.0 }
0x1b3c   :  { %4863 = vadd.xlane.f32.xlu0 %v4862_v12 }
0x1b3d   :  { %v8500_v32 = vpop.eup %7629 }
0x1b3e   :  { %v8502_v60 = vpop.eup %7631  ;;  %v4871_v13 = vsel %vm244_vm2, %v8500_v32, 0.0 }
0x1b3f   :  { %4872 = vadd.xlane.f32.xlu1 %v4871_v13  ;;  %v4868_v26 = vsel %vm244_vm2, %v8502_v60, 0.0 }
0x1b40   :  { %4869 = vadd.xlane.f32.xlu0 %v4868_v26 }
0x1b41   :  { %v8508_v17 = vpop.eup %7633 }
0x1b42   :  { %v8510_v30 = vpop.eup %7635  ;;  %v4883_v54 = vsel %vm244_vm2, %v8508_v17, 0.0 }
0x1b43   :  { %4884 = vadd.xlane.f32.xlu1 %v4883_v54  ;;  %v4880_v47 = vsel %vm244_vm2, %v8510_v30, 0.0 }
0x1b44   :  { %4881 = vadd.xlane.f32.xlu0 %v4880_v47 }
0x1bc4   :  { %v4879_v43 = vpop.xlane.xlu1 %4878 }
0x1bc5   :  { %7637 = vrcp.f32 %v4879_v43  ;;  %v4876_v33 = vpop.xlane.xlu0 %4875 }
0x1bc6   :  { %7639 = vrcp.f32 %v4876_v33 }
0x1bc8   :  { %v4867_v40 = vpop.xlane.xlu1 %4866 }
0x1bc9   :  { %7641 = vrcp.f32 %v4867_v40  ;;  %v4864_v59 = vpop.xlane.xlu0 %4863 }
0x1bca   :  { %7643 = vrcp.f32 %v4864_v59 }
0x1bcc   :  { %v4873_v53 = vpop.xlane.xlu1 %4872 }
0x1bcd   :  { %7645 = vrcp.f32 %v4873_v53  ;;  %v4870_v50 = vpop.xlane.xlu0 %4869 }
0x1bce   :  { %7647 = vrcp.f32 %v4870_v50 }
0x1bcf   :  { %v7638_v52 = vpop.eup %7637 }
0x1bd0   :  { %v7640_v29 = vpop.eup %7639  ;;  %v4899_v11 = vmul.f32 %v7638_v52, %v4879_v43  ;;  %v4885_v3 = vpop.xlane.xlu1 %4884 }
0x1bd1   :  { %v4898_v46 = vmul.f32 %v7640_v29, %v4876_v33  ;;  %7649 = vrcp.f32 %v4885_v3  ;;  %v4882_v22 = vpop.xlane.xlu0 %4881 }
0x1bd2   :  { %v4907_v42 = vsub.f32 2.0, %v4899_v11  ;;  %7651 = vrcp.f32 %v4882_v22 }
0x1bd3   :  { %v7642_v20 = vpop.eup %7641  ;;  %v4906_v41 = vsub.f32 2.0, %v4898_v46 }
0x1bd4   :  { %v7644_v34 = vpop.eup %7643  ;;  %v4915_v6 = vmul.f32 %v7638_v52, %v4907_v42  ;;  %v4895_v7 = vmul.f32 %v7642_v20, %v4867_v40 }
0x1bd5   :  { %v4914_v25 = vmul.f32 %v7640_v29, %v4906_v41  ;;  %v4894_v28 = vmul.f32 %v7644_v34, %v4864_v59  ;;  %v8541_v59 = vld [vmem:[%s8741_s2 + $0x160] sm:$0xff] }
0x1bd6   :  { %v4903_v36 = vsub.f32 2.0, %v4895_v7  ;;  %v4923_v58 = vmul.f32 %v7622_v49, %v4915_v6  ;;  %v8556_v7 = vld [vmem:[%s8741_s2 + $0x170] sm:$0xff] }
0x1bd7   :  { %v7646_v5 = vpop.eup %7645  ;;  %v4922_v37 = vmul.f32 %v7624_v57, %v4914_v25  ;;  %v4902_v14 = vsub.f32 2.0, %v4894_v28 }
0x1bd8   :  { %v7648_v61 = vpop.eup %7647  ;;  %v4911_v27 = vmul.f32 %v7642_v20, %v4903_v36  ;;  %v4897_v51 = vmul.f32 %v7646_v5, %v4873_v53 }
0x1bd9   :  { %v4910_v48 = vmul.f32 %v7644_v34, %v4902_v14  ;;  %v4896_v55 = vmul.f32 %v7648_v61, %v4870_v50  ;;  %7370 = vmatprep.mubr.msk.f32.mxu0 %vm244_vm2, %v4922_v37  ;;  %v8550_v34 = vld [vmem:[%s8741_s2 + $0x168] sm:$0xff] }
0x1bda   :  { %v4905_v44 = vsub.f32 2.0, %v4897_v51  ;;  %7371 = vmatmul.mubr.msk.f32.vlgmr.msra.gmra.mrb[68].mxu0 %vm244_vm2, %v4923_v58  ;;  %v4919_v1 = vmul.f32 %v8495_v63, %v4911_v27  ;;  %v4364_v51 = vadd.f32 %v8461_v62, %v8093_v35 }
0x1bdb   :  { %v7650_v16 = vpop.eup %7649  ;;  %v4918_v8 = vmul.f32 %v7628_v0, %v4910_v48  ;;  %v4904_v56 = vsub.f32 2.0, %v4896_v55 }
0x1bdc   :  { %v7652_v24 = vpop.eup %7651  ;;  %v4913_v12 = vmul.f32 %v7646_v5, %v4905_v44  ;;  %v4901_v57 = vmul.f32 %v7650_v16, %v4885_v3  ;;  %v4368_v44 = vadd.f32 %v4364_v51, %v8417_v31 }
0x1bdd   :  { %v4912_v13 = vmul.f32 %v7648_v61, %v4904_v56  ;;  %v4900_v26 = vmul.f32 %v7652_v24, %v4882_v22  ;;  %7362 = vmatprep.mubr.msk.f32.mxu1 %vm244_vm2, %v4918_v8  ;;  %v4359_v61 = vadd.f32 %v8463_v4, %v8093_v35  ;;  %v37_v4 = vld [vmem:[%s8741_s2 + $0xb0] sm:$0xff]  ;;  %v5137_v35 = vrot.slane %v8440_v2, %v7939_v39 }
0x1bde   :  { %v4909_v49 = vsub.f32 2.0, %v4901_v57  ;;  %7363 = vmatmul.mubr.msk.f32.vlgmr.msra.gmra.mrb[62].mxu1 %vm244_vm2, %v4919_v1  ;;  %v4921_v43 = vmul.f32 %v8500_v32, %v4913_v12  ;;  %v36_v32 = vld [vmem:[%s8741_s2 + $0xa8] sm:$0xff] }
0x1bdf   :  { %v4920_v54 = vmul.f32 %v8502_v60, %v4912_v13  ;;  %v4908_v47 = vsub.f32 2.0, %v4900_v26  ;;  %v33_v60 = vld [vmem:[%s8741_s2 + $0x90] sm:$0xff]  ;;  %v4367_v55 = vadd.f32 %v4359_v61, %v8414_v38  ;;  %v8579_v38 = vld [vmem:[%s8741_s2 + $0xc0] sm:$0xf] }
0x1be0   :  { %v4917_v33 = vmul.f32 %v7650_v16, %v4909_v49  ;;  %7376 = vmatprep.subr.mxu1 %v33_v60  ;;  %v5309_v31 = vrot.slane %v8579_v38, %v7803_v19 }
0x1be1   :  { %v4916_v0 = vmul.f32 %v7652_v24, %v4908_v47  ;;  %7365 = vmatprep.mubr.msk.f32.mxu1 %vm244_vm2, %v4920_v54  ;;  %7377 = vmatpush3.msra.mxu1 %v33_v60  ;;  %v5394_v54 = vrot.slane %v8579_v38, %v7819_v23 }
0x1be2   :  { %7366 = vmatmul.mubr.msk.f32.gmra.mrb[64].mxu1 %vm244_vm2, %v4921_v43  ;;  %v4925_v40 = vmul.f32 %v8508_v17, %v4917_v33  ;;  %7386 = vmatprep.subr.mxu1 %v36_v32 }
0x1be3   :  { %v4924_v63 = vmul.f32 %v8510_v30, %v4916_v0  ;;  %v35_v30 = vld [vmem:[%s8741_s2 + $0xa0] sm:$0xff] }
0x1be4   :  { %7381 = vmatprep.subr.mxu0 %v35_v30 }
0x1be5   :  { %7373 = vmatprep.mubr.msk.f32.mxu0 %vm244_vm2, %v4924_v63  ;;  %7382 = vmatpush3.msra.mxu0 %v35_v30 }
0x1be6   :  { %7374 = vmatmul.mubr.msk.f32.gmra.mrb[70].mxu0 %vm244_vm2, %v4925_v40  ;;  %7391 = vmatprep.subr.mxu0 %v37_v4 }
0x1cad   :  { %v7372_v17 = vpop.f32.mrb[68].mxu0 }
0x1cae   :  { %v5125_v53 = vmul.f32 %v8541_v59, %v7372_v17  ;;  %v5101_v50 = vpop.f32.mrb[69].mxu0 }
0x1caf   :  { %v5124_v52 = vmul.f32 %v8453_v21, %v5101_v50 }
0x1cb1   :  { %v5129_v29 = vadd.f32 %v5125_v53, %v5124_v52  ;;  %v7364_v11 = vpop.f32.mrb[62].mxu1 }
0x1cb2   :  { %v5121_v3 = vmul.f32 %v8541_v59, %v7364_v11  ;;  %v5004_v46 = vpop.f32.mrb[63].mxu1 }
0x1cb3   :  { %v5120_v22 = vmul.f32 %v8453_v21, %v5004_v46 }
0x1cb5   :  { %v5128_v42 = vadd.f32 %v5121_v3, %v5120_v22  ;;  %v7367_v20 = vpop.f32.mrb[64].mxu1 }
0x1cb6   :  { %v5014_v41 = vpop.f32.mrb[65].mxu1  ;;  %v5123_v25 = vmul.f32 %v8556_v7, %v7367_v20 }
0x1cb7   :  { %v5122_v6 = vmul.f32 %v8550_v34, %v5014_v41 }
0x1cb9   :  { %v5130_v28 = vadd.f32 %v5128_v42, %v5122_v6  ;;  %v7375_v36 = vpop.f32.mrb[70].mxu0 }
0x1cba   :  { %v5111_v5 = vpop.f32.mrb[71].mxu0  ;;  %v5127_v58 = vmul.f32 %v8556_v7, %v7375_v36 }
0x1cbb   :  { %v5132_v37 = vadd.f32 %v5130_v28, %v5123_v25  ;;  %v5126_v14 = vmul.f32 %v8550_v34, %v5111_v5 }
0x1cbd   :  { %v5131_v27 = vadd.f32 %v5129_v29, %v5126_v14  ;;  %7378 = vmatprep.mubr.msk.f32.mxu1 %vm244_vm2, %v5132_v37 }
0x1cbf   :  { %v5133_v48 = vadd.f32 %v5131_v27, %v5127_v58 }
0x1cc1   :  { %7379 = vmatmul.mubr.msk.f32.vlgmr.msra.gmra.mrb[66].mxu1 %vm244_vm2, %v5133_v48 }
0x1cc2   :  { %7388 = vmatprep.mubr.msk.f32.mxu1 %vm244_vm2, %v4367_v55  ;;  %7387 = vmatpush3.msra.mxu1 %v36_v32 }
0x1cc5   :  { %7389 = vmatmul.mubr.msk.f32.vlgmr.msra.gmra.mrb[68].mxu1 %vm244_vm2, %v4368_v44 }
0x1d94   :  { %v7380_v62 = vpop.f32.mrb[66].mxu1 }
0x1d95   :  { %v5216_v16 = vadd.f32 %v7380_v62, %v5137_v35  ;;  %v5210_v8 = vpop.f32.mrb[67].mxu1 }
0x1d96   :  { %v5211_v56 = vadd.f32 %v5210_v8, %v5137_v35 }
0x1d97   :  { %v8584_v24 = vadd.f32 %v7768_v9, %v5216_v16  ;;  %v5224_v9 = vrot.slane %v8579_v38, %v7800_v18 }
0x1d98   :  { %v8587_v1 = vadd.f32 %v5211_v56, %v7770_v10  ;;  %v7390_v12 = vpop.f32.mrb[68].mxu1 }
0x1d99   :  { %v5388_v2 = vadd.f32 %v7390_v12, %v5309_v31  ;;  %v5382_v57 = vpop.f32.mrb[69].mxu1 }
0x1d9a   :  { %v5383_v13 = vadd.f32 %v5382_v57, %v5309_v31  ;;  %7383 = vmatprep.mubr.msk.f32.mxu0 %vm244_vm2, %v8587_v1 }
0x1d9b   :  { %7384 = vmatmul.mubr.msk.f32.vlgmr.msra.gmra.mrb[72].mxu0 %vm244_vm2, %v8584_v24 }
0x1d9c   :  { %7392 = vmatpush3.msra.mxu0 %v37_v4  ;;  %7393 = vmatprep.mubr.msk.f32.mxu0 %vm244_vm2, %v4367_v55 }
0x1d9d   :  { %7396 = vmatprep.subr.msk.mxu1 %vm244_vm2, %v5383_v13  ;;  %7404 = vmatprep.subr.msk.mxu0 %vm244_vm2, %v5388_v2 }
0x1d9e   :  { %7397 = vmatpush3.xpose.msk.msra.mxu1 %vm244_vm2, %v5383_v13 }
0x1d9f   :  { %7394 = vmatmul.mubr.msk.f32.vlgmr.msra.gmra.mrb[74].mxu0 %vm244_vm2, %v4368_v44 }
0x1da3   :  { %7405 = vmatpush3.xpose.msk.msra.mxu0 %vm244_vm2, %v5388_v2 }
0x1e6e   :  { %v7385_v10 = vpop.f32.mrb[72].mxu0 }
0x1e6f   :  { %v5303_v26 = vadd.f32 %v7385_v10, %v5224_v9  ;;  %v5297_v49 = vpop.f32.mrb[73].mxu0 }
0x1e70   :  { %v5298_v47 = vadd.f32 %v5297_v49, %v5224_v9 }
0x1e71   :  { %v5475_v43 = vmul.f32 %v8541_v59, %v5303_v26  ;;  %v5474_v33 = vmul.f32 %v8453_v21, %v5303_v26  ;;  %v5476_v30 = vmul.f32 %v8550_v34, %v5303_v26  ;;  %v5477_v53 = vmul.f32 %v8556_v7, %v5303_v26 }
0x1e72   :  { %v5471_v0 = vmul.f32 %v8541_v59, %v5298_v47  ;;  %v7395_v63 = vpop.f32.mrb[74].mxu0  ;;  %v5470_v40 = vmul.f32 %v8453_v21, %v5298_v47  ;;  %v5472_v23 = vmul.f32 %v8550_v34, %v5298_v47  ;;  %v5473_v50 = vmul.f32 %v8556_v7, %v5298_v47 }
0x1e73   :  { %v5467_v60 = vadd.f32 %v7395_v63, %v5394_v54  ;;  %v5461_v32 = vpop.f32.mrb[75].mxu0  ;;  %7406 = vmatprep.mubr.msk.f32.mxu0 %vm244_vm2, %v5474_v33 }
0x1e74   :  { %v5462_v17 = vadd.f32 %v5461_v32, %v5394_v54  ;;  %7398 = vmatprep.mubr.msk.f32.mxu1 %vm244_vm2, %v5470_v40  ;;  %7407 = vmatmul.mubr.msk.f32.vlgmr.msra.gmra.mrb[76].mxu0 %vm244_vm2, %v5475_v43 }
0x1e75   :  { %7399 = vmatmul.mubr.msk.f32.vlgmr.msra.gmra.mrb[70].mxu1 %vm244_vm2, %v5471_v0  ;;  %7409 = vmatprep.mubr.msk.f32.mxu0 %vm244_vm2, %v5476_v30 }
0x1e76   :  { %7420 = vmatprep.subr.mxu0 %v5467_v60  ;;  %7401 = vmatprep.mubr.msk.f32.mxu1 %vm244_vm2, %v5472_v23 }
0x1e77   :  { %7412 = vmatprep.subr.mxu1 %v5462_v17  ;;  %7421 = vmatpush3.msra.mxu0 %v5467_v60 }
0x1e78   :  { %7413 = vmatpush3.msra.mxu1 %v5462_v17  ;;  %7410 = vmatmul.mubr.msk.f32.gmra.mrb[78].mxu0 %vm244_vm2, %v5477_v53 }
0x1e79   :  { %7402 = vmatmul.mubr.msk.f32.gmra.mrb[72].mxu1 %vm244_vm2, %v5473_v50 }
0x1f47   :  { %v7408_v52 = vpop.f32.mrb[76].mxu0 }
0x1f48   :  { %v7400_v29 = vpop.f32.mrb[70].mxu1  ;;  %v5659_v11 = vpop.f32.mrb[77].mxu0  ;;  %v5693_v3 = vsel %vm244_vm2, %v7408_v52, -inf }
0x1f49   :  { %5694 = vmax.xlane.f32.xlu1 %v5693_v3  ;;  %v5559_v46 = vpop.f32.mrb[71].mxu1  ;;  %v5690_v22 = vsel %vm244_vm2, %v5659_v11, -inf  ;;  %v5681_v6 = vsel %vm244_vm2, %v7400_v29, -inf }
0x1f4a   :  { %5691 = vmax.xlane.f32.xlu0 %v5690_v22  ;;  %v5678_v28 = vsel %vm244_vm2, %v5559_v46, -inf }
0x1f4b   :  { %v7411_v42 = vpop.f32.mrb[78].mxu0 }
0x1f4c   :  { %v7403_v20 = vpop.f32.mrb[72].mxu1  ;;  %v5669_v41 = vpop.f32.mrb[79].mxu0  ;;  %v5699_v37 = vsel %vm244_vm2, %v7411_v42, -inf }
0x1f4d   :  { %5682 = vmax.xlane.f32.xlu1 %v5681_v6  ;;  %v5569_v25 = vpop.f32.mrb[73].mxu1  ;;  %v5687_v36 = vsel %vm244_vm2, %v7403_v20, -inf  ;;  %v5696_v14 = vsel %vm244_vm2, %v5669_v41, -inf }
0x1f4e   :  { %5679 = vmax.xlane.f32.xlu0 %v5678_v28  ;;  %v5684_v5 = vsel %vm244_vm2, %v5569_v25, -inf }
0x1f51   :  { %5688 = vmax.xlane.f32.xlu1 %v5687_v36 }
0x1f52   :  { %5685 = vmax.xlane.f32.xlu0 %v5684_v5 }
0x1f55   :  { %5700 = vmax.xlane.f32.xlu1 %v5699_v37 }
0x1f56   :  { %5697 = vmax.xlane.f32.xlu0 %v5696_v14 }
0x1fd6   :  { %v5695_v61 = vpop.xlane.xlu1 %5694 }
0x1fd7   :  { %v5707_v58 = vsub.f32 %v7408_v52, %v5695_v61  ;;  %v5692_v27 = vpop.xlane.xlu0 %5691 }
0x1fd8   :  { %v5706_v51 = vsub.f32 %v5659_v11, %v5692_v27 }
0x1fd9   :  { %v5720_v48 = vmul.f32 1.442695, %v5707_v58 }
0x1fda   :  { %v5718_v55 = vmul.f32 1.442695, %v5706_v51  ;;  %v5683_v44 = vpop.xlane.xlu1 %5682 }
0x1fdb   :  { %7653 = vpow2.f32 %v5720_v48  ;;  %v5703_v4 = vsub.f32 %v7400_v29, %v5683_v44  ;;  %v5680_v35 = vpop.xlane.xlu0 %5679 }
0x1fdc   :  { %7655 = vpow2.f32 %v5718_v55  ;;  %v5702_v62 = vsub.f32 %v5559_v46, %v5680_v35 }
0x1fdd   :  { %v5712_v16 = vmul.f32 1.442695, %v5703_v4 }
0x1fde   :  { %v5710_v8 = vmul.f32 1.442695, %v5702_v62  ;;  %v5689_v31 = vpop.xlane.xlu1 %5688 }
0x1fdf   :  { %7657 = vpow2.f32 %v5712_v16  ;;  %v5705_v56 = vsub.f32 %v7403_v20, %v5689_v31  ;;  %v5686_v12 = vpop.xlane.xlu0 %5685 }
0x1fe0   :  { %7659 = vpow2.f32 %v5710_v8  ;;  %v5704_v2 = vsub.f32 %v5569_v25, %v5686_v12 }
0x1fe1   :  { %v5716_v57 = vmul.f32 1.442695, %v5705_v56 }
0x1fe2   :  { %v5714_v13 = vmul.f32 1.442695, %v5704_v2  ;;  %v5701_v9 = vpop.xlane.xlu1 %5700 }
0x1fe3   :  { %7661 = vpow2.f32 %v5716_v57  ;;  %v5709_v10 = vsub.f32 %v7411_v42, %v5701_v9  ;;  %v5698_v26 = vpop.xlane.xlu0 %5697 }
0x1fe4   :  { %7663 = vpow2.f32 %v5714_v13  ;;  %v5708_v49 = vsub.f32 %v5669_v41, %v5698_v26 }
0x1fe5   :  { %v7654_v54 = vpop.eup %7653  ;;  %v5724_v47 = vmul.f32 1.442695, %v5709_v10 }
0x1fe6   :  { %v7656_v43 = vpop.eup %7655  ;;  %v5722_v33 = vmul.f32 1.442695, %v5708_v49  ;;  %v5741_v0 = vsel %vm244_vm2, %v7654_v54, 0.0 }
0x1fe7   :  { %7665 = vpow2.f32 %v5724_v47  ;;  %5742 = vadd.xlane.f32.xlu1 %v5741_v0  ;;  %v5738_v63 = vsel %vm244_vm2, %v7656_v43, 0.0 }
0x1fe8   :  { %7667 = vpow2.f32 %v5722_v33  ;;  %5739 = vadd.xlane.f32.xlu0 %v5738_v63 }
0x1fe9   :  { %v8629_v40 = vpop.eup %7657 }
0x1fea   :  { %v7660_v60 = vpop.eup %7659  ;;  %v5729_v32 = vsel %vm244_vm2, %v8629_v40, 0.0 }
0x1feb   :  { %5730 = vadd.xlane.f32.xlu1 %v5729_v32  ;;  %v5726_v30 = vsel %vm244_vm2, %v7660_v60, 0.0 }
0x1fec   :  { %5727 = vadd.xlane.f32.xlu0 %v5726_v30 }
0x1fed   :  { %v8634_v17 = vpop.eup %7661 }
0x1fee   :  { %v8636_v23 = vpop.eup %7663  ;;  %v5735_v53 = vsel %vm244_vm2, %v8634_v17, 0.0 }
0x1fef   :  { %5736 = vadd.xlane.f32.xlu1 %v5735_v53  ;;  %v5732_v50 = vsel %vm244_vm2, %v8636_v23, 0.0 }
0x1ff0   :  { %5733 = vadd.xlane.f32.xlu0 %v5732_v50 }
0x1ff1   :  { %v8642_v52 = vpop.eup %7665 }
0x1ff2   :  { %v8644_v29 = vpop.eup %7667  ;;  %v5747_v11 = vsel %vm244_vm2, %v8642_v52, 0.0 }
0x1ff3   :  { %5748 = vadd.xlane.f32.xlu1 %v5747_v11  ;;  %v5744_v3 = vsel %vm244_vm2, %v8644_v29, 0.0 }
0x1ff4   :  { %5745 = vadd.xlane.f32.xlu0 %v5744_v3 }
0x2074   :  { %v5743_v46 = vpop.xlane.xlu1 %5742 }
0x2075   :  { %7669 = vrcp.f32 %v5743_v46  ;;  %v5740_v22 = vpop.xlane.xlu0 %5739 }
0x2076   :  { %7671 = vrcp.f32 %v5740_v22 }
0x2078   :  { %v5731_v42 = vpop.xlane.xlu1 %5730 }
0x2079   :  { %7673 = vrcp.f32 %v5731_v42  ;;  %v5728_v20 = vpop.xlane.xlu0 %5727 }
0x207a   :  { %7675 = vrcp.f32 %v5728_v20 }
0x207c   :  { %v5737_v41 = vpop.xlane.xlu1 %5736 }
0x207d   :  { %7677 = vrcp.f32 %v5737_v41  ;;  %v5734_v6 = vpop.xlane.xlu0 %5733 }
0x207e   :  { %7679 = vrcp.f32 %v5734_v6 }
0x207f   :  { %v7670_v25 = vpop.eup %7669 }
0x2080   :  { %v7672_v28 = vpop.eup %7671  ;;  %v5763_v36 = vmul.f32 %v7670_v25, %v5743_v46  ;;  %v5749_v5 = vpop.xlane.xlu1 %5748 }
0x2081   :  { %v5762_v37 = vmul.f32 %v7672_v28, %v5740_v22  ;;  %7681 = vrcp.f32 %v5749_v5  ;;  %v5746_v14 = vpop.xlane.xlu0 %5745 }
0x2082   :  { %v5771_v61 = vsub.f32 2.0, %v5763_v36  ;;  %7683 = vrcp.f32 %v5746_v14 }
0x2083   :  { %v7674_v58 = vpop.eup %7673  ;;  %v5770_v27 = vsub.f32 2.0, %v5762_v37 }
0x2084   :  { %v7676_v51 = vpop.eup %7675  ;;  %v5779_v48 = vmul.f32 %v7670_v25, %v5771_v61  ;;  %v5759_v55 = vmul.f32 %v7674_v58, %v5731_v42 }
0x2085   :  { %v5778_v44 = vmul.f32 %v7672_v28, %v5770_v27  ;;  %v5758_v4 = vmul.f32 %v7676_v51, %v5728_v20 }
0x2086   :  { %v5767_v35 = vsub.f32 2.0, %v5759_v55  ;;  %v5787_v56 = vmul.f32 %v7654_v54, %v5779_v48 }
0x2087   :  { %v7678_v62 = vpop.eup %7677  ;;  %v5786_v16 = vmul.f32 %v7656_v43, %v5778_v44  ;;  %v5766_v8 = vsub.f32 2.0, %v5758_v4 }
0x2088   :  { %v7680_v31 = vpop.eup %7679  ;;  %v5775_v12 = vmul.f32 %v7674_v58, %v5767_v35  ;;  %v5761_v2 = vmul.f32 %v7678_v62, %v5737_v41 }
0x2089   :  { %v5774_v57 = vmul.f32 %v7676_v51, %v5766_v8  ;;  %v5760_v13 = vmul.f32 %v7680_v31, %v5734_v6  ;;  %7422 = vmatprep.mubr.msk.f32.mxu0 %vm244_vm2, %v5786_v16 }
0x208a   :  { %v5769_v9 = vsub.f32 2.0, %v5761_v2  ;;  %7423 = vmatmul.mubr.msk.f32.vlgmr.msra.gmra.mrb[80].mxu0 %vm244_vm2, %v5787_v56  ;;  %v5783_v33 = vmul.f32 %v8629_v40, %v5775_v12 }
0x208b   :  { %v7682_v10 = vpop.eup %7681  ;;  %v5782_v26 = vmul.f32 %v7660_v60, %v5774_v57  ;;  %v5768_v49 = vsub.f32 2.0, %v5760_v13 }
0x208c   :  { %v7684_v47 = vpop.eup %7683  ;;  %v5777_v0 = vmul.f32 %v7678_v62, %v5769_v9  ;;  %v5765_v43 = vmul.f32 %v7682_v10, %v5749_v5 }
0x208d   :  { %v5776_v63 = vmul.f32 %v7680_v31, %v5768_v49  ;;  %v5764_v32 = vmul.f32 %v7684_v47, %v5746_v14  ;;  %7414 = vmatprep.mubr.msk.f32.mxu1 %vm244_vm2, %v5782_v26 }
0x208e   :  { %v5773_v54 = vsub.f32 2.0, %v5765_v43  ;;  %7415 = vmatmul.mubr.msk.f32.vlgmr.msra.gmra.mrb[74].mxu1 %vm244_vm2, %v5783_v33  ;;  %v5785_v50 = vmul.f32 %v8634_v17, %v5777_v0  ;;  %v48_v17 = vld [vmem:[%s8741_s2 + $0x108] sm:$0xff]  ;;  %v7710_v43 = vld [vmem:[%s8741_s2 + $0x130] ss:$0 sm:$0xff] }
0x208f   :  { %v5784_v30 = vmul.f32 %v8636_v23, %v5776_v63  ;;  %v5772_v53 = vsub.f32 2.0, %v5764_v32  ;;  %v38_v23 = vld [vmem:[%s8741_s2 + $0xb8] sm:$0xff]  ;;  %7433 = vmatprep.subr.mxu0 %v48_v17 }
0x2090   :  { %v5781_v11 = vmul.f32 %v7682_v10, %v5773_v54  ;;  %7428 = vmatprep.subr.mxu1 %v38_v23  ;;  %7434 = vmatpush3.msra.mxu0 %v48_v17 }
0x2091   :  { %v5780_v60 = vmul.f32 %v7684_v47, %v5772_v53  ;;  %7417 = vmatprep.mubr.msk.f32.mxu1 %vm244_vm2, %v5784_v30  ;;  %7429 = vmatpush3.msra.mxu1 %v38_v23 }
0x2092   :  { %7418 = vmatmul.mubr.msk.f32.gmra.mrb[76].mxu1 %vm244_vm2, %v5785_v50  ;;  %v5789_v3 = vmul.f32 %v8642_v52, %v5781_v11  ;;  %v7709_v52 = vld [vmem:[%s8741_s2 + $0x128] sm:$0xff] }
0x2093   :  { %v5788_v40 = vmul.f32 %v8644_v29, %v5780_v60  ;;  %7445 = vmatprep.subr.mxu0 %v7709_v52 }
0x2095   :  { %7425 = vmatprep.mubr.msk.f32.mxu0 %vm244_vm2, %v5788_v40 }
0x2096   :  { %7426 = vmatmul.mubr.msk.f32.gmra.mrb[82].mxu0 %vm244_vm2, %v5789_v3 }
0x215d   :  { %v7424_v29 = vpop.f32.mrb[80].mxu0 }
0x215e   :  { %v5989_v46 = vmul.f32 %v8541_v59, %v7424_v29  ;;  %v5965_v22 = vpop.f32.mrb[81].mxu0 }
0x215f   :  { %v5988_v42 = vmul.f32 %v8453_v21, %v5965_v22 }
0x2161   :  { %v5993_v20 = vadd.f32 %v5989_v46, %v5988_v42  ;;  %v7416_v41 = vpop.f32.mrb[74].mxu1 }
0x2162   :  { %v5985_v6 = vmul.f32 %v8541_v59, %v7416_v41  ;;  %v5868_v25 = vpop.f32.mrb[75].mxu1 }
0x2163   :  { %v5984_v28 = vmul.f32 %v8453_v21, %v5868_v25  ;;  %v6001_v21 = vrot.slane %v8579_v38, %v7939_v39  ;;  %v50_v39 = vld [vmem:[%s8741_s2 + $0x118] sm:$0xff]  ;;  %v47_v38 = vld [vmem:[%s8741_s2 + $0x120] sm:$0x3] }
0x2164   :  { %v6173_v13 = vrot.slane %v47_v38, %v7803_v19  ;;  %v61_v19 = vld [vmem:[%s8741_s2 + $0x178] sm:$0xf] }
0x2165   :  { %v5992_v36 = vadd.f32 %v5985_v6, %v5984_v28  ;;  %v7419_v5 = vpop.f32.mrb[76].mxu1  ;;  %v63_v28 = vld [vmem:[%s8741_s2 + $0x188] sm:$0xf] }
0x2166   :  { %v5878_v37 = vpop.f32.mrb[77].mxu1  ;;  %v5987_v61 = vmul.f32 %v8556_v7, %v7419_v5 }
0x2167   :  { %v5986_v14 = vmul.f32 %v8550_v34, %v5878_v37 }
0x2169   :  { %v5994_v58 = vadd.f32 %v5992_v36, %v5986_v14  ;;  %v7427_v27 = vpop.f32.mrb[82].mxu0  ;;  %v7711_v36 = vld [vmem:[%s8742_s1] sm:$0xff]  ;;  %v7712_v14 = vld [vmem:[%s8742_s1 + $0x8] sm:$0xff] }
0x216a   :  { %v5975_v51 = vpop.f32.mrb[83].mxu0  ;;  %v5991_v44 = vmul.f32 %v8556_v7, %v7427_v27 }
0x216b   :  { %v5996_v48 = vadd.f32 %v5994_v58, %v5987_v61  ;;  %v5990_v55 = vmul.f32 %v8550_v34, %v5975_v51  ;;  %v49_v34 = vld [vmem:[%s8741_s2 + $0x110] sm:$0xff] }
0x216c   :  { %v7477_v7 = vpack.c.bf16 %v50_v39, %v49_v34 }
0x216d   :  { %v5995_v4 = vadd.f32 %v5993_v20, %v5990_v55  ;;  %7430 = vmatprep.mubr.msk.f32.mxu1 %vm244_vm2, %v5996_v48 }
0x216e   :  { %7478 = vmatprep.subr.bf16.mxu1 %v7477_v7 }
0x216f   :  { %v5997_v59 = vadd.f32 %v5995_v4, %v5991_v44 }
0x2171   :  { %7431 = vmatmul.mubr.msk.f32.vlgmr.msra.gmra.mrb[78].mxu1 %vm244_vm2, %v5997_v59 }
0x2172   :  { %7480 = vmatpush3.bf16.msra.mxu1 %v7477_v7 }
0x2244   :  { %v7432_v35 = vpop.f32.mrb[78].mxu1 }
0x2245   :  { %v6080_v62 = vadd.f32 %v7432_v35, %v6001_v21  ;;  %v6074_v16 = vpop.f32.mrb[79].mxu1 }
0x2246   :  { %v6075_v8 = vadd.f32 %v6074_v16, %v6001_v21 }
0x2247   :  { %v6084_v56 = vadd.f32 %v6080_v62, %v8584_v24  ;;  %v6088_v24 = vrot.slane %v47_v38, %v7800_v18  ;;  %v62_v18 = vld [vmem:[%s8741_s2 + $0x180] sm:$0xf] }
0x2248   :  { %v6083_v31 = vadd.f32 %v6075_v8, %v8587_v1  ;;  %7450 = vmatprep.subr.msk.mxu1 %vm75_vm0, %v62_v18 }
0x224a   :  { %7435 = vmatprep.mubr.msk.f32.mxu0 %vm244_vm2, %v6083_v31 }
0x224b   :  { %7436 = vmatmul.mubr.msk.f32.vlgmr.msra.gmra.mrb[84].mxu0 %vm244_vm2, %v6084_v56 }
0x224c   :  { %7446 = vmatpush3.msra.mxu0 %v7709_v52 }
0x231e   :  { %v7437_v1 = vpop.f32.mrb[84].mxu0 }
0x231f   :  { %v6161_v12 = vpop.f32.mrb[85].mxu0  ;;  %v6167_v57 = vadd.f32 %v7437_v1, %v6088_v24 }
0x2320   :  { %v6162_v2 = vadd.f32 %v6161_v12, %v6088_v24 }
0x2322   :  { %7442 = vmatprep.mubr.msk.f32.mxu1 %vm1188_vm3, %v6162_v2 }
0x2323   :  { %7443 = vmatmul.mubr.msk.f32.vlgmr.msra.gmra.mrb[80].mxu1 %vm1188_vm3, %v6167_v57 }
0x2324   :  { %7451 = vmatpush3.msk.msra.mxu1 %vm75_vm0, %v62_v18 }
0x2325   :  { %7455 = vmatprep.subr.msk.mxu1 %vm75_vm0, %v61_v19 }
0x23f6   :  { %v7444_v9 = vpop.f32.mrb[80].mxu1 }
0x23f7   :  { %v6252_v10 = vadd.f32 %v7444_v9, %v6173_v13  ;;  %v6246_v26 = vpop.f32.mrb[81].mxu1 }
0x23f8   :  { %v6247_v49 = vadd.f32 %v6246_v26, %v6173_v13 }
0x23f9   :  { %v6256_v33 = vadd.f32 %v6252_v10, %v6084_v56 }
0x23fa   :  { %v6255_v47 = vadd.f32 %v6247_v49, %v6083_v31 }
0x23fc   :  { %7447 = vmatprep.mubr.msk.f32.mxu0 %vm244_vm2, %v6255_v47 }
0x23fd   :  { %7448 = vmatmul.mubr.msk.f32.vlgmr.msra.gmra.mrb[86].mxu0 %vm244_vm2, %v6256_v33 }
0x24d0   :  { %v7449_v0 = vpop.f32.mrb[86].mxu0 }
0x24d1   :  { %v6335_v63 = vadd.f32 %v7710_v43, %v7449_v0  ;;  %v6329_v32 = vpop.f32.mrb[87].mxu0 }
0x24d2   :  { %v6330_v54 = vadd.f32 %v7710_v43, %v6329_v32 }
0x24d3   :  { %v6811_v30 = vclamps-f32 %v6335_v63, 60.0 }
0x24d4   :  { %v6810_v53 = vclamps-f32 %v6330_v54, 60.0 }
0x24d5   :  { %v6343_v50 = vsub.f32 0.0, %v6811_v30 }
0x24d6   :  { %v6342_v11 = vsub.f32 0.0, %v6810_v53 }
0x24d7   :  { %v6346_v60 = vmul.f32 1.442695, %v6343_v50 }
0x24d8   :  { %v6344_v40 = vmul.f32 1.442695, %v6342_v11 }
0x24d9   :  { %7685 = vpow2.f32 %v6346_v60 }
0x24da   :  { %7687 = vpow2.f32 %v6344_v40 }
0x24e3   :  { %v7686_v3 = vpop.eup %7685 }
0x24e4   :  { %v7688_v23 = vpop.eup %7687  ;;  %v6349_v17 = vadd.f32 1.0, %v7686_v3 }
0x24e5   :  { %v6348_v52 = vadd.f32 1.0, %v7688_v23 }
0x24e6   :  { %7689 = vrcp.f32 %v6349_v17 }
0x24e7   :  { %7691 = vrcp.f32 %v6348_v52 }
0x24f0   :  { %v7690_v29 = vpop.eup %7689 }
0x24f1   :  { %v7692_v46 = vpop.eup %7691  ;;  %v6353_v22 = vmul.f32 %v7690_v29, %v6349_v17 }
0x24f2   :  { %v6352_v42 = vmul.f32 %v7692_v46, %v6348_v52 }
0x24f3   :  { %v6355_v20 = vsub.f32 2.0, %v6353_v22 }
0x24f4   :  { %v6354_v41 = vsub.f32 2.0, %v6352_v42 }
0x24f5   :  { %v6357_v25 = vmul.f32 %v7690_v29, %v6355_v20 }
0x24f6   :  { %v6356_v6 = vmul.f32 %v7692_v46, %v6354_v41 }
0x24f8   :  { %7452 = vmatprep.mubr.msk.f32.mxu1 %vm68_vm1, %v6356_v6  ;;  %v6358_v5 = vsub.f32 %v6356_v6, %v7711_v36 }
0x24f9   :  { %7453 = vmatmul.mubr.msk.f32.vlgmr.msra.gmra.mrb[82].mxu1 %vm68_vm1, %v6357_v25 }
0x24fa   :  { %7456 = vmatpush3.msk.msra.mxu1 %vm75_vm0, %v61_v19  ;;  %7457 = vmatprep.mubr.msk.f32.mxu1 %vm68_vm1, %v8279_v45  ;;  %v6360_v37 = vmul.f32 %v6358_v5, %v6358_v5  ;;  %v6359_v45 = vsub.f32 %v6357_v25, %v7712_v14 }
0x24fb   :  { %7460 = vmatprep.subr.msk.mxu1 %vm75_vm0, %v63_v28 }
0x24fc   :  { %v6361_v61 = vmul.f32 %v6359_v45, %v6359_v45 }
0x2501   :  { %7458 = vmatmul.mubr.msk.f32.vlgmr.msra.gmra.mrb[82].mxu1 %vm68_vm1, %v8277_v15 }
0x2502   :  { %7461 = vmatpush3.msk.msra.mxu1 %vm75_vm0, %v63_v28  ;;  %7462 = vmatprep.mubr.msk.f32.mxu1 %vm68_vm1, %v6360_v37 }
0x2509   :  { %7463 = vmatmul.mubr.msk.f32.vlgmr.msra.gmra.mrb[82].mxu1 %vm68_vm1, %v6361_v61 }
0x25dc   :  { %v7464_v58 = vpop.f32.mrb[82].mxu1 }
0x25dd   :  { %6617 = vst [vmem:[%s8744_s3 + $0x8] sm:$0xff] %v7464_v58  ;;  %v6605_v27 = vpop.f32.mrb[83].mxu1 }
0x25de   :  { %6616 = vst [vmem:[%s8744_s3] sm:$0xff] %v6605_v27 }

</bundles_post_ra>
